<compile_context>
chip_gen: v5e
topology: v5e:2x2
jax: 0.10.0
libtpu: 0.0.40
codegen_flags: <defaults>
</compile_context>

<pallas_src>
import numpy as np
import jax
import jax.numpy as jnp
from jax.experimental import pallas as pl
from jax.experimental.pallas import tpu as pltpu

B_TILE = 8   # images per grid step; 8 makes each conv row exactly one sublane tile


# ----------------------------------------------------------------------------
# Fused LeNet kernel: one grid step = B_TILE images end-to-end.
# ----------------------------------------------------------------------------
def _lenet_kernel(x_ref, t1_ref, b1_ref, se1_ref, so1_ref,
                  t2_ref, b2_ref, se2_ref, so2_ref,
                  wf1_ref, bf1_ref, wf2_ref, bf2_ref, wf3_ref, bf3_ref,
                  out_ref,
                  a1_ref, fcin_ref):
    f32 = jnp.float32
    bf16 = jnp.bfloat16
    B = B_TILE

    # ---- conv1 (1->6, 5x5, pad 2) + ReLU + 2x2 maxpool ----------------------
    # x_ref: (1, 32*B, 32) bf16, sublane = padded-row*B + b, lane = padded-col.
    # Processed in two 14-row halves to keep the f32 accumulator small
    # (<= 28 vregs live), each half: 5 aligned row-shifted slices x banded
    # (32,168) weights -> (112, 6*28), then bias/ReLU, width-pool via one-hot
    # matmuls, height-pool via aligned 8-row block maxes into a1_ref.
    for half in range(2):
        y = None
        for kh in range(5):
            r0 = (14 * half + kh) * B
            lhs = x_ref[0, r0:r0 + 14 * B, :]                      # (112, 32) bf16
            d = jnp.dot(lhs, t1_ref[kh], preferred_element_type=f32)
            y = d if y is None else y + d                          # (112, 168) f32
        y = jnp.maximum(y + b1_ref[...], 0.0).astype(bf16)         # bias + ReLU
        pw = jnp.maximum(                                          # width pool
            jnp.dot(y, se1_ref[...], preferred_element_type=f32),
            jnp.dot(y, so1_ref[...], preferred_element_type=f32))  # (112, 84)
        for q in range(7):                                         # height pool
            r0 = 2 * q * B
            blk = jnp.maximum(pw[r0:r0 + B, :], pw[r0 + B:r0 + 2 * B, :])
            i = 7 * half + q
            a1_ref[i * B:(i + 1) * B, :] = blk                     # row = i*8+b

    # ---- conv2 (6->16, 5x5) + ReLU + 2x2 maxpool ----------------------------
    # a1_ref: (14*B, 84) f32, sublane = i*B + b, lane = ci*14 + j.
    # 5 aligned 80-row slices x banded (84,160) weights, accumulated in vregs.
    y2 = None
    for kh in range(5):
        a_kh = a1_ref[kh * B:(kh + 10) * B, :].astype(bf16)        # (80, 84)
        d = jnp.dot(a_kh, t2_ref[kh], preferred_element_type=f32)
        y2 = d if y2 is None else y2 + d                           # (80, 160) f32
    y2 = jnp.maximum(y2 + b2_ref[...], 0.0).astype(bf16)
    pw2 = jnp.maximum(
        jnp.dot(y2, se2_ref[...], preferred_element_type=f32),
        jnp.dot(y2, so2_ref[...], preferred_element_type=f32))     # (80, 80)
    for i2 in range(5):                                            # height pool +
        r0 = 2 * i2 * B                                            # flatten to fc in
        blk = jnp.maximum(pw2[r0:r0 + B, :], pw2[r0 + B:r0 + 2 * B, :])
        fcin_ref[:, i2 * 80:(i2 + 1) * 80] = blk                   # (8, 80)

    # ---- fc1 + ReLU, fc2 + ReLU, fc3 (hidden/output widths padded to 128) ---
    fcin = fcin_ref[...].astype(bf16)                              # (8, 400)
    h = jnp.dot(fcin, wf1_ref[...], preferred_element_type=f32) + bf1_ref[...]
    h = jnp.maximum(h, 0.0).astype(bf16)                           # (8, 128)
    h = jnp.dot(h, wf2_ref[...], preferred_element_type=f32) + bf2_ref[...]
    h = jnp.maximum(h, 0.0).astype(bf16)                           # (8, 128)
    logits = (jnp.dot(h, wf3_ref[...], preferred_element_type=f32)
              + bf3_ref[...])                                      # (8, 128)
    out_ref[0, :, :] = logits


# ----------------------------------------------------------------------------
# Parameter repacking (trace-time only; all constants built outside the kernel)
# ----------------------------------------------------------------------------
def pack_params(p):
    f32, bf16 = jnp.float32, jnp.bfloat16
    cw1 = p["cw1"]                      # (5,5,1,6)  HWIO
    cw2 = p["cw2"]                      # (5,5,6,16) HWIO

    # Banded conv1 weights: t1[kh, wp, co*28 + w] = W1[co, kh, wp - w].
    wp = jnp.arange(32)[:, None]
    w = jnp.arange(28)[None, :]
    kw = wp - w
    valid = (kw >= 0) & (kw < 5)
    kwc = jnp.clip(kw, 0, 4)
    t1 = []
    for kh in range(5):
        m = jnp.where(valid[..., None], cw1[kh, kwc, 0, :], 0.0)   # (32,28,6)
        t1.append(jnp.transpose(m, (0, 2, 1)).reshape(32, 168))
    t1 = jnp.stack(t1, 0).astype(bf16)                             # (5,32,168)

    # Banded conv2 weights: t2[kh, ci*14 + j, co*10 + w2] = W2[co, ci, kh, j - w2].
    j = jnp.arange(14)[:, None]
    w2 = jnp.arange(10)[None, :]
    kw2 = j - w2
    valid2 = (kw2 >= 0) & (kw2 < 5)
    kw2c = jnp.clip(kw2, 0, 4)
    t2 = []
    for kh in range(5):
        m = jnp.where(valid2[..., None, None], cw2[kh, kw2c, :, :], 0.0)  # (14,10,6,16)
        t2.append(jnp.transpose(m, (2, 0, 3, 1)).reshape(84, 160))
    t2 = jnp.stack(t2, 0).astype(bf16)                             # (5,84,160)

    b1 = jnp.repeat(p["cb1"], 28).reshape(1, 168).astype(f32)
    b2 = jnp.repeat(p["cb2"], 10).reshape(1, 160).astype(f32)

    # Constant even/odd width-pool selection matrices (0/1, exact in bf16).
    def pool_sel(C, W):
        r = np.arange(C * W)[:, None]
        c = np.arange(C * (W // 2))[None, :]
        same = (r // W) == (c // (W // 2))
        even = (same & ((r % W) == 2 * (c % (W // 2)))).astype(np.float32)
        odd = (same & ((r % W) == 2 * (c % (W // 2)) + 1)).astype(np.float32)
        return jnp.asarray(even, dtype=bf16), jnp.asarray(odd, dtype=bf16)

    se1, so1 = pool_sel(6, 28)          # (168, 84)
    se2, so2 = pool_sel(16, 10)         # (160, 80)

    # fc1: permute input rows to the kernel's flatten order (i2*80 + co*5 + j2
    # vs. torch's co*25 + i2*5 + j2); pad hidden widths to 128 lanes with zeros.
    i2 = jnp.arange(5)[:, None, None]
    co = jnp.arange(16)[None, :, None]
    j2 = jnp.arange(5)[None, None, :]
    perm = (co * 25 + i2 * 5 + j2).reshape(400)
    wf1 = jnp.pad(p["fw1"][perm, :], ((0, 0), (0, 8))).astype(bf16)     # (400,128)
    bf1 = jnp.pad(p["fb1"], ((0, 0), (0, 8))).astype(f32)               # (1,128)
    wf2 = jnp.pad(p["fw2"], ((0, 8), (0, 44))).astype(bf16)             # (128,128)
    bf2 = jnp.pad(p["fb2"], ((0, 0), (0, 44))).astype(f32)              # (1,128)
    wf3 = jnp.pad(p["fw3"], ((0, 44), (0, 118))).astype(bf16)           # (128,128)
    bf3 = jnp.pad(p["fb3"], ((0, 0), (0, 118))).astype(f32)             # (1,128)

    return dict(t1=t1, b1=b1, se1=se1, so1=so1, t2=t2, b2=b2, se2=se2, so2=so2,
                wf1=wf1, bf1=bf1, wf2=wf2, bf2=bf2, wf3=wf3, bf3=bf3)


# ----------------------------------------------------------------------------
# Forward pass: one pallas_call, grid over batch tiles of B_TILE images.
# ----------------------------------------------------------------------------
@jax.jit
def lenet_forward(x_nchw, pk):
    N = x_nchw.shape[0]
    Np = ((N + B_TILE - 1) // B_TILE) * B_TILE
    G = Np // B_TILE

    x = x_nchw.reshape(N, 28, 28)
    if Np != N:
        x = jnp.pad(x, ((0, Np - N), (0, 0), (0, 0)))
    xpad = jnp.pad(x, ((0, 0), (2, 2), (2, 2)))                    # (Np, 32, 32)
    # Per-tile layout: sublane = padded-row*B_TILE + local-batch, lane = column.
    xr = xpad.reshape(G, B_TILE, 32, 32).transpose(0, 2, 1, 3)
    xr = xr.reshape(G, 32 * B_TILE, 32).astype(jnp.bfloat16)

    out = pl.pallas_call(
        _lenet_kernel,
        out_shape=jax.ShapeDtypeStruct((G, B_TILE, 128), jnp.float32),
        grid=(G,),
        in_specs=[
            pl.BlockSpec((1, 32 * B_TILE, 32), lambda t: (t, 0, 0)),   # images
            pl.BlockSpec((5, 32, 168), lambda t: (0, 0, 0)),           # conv1 banded w
            pl.BlockSpec((1, 168), lambda t: (0, 0)),                  # conv1 bias row
            pl.BlockSpec((168, 84), lambda t: (0, 0)),                 # pool1 even
            pl.BlockSpec((168, 84), lambda t: (0, 0)),                 # pool1 odd
            pl.BlockSpec((5, 84, 160), lambda t: (0, 0, 0)),           # conv2 banded w
            pl.BlockSpec((1, 160), lambda t: (0, 0)),                  # conv2 bias row
            pl.BlockSpec((160, 80), lambda t: (0, 0)),                 # pool2 even
            pl.BlockSpec((160, 80), lambda t: (0, 0)),                 # pool2 odd
            pl.BlockSpec((400, 128), lambda t: (0, 0)),                # fc1 w
            pl.BlockSpec((1, 128), lambda t: (0, 0)),                  # fc1 b
            pl.BlockSpec((128, 128), lambda t: (0, 0)),                # fc2 w
            pl.BlockSpec((1, 128), lambda t: (0, 0)),                  # fc2 b
            pl.BlockSpec((128, 128), lambda t: (0, 0)),                # fc3 w
            pl.BlockSpec((1, 128), lambda t: (0, 0)),                  # fc3 b
        ],
        out_specs=pl.BlockSpec((1, B_TILE, 128), lambda t: (t, 0, 0)),
        scratch_shapes=[
            pltpu.VMEM((14 * B_TILE, 84), jnp.float32),   # conv1 pooled activations
            pltpu.VMEM((B_TILE, 400), jnp.float32),       # flattened fc1 input
        ],
        compiler_params=pltpu.CompilerParams(
            dimension_semantics=("parallel",)),
    )(xr, pk["t1"], pk["b1"], pk["se1"], pk["so1"],
      pk["t2"], pk["b2"], pk["se2"], pk["so2"],
      pk["wf1"], pk["bf1"], pk["wf2"], pk["bf2"], pk["wf3"], pk["bf3"])

    return out.reshape(Np, 128)[:N, :10]


# ----------------------------------------------------------------------------
# Deterministic parameter init (synthetic; PyTorch-like fan-in uniform)
# ----------------------------------------------------------------------------
def init_params(key):
    def u(k, shape, fan_in):
        bound = float(fan_in) ** -0.5
        return jax.random.uniform(k, shape, jnp.float32, -bound, bound)

    ks = jax.random.split(key, 10)
    return {
        "cw1": u(ks[0], (5, 5, 1, 6), 25),      # HWIO
        "cb1": u(ks[1], (6,), 25),
        "cw2": u(ks[2], (5, 5, 6, 16), 150),
        "cb2": u(ks[3], (16,), 150),
        "fw1": u(ks[4], (400, 120), 400),       # (in, out)
        "fb1": u(ks[5], (1, 120), 400),
        "fw2": u(ks[6], (120, 84), 120),
        "fb2": u(ks[7], (1, 84), 120),
        "fw3": u(ks[8], (84, 10), 84),
        "fb3": u(ks[9], (1, 10), 84),
    }


# ----------------------------------------------------------------------------
# Pure-JAX reference (mirrors the PyTorch forward exactly, in f32)
# ----------------------------------------------------------------------------
def lenet_reference(x_nchw, p):
    def conv(x, w_hwio, b, pad):
        w_oihw = jnp.transpose(w_hwio, (3, 2, 0, 1))
        y = jax.lax.conv_general_dilated(
            x, w_oihw, window_strides=(1, 1),
            padding=[(pad, pad), (pad, pad)],
            dimension_numbers=("NCHW", "OIHW", "NCHW"))
        return y + b[None, :, None, None]

    def pool(x):
        return jax.lax.reduce_window(x, -jnp.inf, jax.lax.max,
                                     (1, 1, 2, 2), (1, 1, 2, 2), "VALID")

    y = pool(jax.nn.relu(conv(x_nchw, p["cw1"], p["cb1"], 2)))
    y = pool(jax.nn.relu(conv(y, p["cw2"], p["cb2"], 0)))
    y = y.reshape(y.shape[0], -1)
    y = jax.nn.relu(y @ p["fw1"] + p["fb1"])
    y = jax.nn.relu(y @ p["fw2"] + p["fb2"])
    return y @ p["fw3"] + p["fb3"]


if __name__ == "__main__":
    key = jax.random.PRNGKey(0)
    kx, kp = jax.random.split(key)
    # LeNet's fc1 (16*5*5) pins the spatial size to 28x28, single input channel.
    # 16 images = 2 batch tiles of 8 -> 2 "parallel" grid steps.
    x = jax.random.normal(kx, (16, 1, 28, 28), jnp.float32)
    params = init_params(kp)
    packed = pack_params(params)

    out = jax.block_until_ready(lenet_forward(x, packed))
    assert out.shape == (16, 10), out.shape

    ref = lenet_reference(x, params)
    err = float(jnp.max(jnp.abs(out - ref)))
    # Kernel matmul operands are genuinely bfloat16 (f32 accumulation), so the
    # bf16-level tolerance now matches the actual arithmetic.
    assert jnp.allclose(out, ref, rtol=2e-2, atol=2e-2), f"max abs err {err}"

    print("KERNEL_OK")
</pallas_src>

<mosaic_0001>
module attributes {stable_mosaic.version = 11 : i64} {
  func.func @_lenet_kernel(%arg0: i32, %arg1: memref<1x256x32xbf16, #tpu.memory_space<vmem>>, %arg2: memref<5x32x168xbf16, #tpu.memory_space<vmem>>, %arg3: memref<1x168xf32, #tpu.memory_space<vmem>>, %arg4: memref<168x84xbf16, #tpu.memory_space<vmem>>, %arg5: memref<168x84xbf16, #tpu.memory_space<vmem>>, %arg6: memref<5x84x160xbf16, #tpu.memory_space<vmem>>, %arg7: memref<1x160xf32, #tpu.memory_space<vmem>>, %arg8: memref<160x80xbf16, #tpu.memory_space<vmem>>, %arg9: memref<160x80xbf16, #tpu.memory_space<vmem>>, %arg10: memref<400x128xbf16, #tpu.memory_space<vmem>>, %arg11: memref<1x128xf32, #tpu.memory_space<vmem>>, %arg12: memref<128x128xbf16, #tpu.memory_space<vmem>>, %arg13: memref<1x128xf32, #tpu.memory_space<vmem>>, %arg14: memref<128x128xbf16, #tpu.memory_space<vmem>>, %arg15: memref<1x128xf32, #tpu.memory_space<vmem>>, %arg16: memref<1x8x128xf32, #tpu.memory_space<vmem>>, %arg17: memref<112x84xf32, #tpu.memory_space<vmem>>, %arg18: memref<8x400xf32, #tpu.memory_space<vmem>>) attributes {dimension_semantics = [#tpu.dimension_semantics<parallel>], iteration_bounds = array<i64: 2>, scalar_prefetch = 0 : i64, scratch_operands = 2 : i64, tpu.core_type = #tpu.core_type<tc>, window_params = [{transform_indices = @transform_0, window_bounds = array<i64: 1, 256, 32>}, {pipeline_mode = #tpu.pipeline_mode<synchronous>, transform_indices = @transform_1, window_bounds = array<i64: 5, 32, 168>}, {pipeline_mode = #tpu.pipeline_mode<synchronous>, transform_indices = @transform_2, window_bounds = array<i64: 1, 168>}, {pipeline_mode = #tpu.pipeline_mode<synchronous>, transform_indices = @transform_3, window_bounds = array<i64: 168, 84>}, {pipeline_mode = #tpu.pipeline_mode<synchronous>, transform_indices = @transform_4, window_bounds = array<i64: 168, 84>}, {pipeline_mode = #tpu.pipeline_mode<synchronous>, transform_indices = @transform_5, window_bounds = array<i64: 5, 84, 160>}, {pipeline_mode = #tpu.pipeline_mode<synchronous>, transform_indices = @transform_6, window_bounds = array<i64: 1, 160>}, {pipeline_mode = #tpu.pipeline_mode<synchronous>, transform_indices = @transform_7, window_bounds = array<i64: 160, 80>}, {pipeline_mode = #tpu.pipeline_mode<synchronous>, transform_indices = @transform_8, window_bounds = array<i64: 160, 80>}, {pipeline_mode = #tpu.pipeline_mode<synchronous>, transform_indices = @transform_9, window_bounds = array<i64: 400, 128>}, {pipeline_mode = #tpu.pipeline_mode<synchronous>, transform_indices = @transform_10, window_bounds = array<i64: 1, 128>}, {pipeline_mode = #tpu.pipeline_mode<synchronous>, transform_indices = @transform_11, window_bounds = array<i64: 128, 128>}, {pipeline_mode = #tpu.pipeline_mode<synchronous>, transform_indices = @transform_12, window_bounds = array<i64: 1, 128>}, {pipeline_mode = #tpu.pipeline_mode<synchronous>, transform_indices = @transform_13, window_bounds = array<i64: 128, 128>}, {pipeline_mode = #tpu.pipeline_mode<synchronous>, transform_indices = @transform_14, window_bounds = array<i64: 1, 128>}, {transform_indices = @transform_15, window_bounds = array<i64: 1, 8, 128>}]} {
    %c0 = arith.constant 0 : index
    %c0_0 = arith.constant 0 : index
    %c0_1 = arith.constant 0 : index
    %0 = vector.load %arg1[%c0, %c0_0, %c0_1] : memref<1x256x32xbf16, #tpu.memory_space<vmem>>, vector<1x112x32xbf16>
    %1 = vector.shape_cast %0 : vector<1x112x32xbf16> to vector<112x32xbf16>
    %c0_2 = arith.constant 0 : index
    %c0_3 = arith.constant 0 : index
    %c0_4 = arith.constant 0 : index
    %2 = vector.load %arg2[%c0_2, %c0_3, %c0_4] : memref<5x32x168xbf16, #tpu.memory_space<vmem>>, vector<1x32x168xbf16>
    %3 = vector.shape_cast %2 : vector<1x32x168xbf16> to vector<32x168xbf16>
    %cst = arith.constant dense<0.000000e+00> : vector<112x168xf32>
    %4 = tpu.matmul %1, %3, %cst {dimension_numbers = #tpu.dot_dimension_numbers<[1], [0], [0], [1], [0, 0, 1, 1], [], []>} : vector<112x32xbf16>, vector<32x168xbf16>, vector<112x168xf32> -> vector<112x168xf32>
    %c0_5 = arith.constant 0 : index
    %c8 = arith.constant 8 : index
    %c0_6 = arith.constant 0 : index
    %5 = vector.load %arg1[%c0_5, %c8, %c0_6] : memref<1x256x32xbf16, #tpu.memory_space<vmem>>, vector<1x112x32xbf16>
    %6 = vector.shape_cast %5 : vector<1x112x32xbf16> to vector<112x32xbf16>
    %c1 = arith.constant 1 : index
    %c0_7 = arith.constant 0 : index
    %c0_8 = arith.constant 0 : index
    %7 = vector.load %arg2[%c1, %c0_7, %c0_8] : memref<5x32x168xbf16, #tpu.memory_space<vmem>>, vector<1x32x168xbf16>
    %8 = vector.shape_cast %7 : vector<1x32x168xbf16> to vector<32x168xbf16>
    %cst_9 = arith.constant dense<0.000000e+00> : vector<112x168xf32>
    %9 = tpu.matmul %6, %8, %cst_9 {dimension_numbers = #tpu.dot_dimension_numbers<[1], [0], [0], [1], [0, 0, 1, 1], [], []>} : vector<112x32xbf16>, vector<32x168xbf16>, vector<112x168xf32> -> vector<112x168xf32>
    %10 = arith.addf %4, %9 : vector<112x168xf32>
    %c0_10 = arith.constant 0 : index
    %c16 = arith.constant 16 : index
    %c0_11 = arith.constant 0 : index
    %11 = vector.load %arg1[%c0_10, %c16, %c0_11] : memref<1x256x32xbf16, #tpu.memory_space<vmem>>, vector<1x112x32xbf16>
    %12 = vector.shape_cast %11 : vector<1x112x32xbf16> to vector<112x32xbf16>
    %c2 = arith.constant 2 : index
    %c0_12 = arith.constant 0 : index
    %c0_13 = arith.constant 0 : index
    %13 = vector.load %arg2[%c2, %c0_12, %c0_13] : memref<5x32x168xbf16, #tpu.memory_space<vmem>>, vector<1x32x168xbf16>
    %14 = vector.shape_cast %13 : vector<1x32x168xbf16> to vector<32x168xbf16>
    %cst_14 = arith.constant dense<0.000000e+00> : vector<112x168xf32>
    %15 = tpu.matmul %12, %14, %cst_14 {dimension_numbers = #tpu.dot_dimension_numbers<[1], [0], [0], [1], [0, 0, 1, 1], [], []>} : vector<112x32xbf16>, vector<32x168xbf16>, vector<112x168xf32> -> vector<112x168xf32>
    %16 = arith.addf %10, %15 : vector<112x168xf32>
    %c0_15 = arith.constant 0 : index
    %c24 = arith.constant 24 : index
    %c0_16 = arith.constant 0 : index
    %17 = vector.load %arg1[%c0_15, %c24, %c0_16] : memref<1x256x32xbf16, #tpu.memory_space<vmem>>, vector<1x112x32xbf16>
    %18 = vector.shape_cast %17 : vector<1x112x32xbf16> to vector<112x32xbf16>
    %c3 = arith.constant 3 : index
    %c0_17 = arith.constant 0 : index
    %c0_18 = arith.constant 0 : index
    %19 = vector.load %arg2[%c3, %c0_17, %c0_18] : memref<5x32x168xbf16, #tpu.memory_space<vmem>>, vector<1x32x168xbf16>
    %20 = vector.shape_cast %19 : vector<1x32x168xbf16> to vector<32x168xbf16>
    %cst_19 = arith.constant dense<0.000000e+00> : vector<112x168xf32>
    %21 = tpu.matmul %18, %20, %cst_19 {dimension_numbers = #tpu.dot_dimension_numbers<[1], [0], [0], [1], [0, 0, 1, 1], [], []>} : vector<112x32xbf16>, vector<32x168xbf16>, vector<112x168xf32> -> vector<112x168xf32>
    %22 = arith.addf %16, %21 : vector<112x168xf32>
    %c0_20 = arith.constant 0 : index
    %c32 = arith.constant 32 : index
    %c0_21 = arith.constant 0 : index
    %23 = vector.load %arg1[%c0_20, %c32, %c0_21] : memref<1x256x32xbf16, #tpu.memory_space<vmem>>, vector<1x112x32xbf16>
    %24 = vector.shape_cast %23 : vector<1x112x32xbf16> to vector<112x32xbf16>
    %c4 = arith.constant 4 : index
    %c0_22 = arith.constant 0 : index
    %c0_23 = arith.constant 0 : index
    %25 = vector.load %arg2[%c4, %c0_22, %c0_23] : memref<5x32x168xbf16, #tpu.memory_space<vmem>>, vector<1x32x168xbf16>
    %26 = vector.shape_cast %25 : vector<1x32x168xbf16> to vector<32x168xbf16>
    %cst_24 = arith.constant dense<0.000000e+00> : vector<112x168xf32>
    %27 = tpu.matmul %24, %26, %cst_24 {dimension_numbers = #tpu.dot_dimension_numbers<[1], [0], [0], [1], [0, 0, 1, 1], [], []>} : vector<112x32xbf16>, vector<32x168xbf16>, vector<112x168xf32> -> vector<112x168xf32>
    %28 = arith.addf %22, %27 : vector<112x168xf32>
    %c0_25 = arith.constant 0 : index
    %c0_26 = arith.constant 0 : index
    %29 = vector.load %arg3[%c0_25, %c0_26] : memref<1x168xf32, #tpu.memory_space<vmem>>, vector<1x168xf32>
    %30 = vector.broadcast %29 : vector<1x168xf32> to vector<112x168xf32>
    %31 = arith.addf %28, %30 : vector<112x168xf32>
    %cst_27 = arith.constant 0.000000e+00 : f32
    %32 = vector.broadcast %cst_27 : f32 to vector<112x168xf32>
    %33 = arith.maximumf %31, %32 : vector<112x168xf32>
    %34 = arith.truncf %33 : vector<112x168xf32> to vector<112x168xbf16>
    %c0_28 = arith.constant 0 : index
    %c0_29 = arith.constant 0 : index
    %35 = vector.load %arg4[%c0_28, %c0_29] : memref<168x84xbf16, #tpu.memory_space<vmem>>, vector<168x84xbf16>
    %cst_30 = arith.constant dense<0.000000e+00> : vector<112x84xf32>
    %36 = tpu.matmul %34, %35, %cst_30 {dimension_numbers = #tpu.dot_dimension_numbers<[1], [0], [0], [1], [0, 0, 1, 1], [], []>} : vector<112x168xbf16>, vector<168x84xbf16>, vector<112x84xf32> -> vector<112x84xf32>
    %c0_31 = arith.constant 0 : index
    %c0_32 = arith.constant 0 : index
    %37 = vector.load %arg5[%c0_31, %c0_32] : memref<168x84xbf16, #tpu.memory_space<vmem>>, vector<168x84xbf16>
    %cst_33 = arith.constant dense<0.000000e+00> : vector<112x84xf32>
    %38 = tpu.matmul %34, %37, %cst_33 {dimension_numbers = #tpu.dot_dimension_numbers<[1], [0], [0], [1], [0, 0, 1, 1], [], []>} : vector<112x168xbf16>, vector<168x84xbf16>, vector<112x84xf32> -> vector<112x84xf32>
    %39 = arith.maximumf %36, %38 : vector<112x84xf32>
    %40 = vector.extract_strided_slice %39 {offsets = [0, 0], sizes = [8, 84], strides = [1, 1]} : vector<112x84xf32> to vector<8x84xf32>
    %41 = vector.extract_strided_slice %39 {offsets = [8, 0], sizes = [8, 84], strides = [1, 1]} : vector<112x84xf32> to vector<8x84xf32>
    %42 = arith.maximumf %40, %41 : vector<8x84xf32>
    %c0_34 = arith.constant 0 : index
    %c0_35 = arith.constant 0 : index
    %43 = vector.load %arg17[%c0_34, %c0_35] : memref<112x84xf32, #tpu.memory_space<vmem>>, vector<8x84xf32>
    tpu.vector_store %arg17[%c0_34, %c0_35], %42 {strides = array<i32>} : memref<112x84xf32, #tpu.memory_space<vmem>>, vector<8x84xf32>,
    %44 = vector.extract_strided_slice %39 {offsets = [16, 0], sizes = [8, 84], strides = [1, 1]} : vector<112x84xf32> to vector<8x84xf32>
    %45 = vector.extract_strided_slice %39 {offsets = [24, 0], sizes = [8, 84], strides = [1, 1]} : vector<112x84xf32> to vector<8x84xf32>
    %46 = arith.maximumf %44, %45 : vector<8x84xf32>
    %c8_36 = arith.constant 8 : index
    %c0_37 = arith.constant 0 : index
    %47 = vector.load %arg17[%c8_36, %c0_37] : memref<112x84xf32, #tpu.memory_space<vmem>>, vector<8x84xf32>
    tpu.vector_store %arg17[%c8_36, %c0_37], %46 {strides = array<i32>} : memref<112x84xf32, #tpu.memory_space<vmem>>, vector<8x84xf32>,
    %48 = vector.extract_strided_slice %39 {offsets = [32, 0], sizes = [8, 84], strides = [1, 1]} : vector<112x84xf32> to vector<8x84xf32>
    %49 = vector.extract_strided_slice %39 {offsets = [40, 0], sizes = [8, 84], strides = [1, 1]} : vector<112x84xf32> to vector<8x84xf32>
    %50 = arith.maximumf %48, %49 : vector<8x84xf32>
    %c16_38 = arith.constant 16 : index
    %c0_39 = arith.constant 0 : index
    %51 = vector.load %arg17[%c16_38, %c0_39] : memref<112x84xf32, #tpu.memory_space<vmem>>, vector<8x84xf32>
    tpu.vector_store %arg17[%c16_38, %c0_39], %50 {strides = array<i32>} : memref<112x84xf32, #tpu.memory_space<vmem>>, vector<8x84xf32>,
    %52 = vector.extract_strided_slice %39 {offsets = [48, 0], sizes = [8, 84], strides = [1, 1]} : vector<112x84xf32> to vector<8x84xf32>
    %53 = vector.extract_strided_slice %39 {offsets = [56, 0], sizes = [8, 84], strides = [1, 1]} : vector<112x84xf32> to vector<8x84xf32>
    %54 = arith.maximumf %52, %53 : vector<8x84xf32>
    %c24_40 = arith.constant 24 : index
    %c0_41 = arith.constant 0 : index
    %55 = vector.load %arg17[%c24_40, %c0_41] : memref<112x84xf32, #tpu.memory_space<vmem>>, vector<8x84xf32>
    tpu.vector_store %arg17[%c24_40, %c0_41], %54 {strides = array<i32>} : memref<112x84xf32, #tpu.memory_space<vmem>>, vector<8x84xf32>,
    %56 = vector.extract_strided_slice %39 {offsets = [64, 0], sizes = [8, 84], strides = [1, 1]} : vector<112x84xf32> to vector<8x84xf32>
    %57 = vector.extract_strided_slice %39 {offsets = [72, 0], sizes = [8, 84], strides = [1, 1]} : vector<112x84xf32> to vector<8x84xf32>
    %58 = arith.maximumf %56, %57 : vector<8x84xf32>
    %c32_42 = arith.constant 32 : index
    %c0_43 = arith.constant 0 : index
    %59 = vector.load %arg17[%c32_42, %c0_43] : memref<112x84xf32, #tpu.memory_space<vmem>>, vector<8x84xf32>
    tpu.vector_store %arg17[%c32_42, %c0_43], %58 {strides = array<i32>} : memref<112x84xf32, #tpu.memory_space<vmem>>, vector<8x84xf32>,
    %60 = vector.extract_strided_slice %39 {offsets = [80, 0], sizes = [8, 84], strides = [1, 1]} : vector<112x84xf32> to vector<8x84xf32>
    %61 = vector.extract_strided_slice %39 {offsets = [88, 0], sizes = [8, 84], strides = [1, 1]} : vector<112x84xf32> to vector<8x84xf32>
    %62 = arith.maximumf %60, %61 : vector<8x84xf32>
    %c40 = arith.constant 40 : index
    %c0_44 = arith.constant 0 : index
    %63 = vector.load %arg17[%c40, %c0_44] : memref<112x84xf32, #tpu.memory_space<vmem>>, vector<8x84xf32>
    tpu.vector_store %arg17[%c40, %c0_44], %62 {strides = array<i32>} : memref<112x84xf32, #tpu.memory_space<vmem>>, vector<8x84xf32>,
    %64 = vector.extract_strided_slice %39 {offsets = [96, 0], sizes = [8, 84], strides = [1, 1]} : vector<112x84xf32> to vector<8x84xf32>
    %65 = vector.extract_strided_slice %39 {offsets = [104, 0], sizes = [8, 84], strides = [1, 1]} : vector<112x84xf32> to vector<8x84xf32>
    %66 = arith.maximumf %64, %65 : vector<8x84xf32>
    %c48 = arith.constant 48 : index
    %c0_45 = arith.constant 0 : index
    %67 = vector.load %arg17[%c48, %c0_45] : memref<112x84xf32, #tpu.memory_space<vmem>>, vector<8x84xf32>
    tpu.vector_store %arg17[%c48, %c0_45], %66 {strides = array<i32>} : memref<112x84xf32, #tpu.memory_space<vmem>>, vector<8x84xf32>,
    %c0_46 = arith.constant 0 : index
    %c112 = arith.constant 112 : index
    %c0_47 = arith.constant 0 : index
    %68 = vector.load %arg1[%c0_46, %c112, %c0_47] : memref<1x256x32xbf16, #tpu.memory_space<vmem>>, vector<1x112x32xbf16>
    %69 = vector.shape_cast %68 : vector<1x112x32xbf16> to vector<112x32xbf16>
    %c0_48 = arith.constant 0 : index
    %c0_49 = arith.constant 0 : index
    %c0_50 = arith.constant 0 : index
    %70 = vector.load %arg2[%c0_48, %c0_49, %c0_50] : memref<5x32x168xbf16, #tpu.memory_space<vmem>>, vector<1x32x168xbf16>
    %71 = vector.shape_cast %70 : vector<1x32x168xbf16> to vector<32x168xbf16>
    %cst_51 = arith.constant dense<0.000000e+00> : vector<112x168xf32>
    %72 = tpu.matmul %69, %71, %cst_51 {dimension_numbers = #tpu.dot_dimension_numbers<[1], [0], [0], [1], [0, 0, 1, 1], [], []>} : vector<112x32xbf16>, vector<32x168xbf16>, vector<112x168xf32> -> vector<112x168xf32>
    %c0_52 = arith.constant 0 : index
    %c120 = arith.constant 120 : index
    %c0_53 = arith.constant 0 : index
    %73 = vector.load %arg1[%c0_52, %c120, %c0_53] : memref<1x256x32xbf16, #tpu.memory_space<vmem>>, vector<1x112x32xbf16>
    %74 = vector.shape_cast %73 : vector<1x112x32xbf16> to vector<112x32xbf16>
    %c1_54 = arith.constant 1 : index
    %c0_55 = arith.constant 0 : index
    %c0_56 = arith.constant 0 : index
    %75 = vector.load %arg2[%c1_54, %c0_55, %c0_56] : memref<5x32x168xbf16, #tpu.memory_space<vmem>>, vector<1x32x168xbf16>
    %76 = vector.shape_cast %75 : vector<1x32x168xbf16> to vector<32x168xbf16>
    %cst_57 = arith.constant dense<0.000000e+00> : vector<112x168xf32>
    %77 = tpu.matmul %74, %76, %cst_57 {dimension_numbers = #tpu.dot_dimension_numbers<[1], [0], [0], [1], [0, 0, 1, 1], [], []>} : vector<112x32xbf16>, vector<32x168xbf16>, vector<112x168xf32> -> vector<112x168xf32>
    %78 = arith.addf %72, %77 : vector<112x168xf32>
    %c0_58 = arith.constant 0 : index
    %c128 = arith.constant 128 : index
    %c0_59 = arith.constant 0 : index
    %79 = vector.load %arg1[%c0_58, %c128, %c0_59] : memref<1x256x32xbf16, #tpu.memory_space<vmem>>, vector<1x112x32xbf16>
    %80 = vector.shape_cast %79 : vector<1x112x32xbf16> to vector<112x32xbf16>
    %c2_60 = arith.constant 2 : index
    %c0_61 = arith.constant 0 : index
    %c0_62 = arith.constant 0 : index
    %81 = vector.load %arg2[%c2_60, %c0_61, %c0_62] : memref<5x32x168xbf16, #tpu.memory_space<vmem>>, vector<1x32x168xbf16>
    %82 = vector.shape_cast %81 : vector<1x32x168xbf16> to vector<32x168xbf16>
    %cst_63 = arith.constant dense<0.000000e+00> : vector<112x168xf32>
    %83 = tpu.matmul %80, %82, %cst_63 {dimension_numbers = #tpu.dot_dimension_numbers<[1], [0], [0], [1], [0, 0, 1, 1], [], []>} : vector<112x32xbf16>, vector<32x168xbf16>, vector<112x168xf32> -> vector<112x168xf32>
    %84 = arith.addf %78, %83 : vector<112x168xf32>
    %c0_64 = arith.constant 0 : index
    %c136 = arith.constant 136 : index
    %c0_65 = arith.constant 0 : index
    %85 = vector.load %arg1[%c0_64, %c136, %c0_65] : memref<1x256x32xbf16, #tpu.memory_space<vmem>>, vector<1x112x32xbf16>
    %86 = vector.shape_cast %85 : vector<1x112x32xbf16> to vector<112x32xbf16>
    %c3_66 = arith.constant 3 : index
    %c0_67 = arith.constant 0 : index
    %c0_68 = arith.constant 0 : index
    %87 = vector.load %arg2[%c3_66, %c0_67, %c0_68] : memref<5x32x168xbf16, #tpu.memory_space<vmem>>, vector<1x32x168xbf16>
    %88 = vector.shape_cast %87 : vector<1x32x168xbf16> to vector<32x168xbf16>
    %cst_69 = arith.constant dense<0.000000e+00> : vector<112x168xf32>
    %89 = tpu.matmul %86, %88, %cst_69 {dimension_numbers = #tpu.dot_dimension_numbers<[1], [0], [0], [1], [0, 0, 1, 1], [], []>} : vector<112x32xbf16>, vector<32x168xbf16>, vector<112x168xf32> -> vector<112x168xf32>
    %90 = arith.addf %84, %89 : vector<112x168xf32>
    %c0_70 = arith.constant 0 : index
    %c144 = arith.constant 144 : index
    %c0_71 = arith.constant 0 : index
    %91 = vector.load %arg1[%c0_70, %c144, %c0_71] : memref<1x256x32xbf16, #tpu.memory_space<vmem>>, vector<1x112x32xbf16>
    %92 = vector.shape_cast %91 : vector<1x112x32xbf16> to vector<112x32xbf16>
    %c4_72 = arith.constant 4 : index
    %c0_73 = arith.constant 0 : index
    %c0_74 = arith.constant 0 : index
    %93 = vector.load %arg2[%c4_72, %c0_73, %c0_74] : memref<5x32x168xbf16, #tpu.memory_space<vmem>>, vector<1x32x168xbf16>
    %94 = vector.shape_cast %93 : vector<1x32x168xbf16> to vector<32x168xbf16>
    %cst_75 = arith.constant dense<0.000000e+00> : vector<112x168xf32>
    %95 = tpu.matmul %92, %94, %cst_75 {dimension_numbers = #tpu.dot_dimension_numbers<[1], [0], [0], [1], [0, 0, 1, 1], [], []>} : vector<112x32xbf16>, vector<32x168xbf16>, vector<112x168xf32> -> vector<112x168xf32>
    %96 = arith.addf %90, %95 : vector<112x168xf32>
    %c0_76 = arith.constant 0 : index
    %c0_77 = arith.constant 0 : index
    %97 = vector.load %arg3[%c0_76, %c0_77] : memref<1x168xf32, #tpu.memory_space<vmem>>, vector<1x168xf32>
    %98 = vector.broadcast %97 : vector<1x168xf32> to vector<112x168xf32>
    %99 = arith.addf %96, %98 : vector<112x168xf32>
    %cst_78 = arith.constant 0.000000e+00 : f32
    %100 = vector.broadcast %cst_78 : f32 to vector<112x168xf32>
    %101 = arith.maximumf %99, %100 : vector<112x168xf32>
    %102 = arith.truncf %101 : vector<112x168xf32> to vector<112x168xbf16>
    %c0_79 = arith.constant 0 : index
    %c0_80 = arith.constant 0 : index
    %103 = vector.load %arg4[%c0_79, %c0_80] : memref<168x84xbf16, #tpu.memory_space<vmem>>, vector<168x84xbf16>
    %cst_81 = arith.constant dense<0.000000e+00> : vector<112x84xf32>
    %104 = tpu.matmul %102, %103, %cst_81 {dimension_numbers = #tpu.dot_dimension_numbers<[1], [0], [0], [1], [0, 0, 1, 1], [], []>} : vector<112x168xbf16>, vector<168x84xbf16>, vector<112x84xf32> -> vector<112x84xf32>
    %c0_82 = arith.constant 0 : index
    %c0_83 = arith.constant 0 : index
    %105 = vector.load %arg5[%c0_82, %c0_83] : memref<168x84xbf16, #tpu.memory_space<vmem>>, vector<168x84xbf16>
    %cst_84 = arith.constant dense<0.000000e+00> : vector<112x84xf32>
    %106 = tpu.matmul %102, %105, %cst_84 {dimension_numbers = #tpu.dot_dimension_numbers<[1], [0], [0], [1], [0, 0, 1, 1], [], []>} : vector<112x168xbf16>, vector<168x84xbf16>, vector<112x84xf32> -> vector<112x84xf32>
    %107 = arith.maximumf %104, %106 : vector<112x84xf32>
    %108 = vector.extract_strided_slice %107 {offsets = [0, 0], sizes = [8, 84], strides = [1, 1]} : vector<112x84xf32> to vector<8x84xf32>
    %109 = vector.extract_strided_slice %107 {offsets = [8, 0], sizes = [8, 84], strides = [1, 1]} : vector<112x84xf32> to vector<8x84xf32>
    %110 = arith.maximumf %108, %109 : vector<8x84xf32>
    %c56 = arith.constant 56 : index
    %c0_85 = arith.constant 0 : index
    %111 = vector.load %arg17[%c56, %c0_85] : memref<112x84xf32, #tpu.memory_space<vmem>>, vector<8x84xf32>
    tpu.vector_store %arg17[%c56, %c0_85], %110 {strides = array<i32>} : memref<112x84xf32, #tpu.memory_space<vmem>>, vector<8x84xf32>,
    %112 = vector.extract_strided_slice %107 {offsets = [16, 0], sizes = [8, 84], strides = [1, 1]} : vector<112x84xf32> to vector<8x84xf32>
    %113 = vector.extract_strided_slice %107 {offsets = [24, 0], sizes = [8, 84], strides = [1, 1]} : vector<112x84xf32> to vector<8x84xf32>
    %114 = arith.maximumf %112, %113 : vector<8x84xf32>
    %c64 = arith.constant 64 : index
    %c0_86 = arith.constant 0 : index
    %115 = vector.load %arg17[%c64, %c0_86] : memref<112x84xf32, #tpu.memory_space<vmem>>, vector<8x84xf32>
    tpu.vector_store %arg17[%c64, %c0_86], %114 {strides = array<i32>} : memref<112x84xf32, #tpu.memory_space<vmem>>, vector<8x84xf32>,
    %116 = vector.extract_strided_slice %107 {offsets = [32, 0], sizes = [8, 84], strides = [1, 1]} : vector<112x84xf32> to vector<8x84xf32>
    %117 = vector.extract_strided_slice %107 {offsets = [40, 0], sizes = [8, 84], strides = [1, 1]} : vector<112x84xf32> to vector<8x84xf32>
    %118 = arith.maximumf %116, %117 : vector<8x84xf32>
    %c72 = arith.constant 72 : index
    %c0_87 = arith.constant 0 : index
    %119 = vector.load %arg17[%c72, %c0_87] : memref<112x84xf32, #tpu.memory_space<vmem>>, vector<8x84xf32>
    tpu.vector_store %arg17[%c72, %c0_87], %118 {strides = array<i32>} : memref<112x84xf32, #tpu.memory_space<vmem>>, vector<8x84xf32>,
    %120 = vector.extract_strided_slice %107 {offsets = [48, 0], sizes = [8, 84], strides = [1, 1]} : vector<112x84xf32> to vector<8x84xf32>
    %121 = vector.extract_strided_slice %107 {offsets = [56, 0], sizes = [8, 84], strides = [1, 1]} : vector<112x84xf32> to vector<8x84xf32>
    %122 = arith.maximumf %120, %121 : vector<8x84xf32>
    %c80 = arith.constant 80 : index
    %c0_88 = arith.constant 0 : index
    %123 = vector.load %arg17[%c80, %c0_88] : memref<112x84xf32, #tpu.memory_space<vmem>>, vector<8x84xf32>
    tpu.vector_store %arg17[%c80, %c0_88], %122 {strides = array<i32>} : memref<112x84xf32, #tpu.memory_space<vmem>>, vector<8x84xf32>,
    %124 = vector.extract_strided_slice %107 {offsets = [64, 0], sizes = [8, 84], strides = [1, 1]} : vector<112x84xf32> to vector<8x84xf32>
    %125 = vector.extract_strided_slice %107 {offsets = [72, 0], sizes = [8, 84], strides = [1, 1]} : vector<112x84xf32> to vector<8x84xf32>
    %126 = arith.maximumf %124, %125 : vector<8x84xf32>
    %c88 = arith.constant 88 : index
    %c0_89 = arith.constant 0 : index
    %127 = vector.load %arg17[%c88, %c0_89] : memref<112x84xf32, #tpu.memory_space<vmem>>, vector<8x84xf32>
    tpu.vector_store %arg17[%c88, %c0_89], %126 {strides = array<i32>} : memref<112x84xf32, #tpu.memory_space<vmem>>, vector<8x84xf32>,
    %128 = vector.extract_strided_slice %107 {offsets = [80, 0], sizes = [8, 84], strides = [1, 1]} : vector<112x84xf32> to vector<8x84xf32>
    %129 = vector.extract_strided_slice %107 {offsets = [88, 0], sizes = [8, 84], strides = [1, 1]} : vector<112x84xf32> to vector<8x84xf32>
    %130 = arith.maximumf %128, %129 : vector<8x84xf32>
    %c96 = arith.constant 96 : index
    %c0_90 = arith.constant 0 : index
    %131 = vector.load %arg17[%c96, %c0_90] : memref<112x84xf32, #tpu.memory_space<vmem>>, vector<8x84xf32>
    tpu.vector_store %arg17[%c96, %c0_90], %130 {strides = array<i32>} : memref<112x84xf32, #tpu.memory_space<vmem>>, vector<8x84xf32>,
    %132 = vector.extract_strided_slice %107 {offsets = [96, 0], sizes = [8, 84], strides = [1, 1]} : vector<112x84xf32> to vector<8x84xf32>
    %133 = vector.extract_strided_slice %107 {offsets = [104, 0], sizes = [8, 84], strides = [1, 1]} : vector<112x84xf32> to vector<8x84xf32>
    %134 = arith.maximumf %132, %133 : vector<8x84xf32>
    %c104 = arith.constant 104 : index
    %c0_91 = arith.constant 0 : index
    %135 = vector.load %arg17[%c104, %c0_91] : memref<112x84xf32, #tpu.memory_space<vmem>>, vector<8x84xf32>
    tpu.vector_store %arg17[%c104, %c0_91], %134 {strides = array<i32>} : memref<112x84xf32, #tpu.memory_space<vmem>>, vector<8x84xf32>,
    %c0_92 = arith.constant 0 : index
    %c0_93 = arith.constant 0 : index
    %136 = vector.load %arg17[%c0_92, %c0_93] : memref<112x84xf32, #tpu.memory_space<vmem>>, vector<80x84xf32>
    %137 = arith.truncf %136 : vector<80x84xf32> to vector<80x84xbf16>
    %c0_94 = arith.constant 0 : index
    %c0_95 = arith.constant 0 : index
    %c0_96 = arith.constant 0 : index
    %138 = vector.load %arg6[%c0_94, %c0_95, %c0_96] : memref<5x84x160xbf16, #tpu.memory_space<vmem>>, vector<1x84x160xbf16>
    %139 = vector.shape_cast %138 : vector<1x84x160xbf16> to vector<84x160xbf16>
    %cst_97 = arith.constant dense<0.000000e+00> : vector<80x160xf32>
    %140 = tpu.matmul %137, %139, %cst_97 {dimension_numbers = #tpu.dot_dimension_numbers<[1], [0], [0], [1], [0, 0, 1, 1], [], []>} : vector<80x84xbf16>, vector<84x160xbf16>, vector<80x160xf32> -> vector<80x160xf32>
    %c8_98 = arith.constant 8 : index
    %c0_99 = arith.constant 0 : index
    %141 = vector.load %arg17[%c8_98, %c0_99] : memref<112x84xf32, #tpu.memory_space<vmem>>, vector<80x84xf32>
    %142 = arith.truncf %141 : vector<80x84xf32> to vector<80x84xbf16>
    %c1_100 = arith.constant 1 : index
    %c0_101 = arith.constant 0 : index
    %c0_102 = arith.constant 0 : index
    %143 = vector.load %arg6[%c1_100, %c0_101, %c0_102] : memref<5x84x160xbf16, #tpu.memory_space<vmem>>, vector<1x84x160xbf16>
    %144 = vector.shape_cast %143 : vector<1x84x160xbf16> to vector<84x160xbf16>
    %cst_103 = arith.constant dense<0.000000e+00> : vector<80x160xf32>
    %145 = tpu.matmul %142, %144, %cst_103 {dimension_numbers = #tpu.dot_dimension_numbers<[1], [0], [0], [1], [0, 0, 1, 1], [], []>} : vector<80x84xbf16>, vector<84x160xbf16>, vector<80x160xf32> -> vector<80x160xf32>
    %146 = arith.addf %140, %145 : vector<80x160xf32>
    %c16_104 = arith.constant 16 : index
    %c0_105 = arith.constant 0 : index
    %147 = vector.load %arg17[%c16_104, %c0_105] : memref<112x84xf32, #tpu.memory_space<vmem>>, vector<80x84xf32>
    %148 = arith.truncf %147 : vector<80x84xf32> to vector<80x84xbf16>
    %c2_106 = arith.constant 2 : index
    %c0_107 = arith.constant 0 : index
    %c0_108 = arith.constant 0 : index
    %149 = vector.load %arg6[%c2_106, %c0_107, %c0_108] : memref<5x84x160xbf16, #tpu.memory_space<vmem>>, vector<1x84x160xbf16>
    %150 = vector.shape_cast %149 : vector<1x84x160xbf16> to vector<84x160xbf16>
    %cst_109 = arith.constant dense<0.000000e+00> : vector<80x160xf32>
    %151 = tpu.matmul %148, %150, %cst_109 {dimension_numbers = #tpu.dot_dimension_numbers<[1], [0], [0], [1], [0, 0, 1, 1], [], []>} : vector<80x84xbf16>, vector<84x160xbf16>, vector<80x160xf32> -> vector<80x160xf32>
    %152 = arith.addf %146, %151 : vector<80x160xf32>
    %c24_110 = arith.constant 24 : index
    %c0_111 = arith.constant 0 : index
    %153 = vector.load %arg17[%c24_110, %c0_111] : memref<112x84xf32, #tpu.memory_space<vmem>>, vector<80x84xf32>
    %154 = arith.truncf %153 : vector<80x84xf32> to vector<80x84xbf16>
    %c3_112 = arith.constant 3 : index
    %c0_113 = arith.constant 0 : index
    %c0_114 = arith.constant 0 : index
    %155 = vector.load %arg6[%c3_112, %c0_113, %c0_114] : memref<5x84x160xbf16, #tpu.memory_space<vmem>>, vector<1x84x160xbf16>
    %156 = vector.shape_cast %155 : vector<1x84x160xbf16> to vector<84x160xbf16>
    %cst_115 = arith.constant dense<0.000000e+00> : vector<80x160xf32>
    %157 = tpu.matmul %154, %156, %cst_115 {dimension_numbers = #tpu.dot_dimension_numbers<[1], [0], [0], [1], [0, 0, 1, 1], [], []>} : vector<80x84xbf16>, vector<84x160xbf16>, vector<80x160xf32> -> vector<80x160xf32>
    %158 = arith.addf %152, %157 : vector<80x160xf32>
    %c32_116 = arith.constant 32 : index
    %c0_117 = arith.constant 0 : index
    %159 = vector.load %arg17[%c32_116, %c0_117] : memref<112x84xf32, #tpu.memory_space<vmem>>, vector<80x84xf32>
    %160 = arith.truncf %159 : vector<80x84xf32> to vector<80x84xbf16>
    %c4_118 = arith.constant 4 : index
    %c0_119 = arith.constant 0 : index
    %c0_120 = arith.constant 0 : index
    %161 = vector.load %arg6[%c4_118, %c0_119, %c0_120] : memref<5x84x160xbf16, #tpu.memory_space<vmem>>, vector<1x84x160xbf16>
    %162 = vector.shape_cast %161 : vector<1x84x160xbf16> to vector<84x160xbf16>
    %cst_121 = arith.constant dense<0.000000e+00> : vector<80x160xf32>
    %163 = tpu.matmul %160, %162, %cst_121 {dimension_numbers = #tpu.dot_dimension_numbers<[1], [0], [0], [1], [0, 0, 1, 1], [], []>} : vector<80x84xbf16>, vector<84x160xbf16>, vector<80x160xf32> -> vector<80x160xf32>
    %164 = arith.addf %158, %163 : vector<80x160xf32>
    %c0_122 = arith.constant 0 : index
    %c0_123 = arith.constant 0 : index
    %165 = vector.load %arg7[%c0_122, %c0_123] : memref<1x160xf32, #tpu.memory_space<vmem>>, vector<1x160xf32>
    %166 = vector.broadcast %165 : vector<1x160xf32> to vector<80x160xf32>
    %167 = arith.addf %164, %166 : vector<80x160xf32>
    %cst_124 = arith.constant 0.000000e+00 : f32
    %168 = vector.broadcast %cst_124 : f32 to vector<80x160xf32>
    %169 = arith.maximumf %167, %168 : vector<80x160xf32>
    %170 = arith.truncf %169 : vector<80x160xf32> to vector<80x160xbf16>
    %c0_125 = arith.constant 0 : index
    %c0_126 = arith.constant 0 : index
    %171 = vector.load %arg8[%c0_125, %c0_126] : memref<160x80xbf16, #tpu.memory_space<vmem>>, vector<160x80xbf16>
    %cst_127 = arith.constant dense<0.000000e+00> : vector<80x80xf32>
    %172 = tpu.matmul %170, %171, %cst_127 {dimension_numbers = #tpu.dot_dimension_numbers<[1], [0], [0], [1], [0, 0, 1, 1], [], []>} : vector<80x160xbf16>, vector<160x80xbf16>, vector<80x80xf32> -> vector<80x80xf32>
    %c0_128 = arith.constant 0 : index
    %c0_129 = arith.constant 0 : index
    %173 = vector.load %arg9[%c0_128, %c0_129] : memref<160x80xbf16, #tpu.memory_space<vmem>>, vector<160x80xbf16>
    %cst_130 = arith.constant dense<0.000000e+00> : vector<80x80xf32>
    %174 = tpu.matmul %170, %173, %cst_130 {dimension_numbers = #tpu.dot_dimension_numbers<[1], [0], [0], [1], [0, 0, 1, 1], [], []>} : vector<80x160xbf16>, vector<160x80xbf16>, vector<80x80xf32> -> vector<80x80xf32>
    %175 = arith.maximumf %172, %174 : vector<80x80xf32>
    %176 = vector.extract_strided_slice %175 {offsets = [0, 0], sizes = [8, 80], strides = [1, 1]} : vector<80x80xf32> to vector<8x80xf32>
    %177 = vector.extract_strided_slice %175 {offsets = [8, 0], sizes = [8, 80], strides = [1, 1]} : vector<80x80xf32> to vector<8x80xf32>
    %178 = arith.maximumf %176, %177 : vector<8x80xf32>
    %c0_131 = arith.constant 0 : index
    %c0_132 = arith.constant 0 : index
    %179 = vector.load %arg18[%c0_131, %c0_132] : memref<8x400xf32, #tpu.memory_space<vmem>>, vector<8x80xf32>
    tpu.vector_store %arg18[%c0_131, %c0_132], %178 {strides = array<i32>} : memref<8x400xf32, #tpu.memory_space<vmem>>, vector<8x80xf32>,
    %180 = vector.extract_strided_slice %175 {offsets = [16, 0], sizes = [8, 80], strides = [1, 1]} : vector<80x80xf32> to vector<8x80xf32>
    %181 = vector.extract_strided_slice %175 {offsets = [24, 0], sizes = [8, 80], strides = [1, 1]} : vector<80x80xf32> to vector<8x80xf32>
    %182 = arith.maximumf %180, %181 : vector<8x80xf32>
    %c0_133 = arith.constant 0 : index
    %c80_134 = arith.constant 80 : index
    %183 = vector.load %arg18[%c0_133, %c80_134] : memref<8x400xf32, #tpu.memory_space<vmem>>, vector<8x80xf32>
    tpu.vector_store %arg18[%c0_133, %c80_134], %182 {strides = array<i32>} : memref<8x400xf32, #tpu.memory_space<vmem>>, vector<8x80xf32>,
    %184 = vector.extract_strided_slice %175 {offsets = [32, 0], sizes = [8, 80], strides = [1, 1]} : vector<80x80xf32> to vector<8x80xf32>
    %185 = vector.extract_strided_slice %175 {offsets = [40, 0], sizes = [8, 80], strides = [1, 1]} : vector<80x80xf32> to vector<8x80xf32>
    %186 = arith.maximumf %184, %185 : vector<8x80xf32>
    %c0_135 = arith.constant 0 : index
    %c160 = arith.constant 160 : index
    %187 = vector.load %arg18[%c0_135, %c160] : memref<8x400xf32, #tpu.memory_space<vmem>>, vector<8x80xf32>
    tpu.vector_store %arg18[%c0_135, %c160], %186 {strides = array<i32>} : memref<8x400xf32, #tpu.memory_space<vmem>>, vector<8x80xf32>,
    %188 = vector.extract_strided_slice %175 {offsets = [48, 0], sizes = [8, 80], strides = [1, 1]} : vector<80x80xf32> to vector<8x80xf32>
    %189 = vector.extract_strided_slice %175 {offsets = [56, 0], sizes = [8, 80], strides = [1, 1]} : vector<80x80xf32> to vector<8x80xf32>
    %190 = arith.maximumf %188, %189 : vector<8x80xf32>
    %c0_136 = arith.constant 0 : index
    %c240 = arith.constant 240 : index
    %191 = vector.load %arg18[%c0_136, %c240] : memref<8x400xf32, #tpu.memory_space<vmem>>, vector<8x80xf32>
    tpu.vector_store %arg18[%c0_136, %c240], %190 {strides = array<i32>} : memref<8x400xf32, #tpu.memory_space<vmem>>, vector<8x80xf32>,
    %192 = vector.extract_strided_slice %175 {offsets = [64, 0], sizes = [8, 80], strides = [1, 1]} : vector<80x80xf32> to vector<8x80xf32>
    %193 = vector.extract_strided_slice %175 {offsets = [72, 0], sizes = [8, 80], strides = [1, 1]} : vector<80x80xf32> to vector<8x80xf32>
    %194 = arith.maximumf %192, %193 : vector<8x80xf32>
    %c0_137 = arith.constant 0 : index
    %c320 = arith.constant 320 : index
    %195 = vector.load %arg18[%c0_137, %c320] : memref<8x400xf32, #tpu.memory_space<vmem>>, vector<8x80xf32>
    tpu.vector_store %arg18[%c0_137, %c320], %194 {strides = array<i32>} : memref<8x400xf32, #tpu.memory_space<vmem>>, vector<8x80xf32>,
    %c0_138 = arith.constant 0 : index
    %c0_139 = arith.constant 0 : index
    %196 = vector.load %arg18[%c0_138, %c0_139] : memref<8x400xf32, #tpu.memory_space<vmem>>, vector<8x400xf32>
    %197 = arith.truncf %196 : vector<8x400xf32> to vector<8x400xbf16>
    %c0_140 = arith.constant 0 : index
    %c0_141 = arith.constant 0 : index
    %198 = vector.load %arg10[%c0_140, %c0_141] : memref<400x128xbf16, #tpu.memory_space<vmem>>, vector<400x128xbf16>
    %cst_142 = arith.constant dense<0.000000e+00> : vector<8x128xf32>
    %199 = tpu.matmul %197, %198, %cst_142 {dimension_numbers = #tpu.dot_dimension_numbers<[1], [0], [0], [1], [0, 0, 1, 1], [], []>} : vector<8x400xbf16>, vector<400x128xbf16>, vector<8x128xf32> -> vector<8x128xf32>
    %c0_143 = arith.constant 0 : index
    %c0_144 = arith.constant 0 : index
    %200 = vector.load %arg11[%c0_143, %c0_144] : memref<1x128xf32, #tpu.memory_space<vmem>>, vector<1x128xf32>
    %201 = vector.broadcast %200 : vector<1x128xf32> to vector<8x128xf32>
    %202 = arith.addf %199, %201 : vector<8x128xf32>
    %cst_145 = arith.constant 0.000000e+00 : f32
    %203 = vector.broadcast %cst_145 : f32 to vector<8x128xf32>
    %204 = arith.maximumf %202, %203 : vector<8x128xf32>
    %205 = arith.truncf %204 : vector<8x128xf32> to vector<8x128xbf16>
    %c0_146 = arith.constant 0 : index
    %c0_147 = arith.constant 0 : index
    %206 = vector.load %arg12[%c0_146, %c0_147] : memref<128x128xbf16, #tpu.memory_space<vmem>>, vector<128x128xbf16>
    %cst_148 = arith.constant dense<0.000000e+00> : vector<8x128xf32>
    %207 = tpu.matmul %205, %206, %cst_148 {dimension_numbers = #tpu.dot_dimension_numbers<[1], [0], [0], [1], [0, 0, 1, 1], [], []>} : vector<8x128xbf16>, vector<128x128xbf16>, vector<8x128xf32> -> vector<8x128xf32>
    %c0_149 = arith.constant 0 : index
    %c0_150 = arith.constant 0 : index
    %208 = vector.load %arg13[%c0_149, %c0_150] : memref<1x128xf32, #tpu.memory_space<vmem>>, vector<1x128xf32>
    %209 = vector.broadcast %208 : vector<1x128xf32> to vector<8x128xf32>
    %210 = arith.addf %207, %209 : vector<8x128xf32>
    %cst_151 = arith.constant 0.000000e+00 : f32
    %211 = vector.broadcast %cst_151 : f32 to vector<8x128xf32>
    %212 = arith.maximumf %210, %211 : vector<8x128xf32>
    %213 = arith.truncf %212 : vector<8x128xf32> to vector<8x128xbf16>
    %c0_152 = arith.constant 0 : index
    %c0_153 = arith.constant 0 : index
    %214 = vector.load %arg14[%c0_152, %c0_153] : memref<128x128xbf16, #tpu.memory_space<vmem>>, vector<128x128xbf16>
    %cst_154 = arith.constant dense<0.000000e+00> : vector<8x128xf32>
    %215 = tpu.matmul %213, %214, %cst_154 {dimension_numbers = #tpu.dot_dimension_numbers<[1], [0], [0], [1], [0, 0, 1, 1], [], []>} : vector<8x128xbf16>, vector<128x128xbf16>, vector<8x128xf32> -> vector<8x128xf32>
    %c0_155 = arith.constant 0 : index
    %c0_156 = arith.constant 0 : index
    %216 = vector.load %arg15[%c0_155, %c0_156] : memref<1x128xf32, #tpu.memory_space<vmem>>, vector<1x128xf32>
    %217 = vector.broadcast %216 : vector<1x128xf32> to vector<8x128xf32>
    %218 = arith.addf %215, %217 : vector<8x128xf32>
    %c0_157 = arith.constant 0 : index
    %c0_158 = arith.constant 0 : index
    %c0_159 = arith.constant 0 : index
    %219 = vector.load %arg16[%c0_157, %c0_158, %c0_159] : memref<1x8x128xf32, #tpu.memory_space<vmem>>, vector<1x8x128xf32>
    %220 = vector.shape_cast %219 : vector<1x8x128xf32> to vector<8x128xf32>
    %221 = vector.shape_cast %218 : vector<8x128xf32> to vector<1x8x128xf32>
    tpu.vector_store %arg16[%c0_157, %c0_158, %c0_159], %221 {strides = array<i32>} : memref<1x8x128xf32, #tpu.memory_space<vmem>>, vector<1x8x128xf32>,
    return
  }
  func.func @transform_0(%arg0: i32) -> (i32, i32, i32) {
    %c0_i32 = arith.constant 0 : i32
    %c0_i32_0 = arith.constant 0 : i32
    %c0_i32_1 = arith.constant 0 : i32
    return %arg0, %c0_i32, %c0_i32_0 : i32, i32, i32
  }
  func.func @transform_1(%arg0: i32) -> (i32, i32, i32) {
    %c0_i32 = arith.constant 0 : i32
    %c0_i32_0 = arith.constant 0 : i32
    %c0_i32_1 = arith.constant 0 : i32
    %c0_i32_2 = arith.constant 0 : i32
    return %c0_i32, %c0_i32_0, %c0_i32_1 : i32, i32, i32
  }
  func.func @transform_2(%arg0: i32) -> (i32, i32) {
    %c0_i32 = arith.constant 0 : i32
    %c0_i32_0 = arith.constant 0 : i32
    %c0_i32_1 = arith.constant 0 : i32
    return %c0_i32, %c0_i32_0 : i32, i32
  }
  func.func @transform_3(%arg0: i32) -> (i32, i32) {
    %c0_i32 = arith.constant 0 : i32
    %c0_i32_0 = arith.constant 0 : i32
    %c0_i32_1 = arith.constant 0 : i32
    return %c0_i32, %c0_i32_0 : i32, i32
  }
  func.func @transform_4(%arg0: i32) -> (i32, i32) {
    %c0_i32 = arith.constant 0 : i32
    %c0_i32_0 = arith.constant 0 : i32
    %c0_i32_1 = arith.constant 0 : i32
    return %c0_i32, %c0_i32_0 : i32, i32
  }
  func.func @transform_5(%arg0: i32) -> (i32, i32, i32) {
    %c0_i32 = arith.constant 0 : i32
    %c0_i32_0 = arith.constant 0 : i32
    %c0_i32_1 = arith.constant 0 : i32
    %c0_i32_2 = arith.constant 0 : i32
    return %c0_i32, %c0_i32_0, %c0_i32_1 : i32, i32, i32
  }
  func.func @transform_6(%arg0: i32) -> (i32, i32) {
    %c0_i32 = arith.constant 0 : i32
    %c0_i32_0 = arith.constant 0 : i32
    %c0_i32_1 = arith.constant 0 : i32
    return %c0_i32, %c0_i32_0 : i32, i32
  }
  func.func @transform_7(%arg0: i32) -> (i32, i32) {
    %c0_i32 = arith.constant 0 : i32
    %c0_i32_0 = arith.constant 0 : i32
    %c0_i32_1 = arith.constant 0 : i32
    return %c0_i32, %c0_i32_0 : i32, i32
  }
  func.func @transform_8(%arg0: i32) -> (i32, i32) {
    %c0_i32 = arith.constant 0 : i32
    %c0_i32_0 = arith.constant 0 : i32
    %c0_i32_1 = arith.constant 0 : i32
    return %c0_i32, %c0_i32_0 : i32, i32
  }
  func.func @transform_9(%arg0: i32) -> (i32, i32) {
    %c0_i32 = arith.constant 0 : i32
    %c0_i32_0 = arith.constant 0 : i32
    %c0_i32_1 = arith.constant 0 : i32
    return %c0_i32, %c0_i32_0 : i32, i32
  }
  func.func @transform_10(%arg0: i32) -> (i32, i32) {
    %c0_i32 = arith.constant 0 : i32
    %c0_i32_0 = arith.constant 0 : i32
    %c0_i32_1 = arith.constant 0 : i32
    return %c0_i32, %c0_i32_0 : i32, i32
  }
  func.func @transform_11(%arg0: i32) -> (i32, i32) {
    %c0_i32 = arith.constant 0 : i32
    %c0_i32_0 = arith.constant 0 : i32
    %c0_i32_1 = arith.constant 0 : i32
    return %c0_i32, %c0_i32_0 : i32, i32
  }
  func.func @transform_12(%arg0: i32) -> (i32, i32) {
    %c0_i32 = arith.constant 0 : i32
    %c0_i32_0 = arith.constant 0 : i32
    %c0_i32_1 = arith.constant 0 : i32
    return %c0_i32, %c0_i32_0 : i32, i32
  }
  func.func @transform_13(%arg0: i32) -> (i32, i32) {
    %c0_i32 = arith.constant 0 : i32
    %c0_i32_0 = arith.constant 0 : i32
    %c0_i32_1 = arith.constant 0 : i32
    return %c0_i32, %c0_i32_0 : i32, i32
  }
  func.func @transform_14(%arg0: i32) -> (i32, i32) {
    %c0_i32 = arith.constant 0 : i32
    %c0_i32_0 = arith.constant 0 : i32
    %c0_i32_1 = arith.constant 0 : i32
    return %c0_i32, %c0_i32_0 : i32, i32
  }
  func.func @transform_15(%arg0: i32) -> (i32, i32, i32) {
    %c0_i32 = arith.constant 0 : i32
    %c0_i32_0 = arith.constant 0 : i32
    %c0_i32_1 = arith.constant 0 : i32
    return %arg0, %c0_i32, %c0_i32_0 : i32, i32, i32
  }
}

</mosaic_0001>

<bundles_post_ra>
// kernel: lenet_forward.1
= control target key start
LH: loop header
LB: loop body
LE: loop exit
PB: predicated region body
PF: predicated region fallthrough
CT: control target
= control target key end

     0   :  { %s9035_s0 = inlined_call_operand.vmem [shape: bf16[2,256,32], index: 0, kind: input, shape index: {}]   ;;  %s9036_s1 = inlined_call_operand.vmem [shape: bf16[5,32,168], index: 1, kind: input, shape index: {}]   ;;  %s9037_s2 = inlined_call_operand.vmem [shape: f32[1,168], index: 2, kind: input, shape index: {}]   ;;  %s9038_s3 = inlined_call_operand.vmem [shape: bf16[168,84], index: 3, kind: input, shape index: {}]   ;;  %s9039_s4 = inlined_call_operand.vmem [shape: bf16[168,84], index: 4, kind: input, shape index: {}]   ;;  %s9040_s5 = inlined_call_operand.vmem [shape: bf16[5,84,160], index: 5, kind: input, shape index: {}]   ;;  %s9041_s6 = inlined_call_operand.vmem [shape: f32[1,160], index: 6, kind: input, shape index: {}]   ;;  %s9042_s7 = inlined_call_operand.vmem [shape: bf16[160,80], index: 7, kind: input, shape index: {}]   ;;  %s9043_s8 = inlined_call_operand.vmem [shape: bf16[160,80], index: 8, kind: input, shape index: {}]   ;;  %s9044_s9 = inlined_call_operand.vmem [shape: bf16[400,128], index: 9, kind: input, shape index: {}]   ;;  %s9045_s10 = inlined_call_operand.vmem [shape: f32[1,128], index: 10, kind: input, shape index: {}]   ;;  %s9046_s11 = inlined_call_operand.vmem [shape: bf16[128,128], index: 11, kind: input, shape index: {}]   ;;  %s9047_s12 = inlined_call_operand.vmem [shape: f32[1,128], index: 12, kind: input, shape index: {}]   ;;  %s9048_s13 = inlined_call_operand.vmem [shape: bf16[128,128], index: 13, kind: input, shape index: {}]   ;;  %s9049_s14 = inlined_call_operand.vmem [shape: f32[1,128], index: 14, kind: input, shape index: {}]   ;;  %s9050_s15 = inlined_call_operand.hbm [shape: f32[2,8,128], index: 15, kind: output, shape index: {}]  }
   0x1   :  { %9056 = sst [smem:[#allocation21_spill]] %s9035_s0 }
   0x2   :  { %9057 = sst [smem:[#allocation22_spill]] %s9036_s1 }
   0x3   :  { %20 = vsyncpa [#allocation5], 0 }
   0x4   :  { %22 = vsyncpa [#allocation5 + $0x1], 0  ;;  %s7033_s18 = smov 0   ;;  %s7035_s19 = smov 0  }
   0x5   :  { %s7037_s20 = smov 0   ;;  %s7039_s21 = smov 0  }
   0x6 LB: > { %9058 = sst [smem:[#allocation7_spill]] %s6935_s18  ;;  %s7054_s22 = sadd.s32 4294967295, %s6947_s21   ;;  %s6947_s21 = sphi %s7039_s21, %s9103_s21   ;;  %s6943_s20 = sphi %s7037_s20, %s9105_s20   ;;  %s6939_s19 = sphi %s7035_s19, %s9107_s19   ;;  %s6935_s18 = sphi %s7033_s18, %s9106_s18  }
   0x7   : > { %9059 = sst [smem:[#allocation8_spill]] %s6943_s20  ;;  %s5190_s23 = sadd.s32 4294967294, %s6947_s21  }
   0x8   : > { %s7058_s24 = sadd.s32 1, %s6947_s21   ;;  %s355_s25 = sadd.s32 1, %s6943_s20 }
   0x9   : > { %9060 = sst [smem:[#allocation9_spill]] %s7058_s24  ;;  %s352_s26 = ssub.s32 %s6947_s21, %s7058_s24 }
   0xa   : > { %p365_p0 = scmp.ne.s32.totalorder %s6943_s20, %s6939_s19  ;;  %p353_p1 = scmp.eq.s32.totalorder %s352_s26, 0 }
   0xb   : > { %p366_p2 = scmp.eq.s32.totalorder %s7054_s22, 1  ;;  %p371_p3 = scmp.ne.s32.totalorder %s6939_s19, %s6935_s18 }
   0xc   : > { %p372_p4 = scmp.eq.s32.totalorder %s5190_s23, 1  ;;  %p5193_p7 = scmp.ge.s32.totalorder %s6947_s21, 1 }
   0xd   : > { %s7069_s27 = scalar_select %p353_p1, %s6943_s20, %s355_s25  }
   0xe   : > { %p7071_p5 = por %p366_p2, %p365_p0  ;;  %p7075_p6 = por %p372_p4, %p371_p3 }
   0xf   : > { %9061 = sst [smem:[#allocation10_spill]] %s7069_s27  ;;  %p440_p8 = scmp.lt.s32.totalorder %s6947_s21, 3 }
  0x10   : > { %s9063_s29 = scalar_select %p7075_p6, 1, 0 }
  0x11   : > { %p441_p9 = pnand %p5193_p7, %p440_p8 }
  0x12   : > { %9064 = sst [smem:[#allocation11_spill]] %s9063_s29 }
  0x13   : > { %444 = sbr.rel (%p441_p9) target bundleno = 2088 (0x828), region = 80 }
  0x18   : > { %s9065_s1 = sld [smem:[#allocation22_spill]]  ;;  %p488_p10 = scmp.lt.s32.totalorder %s7054_s22, 1  ;;  %vm573_vm0 = vcmask 261120   ;;  %vm1636_vm1 = vcmask 1043456   ;;  %vm1614_vm2 = vcmask 326656   ;;  %vm1918_vm3 = vcmask 687104  }
  0x19   : > { %s9066_s0 = sld [smem:[#allocation21_spill]]  ;;  %vm3476_vm4 = vcmask 1041408   ;;  %vm4646_vm5 = vcmask 654336   ;;  %s6949_s16 = smov 80   ;;  %vm4653_vm6 = vcmask 1048192   ;;  %vm4661_vm7 = vcmask 916736  }
  0x1a   : > { %s489_s24 = scalar_select %p488_p10, %s7054_s22, 1  ;;  %vm4668_vm8 = vcmask 1048448   ;;  %vm4670_vm9 = vcmask 523264   ;;  %vm4677_vm10 = vcmask 1048064   ;;  %vm4679_vm11 = vcmask 130048  }
  0x1b   : > { %s6950_s17 = smov 32   ;;  %s6951_s29 = smov 112  }
  0x1c   : > { %s6438_s18 = sshll.u32 %s489_s24, 7  ;;  %s485_s23 = sand.u32 1, %s6939_s19  }
  0x1d   : > { %s6435_s25 = sshll.u32 %s7054_s22, 3  ;;  %s5194_s20 = sshll.u32 %s485_s23, 3 }
  0x1e   : > { %v5211_v0 = vld [vmem:[%s9065_s1 + $0x30] sm:$0xf]  ;;  %v6446_v1 = vld [vmem:[%s9065_s1 + $0x34] sm:$0xf0]  ;;  %v6445_v2 = vld [vmem:[%s9065_s1 + $0x34] sm:$0xf]  ;;  %s5126_s24 = scalar_lea.hbm %s9050_s15, %s6435_s25 }
  0x1f   : > { %v5212_v3 = vor.u32 %v6446_v1, %v5211_v0  ;;  %v5213_v4 = vld [vmem:[%s9065_s1 + $0x38] sm:$0xf0]  ;;  %v5241_v5 = vld [vmem:[%s9065_s1 + $0x10] sm:$0xf]  ;;  %v6442_v6 = vld [vmem:[%s9065_s1 + $0x14] sm:$0xf0]  ;;  %s7146_s30 = scalar_lea.vmem %s9066_s0, %s6438_s18 }
  0x20   : > { %v5216_v7 = vor.u32 %v6445_v2, %v5213_v4  ;;  %v5242_v8 = vor.u32 %v6442_v6, %v5241_v5  ;;  %v6441_v9 = vld [vmem:[%s9065_s1 + $0x14] sm:$0xf]  ;;  %v5243_v10 = vld [vmem:[%s9065_s1 + $0x18] sm:$0xf0]  ;;  %v5203_v11 = vld [vmem:[%s9065_s1 + $0x20] sm:$0xf] }
  0x21   : > { %601 = vmatpush.bf16.msra.mxu0 %v5212_v3  ;;  %v5246_v12 = vor.u32 %v6441_v9, %v5243_v10  ;;  %v6444_v13 = vld [vmem:[%s9065_s1 + $0x24] sm:$0xf0]  ;;  %v6443_v14 = vld [vmem:[%s9065_s1 + $0x24] sm:$0xf]  ;;  %v5205_v15 = vld [vmem:[%s9065_s1 + $0x28] sm:$0xf0] }
  0x22   : > { %645 = vmatpush.bf16.msra.mxu1 %v5216_v7  ;;  %739 = vmatpush.bf16.msra.mxu2 %v5242_v8  ;;  %v5204_v16 = vor.u32 %v6444_v13, %v5203_v11  ;;  %v5208_v17 = vor.u32 %v6443_v14, %v5205_v15  ;;  %v5233_v18 = vld [vmem:[%s9065_s1] sm:$0xf]  ;;  %v6440_v19 = vld [vmem:[%s9065_s1 + $0x4] sm:$0xf0]  ;;  %v6439_v20 = vld [vmem:[%s9065_s1 + $0x4] sm:$0xf] }
  0x23   : > { %783 = vmatpush.bf16.msra.mxu3 %v5246_v12  ;;  %v5234_v21 = vor.u32 %v6440_v19, %v5233_v18  ;;  %v5235_v22 = vld [vmem:[%s9065_s1 + $0x8] sm:$0xf0]  ;;  %v5303_v23 = vld [vmem:[%s9065_s1 + $0x50] sm:$0xf]  ;;  %v6457_v25 = vld [vmem:[%s9065_s1 + $0x54] sm:$0xf0] }
  0x24   : > { %v5238_v24 = vor.u32 %v6439_v20, %v5235_v22  ;;  %v6456_v26 = vld [vmem:[%s9065_s1 + $0x54] sm:$0xf]  ;;  %v5305_v27 = vld [vmem:[%s9065_s1 + $0x58] sm:$0xf0]  ;;  %v5304_v28 = vor.u32 %v6457_v25, %v5303_v23  ;;  %v6813_v30 = vld [vmem:[%s7146_s30 + $0x4] sm:$0xff]   ;;  %s487_s26 = scalar_lea.vmem [#allocation4], %s5194_s20 }
  0x25   : > { %602 = vmatpush.bf16.msra.mxu0 %v5204_v16  ;;  %v5308_v29 = vor.u32 %v6456_v26, %v5305_v27  ;;  %v6673_v31 = vld [vmem:[%s7146_s30] sm:$0xff]   ;;  %v6815_v32 = vld [vmem:[%s7146_s30 + $0xc] sm:$0xff]   ;;  %v6455_v35 = vld [vmem:[%s9065_s1 + $0x44] sm:$0xf0]  ;;  %s5116_s0 = scalar_lea.sflag [#allocation5], %s485_s23 }
  0x26   : > { %646 = vmatpush.bf16.msra.mxu1 %v5208_v17  ;;  %740 = vmatpush.bf16.msra.mxu2 %v5234_v21  ;;  %v6728_v33 = vld [vmem:[%s7146_s30 + $0x8] sm:$0xff]   ;;  %v5295_v34 = vld [vmem:[%s9065_s1 + $0x40] sm:$0xf]  ;;  %v6454_v36 = vld [vmem:[%s9065_s1 + $0x44] sm:$0xf] }
  0x27   : > { %784 = vmatpush.bf16.msra.mxu3 %v5238_v24  ;;  %v5296_v37 = vor.u32 %v6455_v35, %v5295_v34  ;;  %v5297_v38 = vld [vmem:[%s9065_s1 + $0x48] sm:$0xf0]  ;;  %v6817_v40 = vld [vmem:[%s7146_s30 + $0x14] sm:$0xff]   ;;  %v6819_v42 = vld [vmem:[%s7146_s30 + $0x1c] sm:$0xff]  }
  0x28   : > { %5217 = vmatmul.msk.bf16.vlgmr.msra.gmra.mxu0 %vm573_vm0, %v6813_v30  ;;  %v5300_v39 = vor.u32 %v6454_v36, %v5297_v38  ;;  %v6729_v41 = vld [vmem:[%s7146_s30 + $0x10] sm:$0xff]   ;;  %v6730_v43 = vld [vmem:[%s7146_s30 + $0x18] sm:$0xff]   ;;  %v6821_v44 = vld [vmem:[%s7146_s30 + $0x24] sm:$0xff]  }
  0x29   : > { %922 = vmatpush.bf16.msrb.mxu0 %v5304_v28  ;;  %5247 = vmatmul.msk.bf16.vlgmr.msra.gmra.mxu2 %vm573_vm0, %v6673_v31  ;;  %v6731_v45 = vld [vmem:[%s7146_s30 + $0x20] sm:$0xff]   ;;  %v5365_v46 = vld [vmem:[%s9065_s1 + $0x70] sm:$0xf]  ;;  %v6468_v47 = vld [vmem:[%s9065_s1 + $0x74] sm:$0xf0] }
  0x2a   : > { %966 = vmatpush.bf16.msrb.mxu1 %v5308_v29  ;;  %5254 = vmatmul.msk.bf16.vlgmr.msra.gmra.mxu3 %vm573_vm0, %v6673_v31  ;;  %v6467_v48 = vld [vmem:[%s9065_s1 + $0x74] sm:$0xf]  ;;  %v5366_v49 = vor.u32 %v6468_v47, %v5365_v46  ;;  %v5367_v50 = vld [vmem:[%s9065_s1 + $0x78] sm:$0xf0]  ;;  %v5357_v51 = vld [vmem:[%s9065_s1 + $0x60] sm:$0xf] }
  0x2b   : > { %5224 = vmatmul.msk.bf16.vlgmr.msra.gmra.mxu1 %vm573_vm0, %v6813_v30  ;;  %v6466_v52 = vld [vmem:[%s9065_s1 + $0x64] sm:$0xf0]  ;;  %v5370_v53 = vor.u32 %v6467_v48, %v5367_v50  ;;  %v6465_v54 = vld [vmem:[%s9065_s1 + $0x64] sm:$0xf]  ;;  %v5359_v55 = vld [vmem:[%s9065_s1 + $0x68] sm:$0xf0] }
  0x2c   : > { %1133 = vmatpush.bf16.msrb.mxu2 %v5366_v49  ;;  %v5358_v56 = vor.u32 %v6466_v52, %v5357_v51  ;;  %v5362_v57 = vor.u32 %v6465_v54, %v5359_v55  ;;  %v6823_v58 = vld [vmem:[%s7146_s30 + $0x2c] sm:$0xff]   ;;  %v6479_v61 = vld [vmem:[%s9065_s1 + $0x94] sm:$0xf0]  ;;  %v6478_v62 = vld [vmem:[%s9065_s1 + $0x94] sm:$0xf] }
  0x2d   : > { %923 = vmatpush.bf16.msrb.mxu0 %v5296_v37  ;;  %1177 = vmatpush.bf16.msrb.mxu3 %v5370_v53  ;;  %v6732_v59 = vld [vmem:[%s7146_s30 + $0x28] sm:$0xff]   ;;  %v5427_v60 = vld [vmem:[%s9065_s1 + $0x90] sm:$0xf]  ;;  %v5429_v0 = vld [vmem:[%s9065_s1 + $0x98] sm:$0xf0] }
  0x2e   : > { %967 = vmatpush.bf16.msrb.mxu1 %v5300_v39  ;;  %v5428_v63 = vor.u32 %v6479_v61, %v5427_v60  ;;  %v5432_v1 = vor.u32 %v6478_v62, %v5429_v0  ;;  %v6824_v2 = vld [vmem:[%s7146_s30 + $0x34] sm:$0xff]  ;;  %v6458_v4 = vld [vmem:[%s7146_s30 + $0xc] sm:$0xff]  ;;  %v5419_v16 = vld [vmem:[%s9065_s1 + $0x80] sm:$0xf] }
  0x2f   : > { %v6733_v3 = vld [vmem:[%s7146_s30 + $0x30] sm:$0xff]   ;;  %v6447_v5 = vld [vmem:[%s7146_s30 + $0x8] sm:$0xff]  ;;  %v6476_v18 = vld [vmem:[%s9065_s1 + $0x84] sm:$0xf] }
  0x30   : > { %1134 = vmatpush.bf16.msrb.mxu2 %v5358_v56  ;;  %v6459_v6 = vld [vmem:[%s7146_s30 + $0x14] sm:$0xff]  ;;  %v6477_v17 = vld [vmem:[%s9065_s1 + $0x84] sm:$0xf0]  ;;  %v5421_v20 = vld [vmem:[%s9065_s1 + $0x88] sm:$0xf0] }
  0x31   : > { %1178 = vmatpush.bf16.msrb.mxu3 %v5362_v57  ;;  %1344 = vmatpush.bf16.msra.mxu0 %v5428_v63  ;;  %v6448_v7 = vld [vmem:[%s7146_s30 + $0x10] sm:$0xff]  ;;  %v5420_v19 = vor.u32 %v6477_v17, %v5419_v16  ;;  %v5424_v21 = vor.u32 %v6476_v18, %v5421_v20  ;;  %v6460_v26 = vld [vmem:[%s7146_s30 + $0x1c] sm:$0xff]  ;;  %v6451_v53 = vld [vmem:[%s7146_s30 + $0x28] sm:$0xff] }
  0x32   : > { %1388 = vmatpush.bf16.msra.mxu1 %v5432_v1  ;;  %v6449_v27 = vld [vmem:[%s7146_s30 + $0x18] sm:$0xff]  ;;  %v6462_v52 = vld [vmem:[%s7146_s30 + $0x2c] sm:$0xff] }
  0x33   : > { %v6463_v0 = vld [vmem:[%s7146_s30 + $0x34] sm:$0xff] }
  0x34   : > { %v6452_v1 = vld [vmem:[%s7146_s30 + $0x30] sm:$0xff] }
  0x35   : > { %1345 = vmatpush.bf16.msra.mxu0 %v5420_v19 }
  0x36   : > { %1389 = vmatpush.bf16.msra.mxu1 %v5424_v21 }
  0x38   : > { %5218 = vmatmul.msk.bf16.gmra.mxu0 %vm573_vm0, %v6815_v32 }
  0x39   : > { %5248 = vmatmul.msk.bf16.gmra.mxu2 %vm573_vm0, %v6728_v33 }
  0x3a   : > { %5255 = vmatmul.msk.bf16.gmra.mxu3 %vm573_vm0, %v6728_v33 }
  0x3b   : > { %5225 = vmatmul.msk.bf16.gmra.mxu1 %vm573_vm0, %v6815_v32 }
  0x48   : > { %5219 = vmatmul.msk.bf16.gmra.mxu0 %vm573_vm0, %v6817_v40 }
  0x49   : > { %5249 = vmatmul.msk.bf16.gmra.mxu2 %vm573_vm0, %v6729_v41 }
  0x4a   : > { %5256 = vmatmul.msk.bf16.gmra.mxu3 %vm573_vm0, %v6729_v41  ;;  %v6450_v41 = vld [vmem:[%s7146_s30 + $0x20] sm:$0xff] }
  0x4b   : > { %5226 = vmatmul.msk.bf16.gmra.mxu1 %vm573_vm0, %v6817_v40  ;;  %v6461_v40 = vld [vmem:[%s7146_s30 + $0x24] sm:$0xff] }
  0x58   : > { %5220 = vmatmul.msk.bf16.gmra.mxu0 %vm573_vm0, %v6819_v42 }
  0x59   : > { %5250 = vmatmul.msk.bf16.gmra.mxu2 %vm573_vm0, %v6730_v43 }
  0x5a   : > { %5257 = vmatmul.msk.bf16.gmra.mxu3 %vm573_vm0, %v6730_v43 }
  0x5b   : > { %5227 = vmatmul.msk.bf16.gmra.mxu1 %vm573_vm0, %v6819_v42 }
  0x68   : > { %5221 = vmatmul.msk.bf16.gmra.mxu0 %vm573_vm0, %v6821_v44 }
  0x69   : > { %5251 = vmatmul.msk.bf16.gmra.mxu2 %vm573_vm0, %v6731_v45 }
  0x6a   : > { %5258 = vmatmul.msk.bf16.gmra.mxu3 %vm573_vm0, %v6731_v45 }
  0x6b   : > { %5228 = vmatmul.msk.bf16.gmra.mxu1 %vm573_vm0, %v6821_v44 }
  0x78   : > { %5222 = vmatmul.msk.bf16.gmra.mxu0 %vm573_vm0, %v6823_v58 }
  0x79   : > { %5252 = vmatmul.msk.bf16.gmra.mxu2 %vm573_vm0, %v6732_v59 }
  0x7a   : > { %5259 = vmatmul.msk.bf16.gmra.mxu3 %vm573_vm0, %v6732_v59 }
  0x7b   : > { %5229 = vmatmul.msk.bf16.gmra.mxu1 %vm573_vm0, %v6823_v58 }
  0x88   : > { %5223 = vmatmul.msk.bf16.gmra.mxu0 %vm573_vm0, %v6824_v2 }
  0x89   : > { %5253 = vmatmul.msk.bf16.gmra.mxu2 %vm573_vm0, %v6733_v3 }
  0x8a   : > { %5260 = vmatmul.msk.bf16.gmra.mxu3 %vm573_vm0, %v6733_v3 }
  0x8b   : > { %5230 = vmatmul.msk.bf16.gmra.mxu1 %vm573_vm0, %v6824_v2 }
  0x98   : > { %5309 = vmatmul.msk.bf16.vlgmr.msrb.gmra.mxu0 %vm573_vm0, %v6447_v5 }
  0x99   : > { %5371 = vmatmul.msk.bf16.vlgmr.msrb.gmra.mxu2 %vm573_vm0, %v6458_v4 }
  0x9a   : > { %5378 = vmatmul.msk.bf16.vlgmr.msrb.gmra.mxu3 %vm573_vm0, %v6458_v4 }
  0x9b   : > { %5316 = vmatmul.msk.bf16.vlgmr.msrb.gmra.mxu1 %vm573_vm0, %v6447_v5 }
  0xa5   : > { %v604_v8 = vpop.f32.mrf.mxu0 }
  0xa8   : > { %v648_v9 = vpop.f32.mrf.mxu1  ;;  %5310 = vmatmul.msk.bf16.gmra.mxu0 %vm573_vm0, %v6448_v7 }
  0xa9   : > { %5372 = vmatmul.msk.bf16.gmra.mxu2 %vm573_vm0, %v6459_v6 }
  0xaa   : > { %5379 = vmatmul.msk.bf16.gmra.mxu3 %vm573_vm0, %v6459_v6 }
  0xab   : > { %5317 = vmatmul.msk.bf16.gmra.mxu1 %vm573_vm0, %v6448_v7 }
  0xac   : > { %v742_v10 = vpop.f32.mrf.mxu2 }
  0xad   : > { %v786_v11 = vpop.f32.mrf.mxu3  ;;  %v7250_v12 = vadd.f32 %v742_v10, %v604_v8  ;;  %v606_v14 = vpop.f32.mrf.mxu0 }
  0xae   : > { %v7252_v13 = vadd.f32 %v786_v11, %v648_v9 }
  0xb0   : > { %v650_v15 = vpop.f32.mrf.mxu1 }
  0xb4   : > { %v744_v22 = vpop.f32.mrf.mxu2 }
  0xb5   : > { %v788_v23 = vpop.f32.mrf.mxu3  ;;  %v7266_v24 = vadd.f32 %v744_v22, %v606_v14  ;;  %v609_v28 = vpop.f32.mrf.mxu0  ;;  %v6464_v14 = vld [vmem:[%s7146_s30 + $0x3c] sm:$0xff] }
  0xb6   : > { %v7268_v25 = vadd.f32 %v788_v23, %v650_v15  ;;  %v6453_v15 = vld [vmem:[%s7146_s30 + $0x38] sm:$0xff] }
  0xb8   : > { %v653_v29 = vpop.f32.mrf.mxu1  ;;  %5311 = vmatmul.msk.bf16.gmra.mxu0 %vm573_vm0, %v6449_v27 }
  0xb9   : > { %5373 = vmatmul.msk.bf16.gmra.mxu2 %vm573_vm0, %v6460_v26 }
  0xba   : > { %5380 = vmatmul.msk.bf16.gmra.mxu3 %vm573_vm0, %v6460_v26 }
  0xbb   : > { %5318 = vmatmul.msk.bf16.gmra.mxu1 %vm573_vm0, %v6449_v27 }
  0xbc   : > { %v747_v30 = vpop.f32.mrf.mxu2 }
  0xbd   : > { %v791_v31 = vpop.f32.mrf.mxu3  ;;  %v7276_v32 = vadd.f32 %v747_v30, %v609_v28  ;;  %v611_v34 = vpop.f32.mrf.mxu0  ;;  %v6469_v28 = vld [vmem:[%s7146_s30 + $0x10] sm:$0xff] }
  0xbe   : > { %v7278_v33 = vadd.f32 %v791_v31, %v653_v29  ;;  %v6487_v31 = vld [vmem:[%s9038_s3 + $0x38] sm:$0xff] }
  0xbf   : > { %1640 = vmatpush.bf16.msra.mxu2 %v6487_v31  ;;  %v6483_v31 = vld [vmem:[%s9038_s3 + $0x18] sm:$0xff] }
  0xc0   : > { %v655_v35 = vpop.f32.mrf.mxu1 }
  0xc4   : > { %v749_v36 = vpop.f32.mrf.mxu2 }
  0xc5   : > { %v793_v37 = vpop.f32.mrf.mxu3  ;;  %v7280_v38 = vadd.f32 %v749_v36, %v611_v34  ;;  %v614_v42 = vpop.f32.mrf.mxu0  ;;  %v1550_v34 = vld [vmem:[%s9038_s3 + $0x50] sm:$0xf] }
  0xc6   : > { %v7282_v39 = vadd.f32 %v793_v37, %v655_v35  ;;  %v1592_v35 = vunpack.c.l.b16 %v1550_v34  ;;  %v6473_v34 = vld [vmem:[%s7146_s30 + $0x30] sm:$0xff] }
  0xc8   : > { %v658_v43 = vpop.f32.mrf.mxu1  ;;  %5312 = vmatmul.msk.bf16.gmra.mxu0 %vm573_vm0, %v6450_v41  ;;  %v1603_v36 = vpack.c.b16 %v1592_v35, %v1592_v35 }
  0xc9   : > { %5374 = vmatmul.msk.bf16.gmra.mxu2 %vm573_vm0, %v6461_v40 }
  0xca   : > { %5381 = vmatmul.msk.bf16.gmra.mxu3 %vm573_vm0, %v6461_v40 }
  0xcb   : > { %5319 = vmatmul.msk.bf16.gmra.mxu1 %vm573_vm0, %v6450_v41 }
  0xcc   : > { %v752_v44 = vpop.f32.mrf.mxu2 }
  0xcd   : > { %v796_v45 = vpop.f32.mrf.mxu3  ;;  %v7290_v46 = vadd.f32 %v752_v44, %v614_v42  ;;  %v7294_v48 = vpop.f32.mrf.mxu0 }
  0xce   : > { %v7292_v47 = vadd.f32 %v796_v45, %v658_v43  ;;  %v1638_v43 = vsel %vm1636_vm1, %v1603_v36, 0 }
  0xcf   : > { %1689 = vmatpush.bf16.msra.mxu3 %v1638_v43 }
  0xd0   : > { %v7296_v49 = vpop.f32.mrf.mxu1 }
  0xd4   : > { %v7298_v50 = vpop.f32.mrf.mxu2 }
  0xd5   : > { %v7300_v51 = vpop.f32.mrf.mxu3  ;;  %v619_v54 = vpop.f32.mrf.mxu0 }
  0xd8   : > { %v663_v55 = vpop.f32.mrf.mxu1  ;;  %5313 = vmatmul.msk.bf16.gmra.mxu0 %vm573_vm0, %v6451_v53 }
  0xd9   : > { %5375 = vmatmul.msk.bf16.gmra.mxu2 %vm573_vm0, %v6462_v52 }
  0xda   : > { %5382 = vmatmul.msk.bf16.gmra.mxu3 %vm573_vm0, %v6462_v52  ;;  %v6486_v52 = vld [vmem:[%s9038_s3 + $0x30] sm:$0xff] }
  0xdb   : > { %5320 = vmatmul.msk.bf16.gmra.mxu1 %vm573_vm0, %v6451_v53  ;;  %v6470_v53 = vld [vmem:[%s7146_s30 + $0x18] sm:$0xff]  ;;  %1641 = vmatpush.bf16.msra.mxu2 %v6486_v52 }
  0xdc   : > { %v757_v56 = vpop.f32.mrf.mxu2 }
  0xdd   : > { %v801_v57 = vpop.f32.mrf.mxu3  ;;  %v7308_v58 = vadd.f32 %v757_v56, %v619_v54  ;;  %v7312_v60 = vpop.f32.mrf.mxu0 }
  0xde   : > { %v7310_v59 = vadd.f32 %v801_v57, %v663_v55 }
  0xe0   : > { %v7314_v61 = vpop.f32.mrf.mxu1 }
  0xe4   : > { %v7316_v62 = vpop.f32.mrf.mxu2 }
  0xe5   : > { %v7318_v63 = vpop.f32.mrf.mxu3  ;;  %v624_v2 = vpop.f32.mrf.mxu0 }
  0xe8   : > { %v668_v3 = vpop.f32.mrf.mxu1  ;;  %5314 = vmatmul.msk.bf16.gmra.mxu0 %vm573_vm0, %v6452_v1 }
  0xe9   : > { %5376 = vmatmul.msk.bf16.gmra.mxu2 %vm573_vm0, %v6463_v0 }
  0xea   : > { %5383 = vmatmul.msk.bf16.gmra.mxu3 %vm573_vm0, %v6463_v0 }
  0xeb   : > { %5321 = vmatmul.msk.bf16.gmra.mxu1 %vm573_vm0, %v6452_v1 }
  0xec   : > { %v762_v4 = vpop.f32.mrf.mxu2 }
  0xed   : > { %v806_v5 = vpop.f32.mrf.mxu3  ;;  %v7326_v6 = vadd.f32 %v762_v4, %v624_v2  ;;  %v7330_v8 = vpop.f32.mrf.mxu0 }
  0xee   : > { %v7328_v7 = vadd.f32 %v806_v5, %v668_v3 }
  0xf0   : > { %v7332_v9 = vpop.f32.mrf.mxu1 }
  0xf4   : > { %v7334_v10 = vpop.f32.mrf.mxu2 }
  0xf5   : > { %v7336_v11 = vpop.f32.mrf.mxu3  ;;  %v629_v16 = vpop.f32.mrf.mxu0 }
  0xf8   : > { %v673_v17 = vpop.f32.mrf.mxu1  ;;  %5315 = vmatmul.msk.bf16.gmra.mxu0 %vm573_vm0, %v6453_v15 }
  0xf9   : > { %5377 = vmatmul.msk.bf16.gmra.mxu2 %vm573_vm0, %v6464_v14 }
  0xfa   : > { %5384 = vmatmul.msk.bf16.gmra.mxu3 %vm573_vm0, %v6464_v14 }
  0xfb   : > { %5322 = vmatmul.msk.bf16.gmra.mxu1 %vm573_vm0, %v6453_v15 }
  0xfc   : > { %v767_v18 = vpop.f32.mrf.mxu2 }
  0xfd   : > { %v811_v19 = vpop.f32.mrf.mxu3  ;;  %v7344_v20 = vadd.f32 %v767_v18, %v629_v16  ;;  %v7348_v22 = vpop.f32.mrf.mxu0  ;;  %v6472_v18 = vld [vmem:[%s7146_s30 + $0x28] sm:$0xff] }
  0xfe   : > { %v7346_v21 = vadd.f32 %v811_v19, %v673_v17 }
 0x100   : > { %v7350_v23 = vpop.f32.mrf.mxu1 }
 0x104   : > { %v7352_v26 = vpop.f32.mrf.mxu2 }
 0x105   : > { %v7354_v27 = vpop.f32.mrf.mxu3  ;;  %v634_v29 = vpop.f32.mrf.mxu0 }
 0x108   : > { %v678_v30 = vpop.f32.mrf.mxu1  ;;  %5433 = vmatmul.msk.bf16.vlgmr.msra.gmra.mxu0 %vm573_vm0, %v6469_v28 }
 0x10b   : > { %5440 = vmatmul.msk.bf16.vlgmr.msra.gmra.mxu1 %vm573_vm0, %v6469_v28 }
 0x10c   : > { %v772_v37 = vpop.f32.mrf.mxu2 }
 0x10d   : > { %v816_v40 = vpop.f32.mrf.mxu3  ;;  %v7365_v41 = vadd.f32 %v772_v37, %v634_v29  ;;  %v7370_v44 = vpop.f32.mrf.mxu0  ;;  %v6482_v37 = vld [vmem:[%s9038_s3 + $0x10] sm:$0xff] }
 0x10e   : > { %v7367_v42 = vadd.f32 %v816_v40, %v678_v30  ;;  %9067 = vst [vmem:[#allocation12_spill] sm:$0xff] %v7370_v44 }
 0x110   : > { %v7372_v45 = vpop.f32.mrf.mxu1 }
 0x111   : > { %9068 = vst [vmem:[#allocation13_spill] sm:$0xff] %v7372_v45 }
 0x115   : > { %v925_v54 = vpop.f32.mrf.mxu0 }
 0x116   : > { %v7379_v56 = vadd.f32 %v925_v54, %v7250_v12  ;;  %v6485_v12 = vld [vmem:[%s9038_s3 + $0x28] sm:$0xff]  ;;  %v6497_v54 = vld [vmem:[%s9039_s4 + $0x38] sm:$0xff] }
 0x117   : > { %1642 = vmatpush.bf16.msra.mxu2 %v6485_v12  ;;  %1815 = vmatpush.bf16.msrb.mxu0 %v6497_v54  ;;  %v6496_v12 = vld [vmem:[%s9039_s4 + $0x30] sm:$0xff]  ;;  %v6499_v54 = vld [vmem:[%s9039_s4 + $0x48] sm:$0xff] }
 0x118   : > { %v969_v55 = vpop.f32.mrf.mxu1  ;;  %5434 = vmatmul.msk.bf16.gmra.mxu0 %vm573_vm0, %v6470_v53 }
 0x119   : > { %v7382_v57 = vadd.f32 %v969_v55, %v7252_v13  ;;  %v6471_v13 = vld [vmem:[%s7146_s30 + $0x20] sm:$0xff] }
 0x11b   : > { %5441 = vmatmul.msk.bf16.gmra.mxu1 %vm573_vm0, %v6470_v53  ;;  %1816 = vmatpush.bf16.msrb.mxu0 %v6496_v12 }
 0x11d   : > { %v927_v0 = vpop.f32.mrf.mxu0 }
 0x11e   : > { %v7387_v2 = vadd.f32 %v927_v0, %v7266_v24  ;;  %v6489_v24 = vld [vmem:[%s9038_s3 + $0x48] sm:$0xff] }
 0x11f   : > { %1690 = vmatpush.bf16.msra.mxu3 %v6489_v24  ;;  %v6494_v24 = vld [vmem:[%s9039_s4 + $0x20] sm:$0xff] }
 0x120   : > { %v971_v1 = vpop.f32.mrf.mxu1 }
 0x121   : > { %v7390_v3 = vadd.f32 %v971_v1, %v7268_v25  ;;  %v6481_v1 = vld [vmem:[%s9038_s3 + $0x8] sm:$0xff] }
 0x125   : > { %v930_v4 = vpop.f32.mrf.mxu0 }
 0x126   : > { %v7397_v14 = vadd.f32 %v930_v4, %v7276_v32 }
 0x128   : > { %v974_v5 = vpop.f32.mrf.mxu1  ;;  %5435 = vmatmul.msk.bf16.gmra.mxu0 %vm573_vm0, %v6471_v13 }
 0x129   : > { %v7400_v15 = vadd.f32 %v974_v5, %v7278_v33  ;;  %v6484_v33 = vld [vmem:[%s9038_s3 + $0x20] sm:$0xff]  ;;  %v6495_v5 = vld [vmem:[%s9039_s4 + $0x28] sm:$0xff] }
 0x12a   : > { %1643 = vmatpush.bf16.msra.mxu2 %v6484_v33  ;;  %1817 = vmatpush.bf16.msrb.mxu0 %v6495_v5  ;;  %v6490_v5 = vld [vmem:[%s9039_s4] sm:$0xff] }
 0x12b   : > { %5442 = vmatmul.msk.bf16.gmra.mxu1 %vm573_vm0, %v6471_v13 }
 0x12d   : > { %v932_v25 = vpop.f32.mrf.mxu0 }
 0x12e   : > { %v7408_v17 = vadd.f32 %v932_v25, %v7280_v38  ;;  %1644 = vmatpush.bf16.msra.mxu2 %v6483_v31  ;;  %1818 = vmatpush.bf16.msrb.mxu0 %v6494_v24  ;;  %v6475_v25 = vld [vmem:[%s7146_s30 + $0x40] sm:$0xff] }
 0x12f   : > { %v6498_v24 = vld [vmem:[%s9039_s4 + $0x40] sm:$0xff] }
 0x130   : > { %v976_v16 = vpop.f32.mrf.mxu1 }
 0x131   : > { %v7411_v32 = vadd.f32 %v976_v16, %v7282_v39 }
 0x132   : > { %1645 = vmatpush.bf16.msra.mxu2 %v6482_v37  ;;  %v6492_v37 = vld [vmem:[%s9039_s4 + $0x10] sm:$0xff] }
 0x135   : > { %v935_v19 = vpop.f32.mrf.mxu0 }
 0x136   : > { %v7418_v29 = vadd.f32 %v935_v19, %v7290_v46  ;;  %1646 = vmatpush.bf16.msra.mxu2 %v6481_v1  ;;  %v1748_v19 = vld [vmem:[%s9039_s4 + $0x50] sm:$0xf] }
 0x138   : > { %v979_v28 = vpop.f32.mrf.mxu1  ;;  %5436 = vmatmul.msk.bf16.gmra.mxu0 %vm573_vm0, %v6472_v18 }
 0x139   : > { %v7421_v30 = vadd.f32 %v979_v28, %v7292_v47 }
 0x13b   : > { %5443 = vmatmul.msk.bf16.gmra.mxu1 %vm573_vm0, %v6472_v18  ;;  %v6493_v18 = vld [vmem:[%s9039_s4 + $0x18] sm:$0xff] }
 0x13c   : > { %1819 = vmatpush.bf16.msrb.mxu0 %v6493_v18 }
 0x13d   : > { %v7425_v38 = vpop.f32.mrf.mxu0 }
 0x140   : > { %v7427_v39 = vpop.f32.mrf.mxu1  ;;  %1820 = vmatpush.bf16.msrb.mxu0 %v6492_v37  ;;  %v5555_v37 = vld [vmem:[%s9065_s1 + $0x30] sm:$0xf] }
 0x145   : > { %v940_v46 = vpop.f32.mrf.mxu0 }
 0x146   : > { %v7434_v47 = vadd.f32 %v940_v46, %v7308_v58  ;;  %v6488_v58 = vld [vmem:[%s9038_s3 + $0x40] sm:$0xff] }
 0x147   : > { %1691 = vmatpush.bf16.msra.mxu3 %v6488_v58 }
 0x148   : > { %v984_v35 = vpop.f32.mrf.mxu1  ;;  %5437 = vmatmul.msk.bf16.gmra.mxu0 %vm573_vm0, %v6473_v34 }
 0x149   : > { %v7437_v36 = vadd.f32 %v984_v35, %v7310_v59  ;;  %v6474_v59 = vld [vmem:[%s7146_s30 + $0x38] sm:$0xff]  ;;  %v1790_v35 = vunpack.c.l.b16 %v1748_v19 }
 0x14b   : > { %5444 = vmatmul.msk.bf16.gmra.mxu1 %vm573_vm0, %v6473_v34  ;;  %v1801_v58 = vpack.c.b16 %v1790_v35, %v1790_v35 }
 0x14d   : > { %v7444_v40 = vpop.f32.mrf.mxu0 }
 0x150   : > { %v7446_v43 = vpop.f32.mrf.mxu1 }
 0x155   : > { %v945_v52 = vpop.f32.mrf.mxu0 }
 0x156   : > { %v7456_v55 = vadd.f32 %v945_v52, %v7326_v6  ;;  %v7469_v6 = vpop.f32.mrf.mxu2 }
 0x157   : > { %9069 = vst [vmem:[#allocation14_spill] sm:$0xff] %v7469_v6 }
 0x158   : > { %v989_v53 = vpop.f32.mrf.mxu1  ;;  %5438 = vmatmul.msk.bf16.gmra.mxu0 %vm573_vm0, %v6474_v59 }
 0x159   : > { %v7459_v0 = vadd.f32 %v989_v53, %v7328_v7  ;;  %v7471_v7 = vpop.f32.mrf.mxu3  ;;  %v6491_v53 = vld [vmem:[%s9039_s4 + $0x8] sm:$0xff] }
 0x15a   : > { %9070 = vst [vmem:[#allocation15_spill] sm:$0xff] %v7471_v7  ;;  %1821 = vmatpush.bf16.msrb.mxu0 %v6491_v53 }
 0x15b   : > { %5445 = vmatmul.msk.bf16.gmra.mxu1 %vm573_vm0, %v6474_v59  ;;  %v6480_v59 = vld [vmem:[%s9038_s3] sm:$0xff] }
 0x15c   : > { %1647 = vmatpush.bf16.msra.mxu2 %v6480_v59  ;;  %v6506_v59 = vld [vmem:[%s9065_s1 + $0x34] sm:$0xf] }
 0x15d   : > { %v7473_v13 = vpop.f32.mrf.mxu0 }
 0x15e   : > { %v1136_v28 = vpop.f32.mrf.mxu2  ;;  %1822 = vmatpush.bf16.msrb.mxu0 %v6490_v5 }
 0x160   : > { %v7475_v4 = vpop.f32.mrf.mxu1 }
 0x161   : > { %v1180_v31 = vpop.f32.mrf.mxu3 }
 0x165   : > { %v950_v16 = vpop.f32.mrf.mxu0 }
 0x166   : > { %v7491_v34 = vadd.f32 %v950_v16, %v7344_v20  ;;  %v1813_v20 = vsel %vm1636_vm1, %v1801_v58, 0  ;;  %v1138_v1 = vpop.f32.mrf.mxu2  ;;  %v6507_v58 = vld [vmem:[%s9065_s1 + $0x34] sm:$0xf0] }
 0x167   : > { %1864 = vmatpush.bf16.msrb.mxu1 %v1813_v20  ;;  %v5556_v20 = vor.u32 %v6507_v58, %v5555_v37  ;;  %v1215_v37 = vadd.f32 %v1136_v28, %v7379_v56  ;;  %v1216_v58 = vadd.f32 %v1180_v31, %v7382_v57 }
 0x168   : > { %v994_v33 = vpop.f32.mrf.mxu1  ;;  %5439 = vmatmul.msk.bf16.gmra.mxu0 %vm573_vm0, %v6475_v25 }
 0x169   : > { %v7494_v46 = vadd.f32 %v994_v33, %v7346_v21  ;;  %v1182_v12 = vpop.f32.mrf.mxu3  ;;  %2037 = vmatpush.bf16.msrb.mxu2 %v5556_v20  ;;  %v1217_v20 = vadd.f32 %v1138_v1, %v7387_v2 }
 0x16b   : > { %5446 = vmatmul.msk.bf16.gmra.mxu1 %vm573_vm0, %v6475_v25 }
 0x16c   : > { %1865 = vmatpush.bf16.msrb.mxu1 %v6499_v54 }
 0x16d   : > { %v7505_v21 = vpop.f32.mrf.mxu0 }
 0x16e   : > { %v1141_v19 = vpop.f32.mrf.mxu2 }
 0x170   : > { %v7507_v52 = vpop.f32.mrf.mxu1  ;;  %1866 = vmatpush.bf16.msrb.mxu1 %v6498_v24 }
 0x171   : > { %v1185_v35 = vpop.f32.mrf.mxu3 }
 0x175   : > { %v955_v25 = vpop.f32.mrf.mxu0 }
 0x176   : > { %v7522_v33 = vadd.f32 %v955_v25, %v7365_v41  ;;  %v5557_v41 = vld [vmem:[%s9065_s1 + $0x38] sm:$0xf0]  ;;  %v1143_v5 = vpop.f32.mrf.mxu2 }
 0x178   : > { %v999_v16 = vpop.f32.mrf.mxu1  ;;  %9071 = vst [vmem:[#allocation16_spill] sm:$0xff] %v7522_v33 }
 0x179   : > { %v7525_v18 = vadd.f32 %v999_v16, %v7367_v42  ;;  %v5560_v42 = vor.u32 %v6506_v59, %v5557_v41  ;;  %v1187_v24 = vpop.f32.mrf.mxu3 }
 0x17b   : > { %9072 = vst [vmem:[#allocation17_spill] sm:$0xff] %v7525_v18  ;;  %2081 = vmatpush.bf16.msrb.mxu3 %v5560_v42  ;;  %v1454_v18 = vld [vmem:[%s9037_s2] sm:$0x3]  ;;  %v1218_v42 = vadd.f32 %v1182_v12, %v7390_v3 }
 0x17c   : > { %v7548_v59 = vperm.slane %v1454_v18, 0 }
 0x17d   : > { %v7539_v53 = vpop.f32.mrf.mxu0 }
 0x17e   : > { %9073 = vst [vmem:[#allocation18_spill] sm:$0xff] %v7539_v53  ;;  %v7550_v53 = vperm.slane %v1454_v18, 1  ;;  %v1146_v45 = vpop.f32.mrf.mxu2 }
 0x180   : > { %v7541_v54 = vpop.f32.mrf.mxu1 }
 0x181   : > { %9074 = vst [vmem:[#allocation19_spill] sm:$0xff] %v7541_v54  ;;  %v1190_v6 = vpop.f32.mrf.mxu3 }
 0x185   : > { %v1347_v25 = vpop.f32.mrf.mxu0 }
 0x186   : > { %v1426_v33 = vadd.f32 %v1347_v25, %v1215_v37 }
 0x188   : > { %v1391_v16 = vpop.f32.mrf.mxu1  ;;  %v1460_v44 = vadd.f32 %v7548_v59, %v1426_v33  ;;  %v1220_v33 = vadd.f32 %v1185_v35, %v7400_v15 }
 0x189   : > { %v1427_v41 = vadd.f32 %v1391_v16, %v1216_v58 }
 0x18a   : > { %v1488_v18 = vmax.f32 %v1460_v44, 0.0  ;;  %v1192_v44 = vpop.f32.mrf.mxu3 }
 0x18b   : > { %v1461_v56 = vadd.f32 %v7550_v53, %v1427_v41 }
 0x18d   : > { %v1349_v54 = vpop.f32.mrf.mxu0  ;;  %v1489_v16 = vmax.f32 %v1461_v56, 0.0  ;;  %v1222_v56 = vadd.f32 %v1187_v24, %v7411_v32 }
 0x18e   : > { %v1428_v28 = vadd.f32 %v1349_v54, %v1217_v20  ;;  %v1148_v54 = vpop.f32.mrf.mxu2 }
 0x190   : > { %v1393_v7 = vpop.f32.mrf.mxu1  ;;  %v1462_v31 = vadd.f32 %v7548_v59, %v1428_v28 }
 0x191   : > { %v1429_v57 = vadd.f32 %v1393_v7, %v1218_v42  ;;  %v1219_v7 = vadd.f32 %v1141_v19, %v7397_v14  ;;  %v1221_v42 = vadd.f32 %v1143_v5, %v7408_v17 }
 0x192   : > { %v1490_v37 = vmax.f32 %v1462_v31, 0.0  ;;  %v1195_v35 = vpop.f32.mrf.mxu3 }
 0x193   : > { %v1463_v25 = vadd.f32 %v7550_v53, %v1429_v57 }
 0x194   : > { %v1516_v3 = vpack.c.bf16 %v1490_v37, %v1488_v18 }
 0x195   : > { %v1491_v2 = vmax.f32 %v1463_v25, 0.0  ;;  %v1352_v12 = vpop.f32.mrf.mxu0 }
 0x196   : > { %1648 = vmatmul.bf16.vlgmr.msra.gmra.mxu2 %v1516_v3  ;;  %1823 = vmatmul.bf16.vlgmr.msrb.gmra.mxu0 %v1516_v3  ;;  %v1430_v41 = vadd.f32 %v1352_v12, %v1219_v7  ;;  %v1151_v19 = vpop.f32.mrf.mxu2  ;;  %v755_v12 = vadd.f32 %v7298_v50, %v7294_v48  ;;  %v1223_v7 = vadd.f32 %v1146_v45, %v7418_v29 }
 0x197   : > { %v1517_v1 = vpack.c.bf16 %v1491_v2, %v1489_v16 }
 0x198   : > { %v1396_v58 = vpop.f32.mrf.mxu1  ;;  %v1464_v31 = vadd.f32 %v7548_v59, %v1430_v41  ;;  %v1014_v41 = vadd.f32 %v7425_v38, %v755_v12  ;;  %v760_v12 = vadd.f32 %v7316_v62, %v7312_v60 }
 0x199   : > { %5487 = vmatmul.msk.bf16.vlgmr.msra.gmra.mxu3 %vm1614_vm2, %v1517_v1  ;;  %5534 = vmatmul.msk.bf16.vlgmr.msrb.gmra.mxu1 %vm1614_vm2, %v1517_v1  ;;  %v1431_v20 = vadd.f32 %v1396_v58, %v1220_v33  ;;  %v799_v58 = vadd.f32 %v7300_v51, %v7296_v49  ;;  %v1224_v33 = vadd.f32 %v1190_v6, %v7421_v30 }
 0x19a   : > { %v1492_v37 = vmax.f32 %v1464_v31, 0.0 }
 0x19b   : > { %v1465_v25 = vadd.f32 %v7550_v53, %v1431_v20  ;;  %v1015_v20 = vadd.f32 %v7427_v39, %v799_v58  ;;  %v804_v58 = vadd.f32 %v7318_v63, %v7314_v61 }
 0x19d   : > { %v1354_v28 = vpop.f32.mrf.mxu0  ;;  %v1493_v2 = vmax.f32 %v1465_v25, 0.0  ;;  %v1197_v25 = vpop.f32.mrf.mxu3 }
 0x19e   : > { %v1432_v18 = vadd.f32 %v1354_v28, %v1221_v42  ;;  %v1225_v28 = vadd.f32 %v1148_v54, %v1014_v41  ;;  %v1153_v31 = vpop.f32.mrf.mxu2  ;;  %v1018_v41 = vadd.f32 %v7444_v40, %v760_v12 }
 0x1a0   : > { %v1398_v57 = vpop.f32.mrf.mxu1  ;;  %v1466_v14 = vadd.f32 %v7548_v59, %v1432_v18 }
 0x1a1   : > { %v1433_v16 = vadd.f32 %v1398_v57, %v1222_v56  ;;  %v1226_v57 = vadd.f32 %v1192_v44, %v1015_v20  ;;  %v1019_v20 = vadd.f32 %v7446_v43, %v804_v58 }
 0x1a2   : > { %v1494_v3 = vmax.f32 %v1466_v14, 0.0  ;;  %v5547_v14 = vld [vmem:[%s9065_s1 + $0x20] sm:$0xf] }
 0x1a3   : > { %v1467_v15 = vadd.f32 %v7550_v53, %v1433_v16  ;;  %v1230_v60 = vadd.f32 %v1197_v25, %v1019_v20  ;;  %v5585_v20 = vld [vmem:[%s9065_s1 + $0x10] sm:$0xf] }
 0x1a4   : > { %v1518_v32 = vpack.c.bf16 %v1494_v3, %v1492_v37  ;;  %v6504_v37 = vld [vmem:[%s9065_s1 + $0x24] sm:$0xf] }
 0x1a5   : > { %v1495_v17 = vmax.f32 %v1467_v15, 0.0  ;;  %v1357_v24 = vpop.f32.mrf.mxu0  ;;  %v6505_v15 = vld [vmem:[%s9065_s1 + $0x24] sm:$0xf0] }
 0x1a6   : > { %1653 = vmatmul.bf16.gmra.mxu2 %v1518_v32  ;;  %1828 = vmatmul.bf16.gmra.mxu0 %v1518_v32  ;;  %v1434_v42 = vadd.f32 %v1357_v24, %v1223_v7  ;;  %v1156_v32 = vpop.f32.mrf.mxu2  ;;  %v1200_v24 = vpop.f32.mrf.mxu3  ;;  %v1227_v7 = vadd.f32 %v1151_v19, %v7434_v47 }
 0x1a7   : > { %v1519_v5 = vpack.c.bf16 %v1495_v17, %v1493_v2  ;;  %v5548_v17 = vor.u32 %v6505_v15, %v5547_v14 }
 0x1a8   : > { %v1401_v1 = vpop.f32.mrf.mxu1  ;;  %v1468_v48 = vadd.f32 %v7548_v59, %v1434_v42 }
 0x1a9   : > { %5488 = vmatmul.msk.bf16.gmra.mxu3 %vm1614_vm2, %v1519_v5  ;;  %5535 = vmatmul.msk.bf16.gmra.mxu1 %vm1614_vm2, %v1519_v5  ;;  %v1435_v56 = vadd.f32 %v1401_v1, %v1224_v33  ;;  %v5549_v5 = vld [vmem:[%s9065_s1 + $0x28] sm:$0xf0]  ;;  %v1228_v33 = vadd.f32 %v1195_v35, %v7437_v36 }
 0x1aa   : > { %v1496_v30 = vmax.f32 %v1468_v48, 0.0  ;;  %v5552_v1 = vor.u32 %v6504_v37, %v5549_v5  ;;  %2038 = vmatpush.bf16.msrb.mxu2 %v5548_v17 }
 0x1ab   : > { %v1469_v49 = vadd.f32 %v7550_v53, %v1435_v56 }
 0x1ac   : > { %2082 = vmatpush.bf16.msrb.mxu3 %v5552_v1 }
 0x1ad   : > { %v1359_v18 = vpop.f32.mrf.mxu0  ;;  %v1497_v38 = vmax.f32 %v1469_v49, 0.0 }
 0x1ae   : > { %v1436_v50 = vadd.f32 %v1359_v18, %v1225_v28  ;;  %v1229_v28 = vadd.f32 %v1153_v31, %v1018_v41  ;;  %v1158_v19 = vpop.f32.mrf.mxu2  ;;  %v1202_v36 = vpop.f32.mrf.mxu3  ;;  %v770_v41 = vadd.f32 %v7352_v26, %v7348_v22 }
 0x1b0   : > { %v1403_v16 = vpop.f32.mrf.mxu1  ;;  %v1470_v45 = vadd.f32 %v7548_v59, %v1436_v50 }
 0x1b1   : > { %v1437_v51 = vadd.f32 %v1403_v16, %v1226_v57 }
 0x1b2   : > { %v1498_v39 = vmax.f32 %v1470_v45, 0.0  ;;  %v765_v45 = vadd.f32 %v7334_v10, %v7330_v8 }
 0x1b3   : > { %v1471_v29 = vadd.f32 %v7550_v53, %v1437_v51 }
 0x1b4   : > { %v1520_v44 = vpack.c.bf16 %v1498_v39, %v1496_v30  ;;  %v1231_v30 = vadd.f32 %v1156_v32, %v7456_v55  ;;  %v1022_v39 = vadd.f32 %v7473_v13, %v765_v45 }
 0x1b5   : > { %v1499_v6 = vmax.f32 %v1471_v29, 0.0  ;;  %v1362_v2 = vpop.f32.mrf.mxu0  ;;  %v809_v29 = vadd.f32 %v7336_v11, %v7332_v9 }
 0x1b6   : > { %1658 = vmatmul.bf16.gmra.mxu2 %v1520_v44  ;;  %1833 = vmatmul.bf16.gmra.mxu0 %v1520_v44  ;;  %v1438_v42 = vadd.f32 %v1362_v2, %v1227_v7  ;;  %v1205_v44 = vpop.f32.mrf.mxu3  ;;  %v1233_v37 = vadd.f32 %v1158_v19, %v1022_v39  ;;  %v6517_v39 = vld [vmem:[%s9065_s1 + $0x54] sm:$0xf] }
 0x1b7   : > { %v1521_v54 = vpack.c.bf16 %v1499_v6, %v1497_v38  ;;  %v1232_v38 = vadd.f32 %v1200_v24, %v7459_v0  ;;  %v1023_v6 = vadd.f32 %v7475_v4, %v809_v29  ;;  %v1236_v26 = vadd.f32 %v1205_v44, %v7494_v46 }
 0x1b8   : > { %v1406_v3 = vpop.f32.mrf.mxu1  ;;  %v1472_v18 = vadd.f32 %v7548_v59, %v1438_v42  ;;  %v6503_v42 = vld [vmem:[%s9065_s1 + $0x14] sm:$0xf0] }
 0x1b9   : > { %5489 = vmatmul.msk.bf16.gmra.mxu3 %vm1614_vm2, %v1521_v54  ;;  %5536 = vmatmul.msk.bf16.gmra.mxu1 %vm1614_vm2, %v1521_v54  ;;  %v1439_v56 = vadd.f32 %v1406_v3, %v1228_v33  ;;  %v1161_v54 = vpop.f32.mrf.mxu2  ;;  %v1234_v2 = vadd.f32 %v1202_v36, %v1023_v6  ;;  %v9075_v6 = vld [vmem:[#allocation12_spill] sm:$0xff] }
 0x1ba   : > { %v1500_v16 = vmax.f32 %v1472_v18, 0.0  ;;  %v1235_v22 = vadd.f32 %v1161_v54, %v7491_v34  ;;  %v1026_v18 = vadd.f32 %v7505_v21, %v770_v41  ;;  %v9076_v54 = vld [vmem:[#allocation14_spill] sm:$0xff] }
 0x1bb   : > { %v1473_v61 = vadd.f32 %v7550_v53, %v1439_v56  ;;  %v6502_v56 = vld [vmem:[%s9065_s1 + $0x14] sm:$0xf]  ;;  %v775_v44 = vadd.f32 %v9076_v54, %v9075_v6  ;;  %v6831_v54 = vld [vmem:[%s7146_s30 + $0x4c] sm:$0xff]  }
 0x1bd   : > { %v1364_v62 = vpop.f32.mrf.mxu0  ;;  %v1501_v43 = vmax.f32 %v1473_v61, 0.0 }
 0x1be   : > { %v1440_v63 = vadd.f32 %v1364_v62, %v1229_v28  ;;  %v1207_v1 = vpop.f32.mrf.mxu3  ;;  %v814_v28 = vadd.f32 %v7354_v27, %v7350_v23  ;;  %v5587_v62 = vld [vmem:[%s9065_s1 + $0x18] sm:$0xf0] }
 0x1c0   : > { %v1408_v57 = vpop.f32.mrf.mxu1  ;;  %v1474_v35 = vadd.f32 %v7548_v59, %v1440_v63  ;;  %v1027_v61 = vadd.f32 %v7507_v52, %v814_v28 }
 0x1c1   : > { %v1441_v47 = vadd.f32 %v1408_v57, %v1230_v60  ;;  %v1163_v24 = vpop.f32.mrf.mxu2  ;;  %v5586_v60 = vor.u32 %v6503_v42, %v5585_v20  ;;  %v5590_v57 = vor.u32 %v6502_v56, %v5587_v62 }
 0x1c2   : > { %v1502_v48 = vmax.f32 %v1474_v35, 0.0  ;;  %v1237_v19 = vadd.f32 %v1163_v24, %v1026_v18  ;;  %v1238_v23 = vadd.f32 %v1207_v1, %v1027_v61 }
 0x1c3   : > { %v1475_v40 = vadd.f32 %v7550_v53, %v1441_v47  ;;  %2175 = vmatpush.bf16.msra.mxu0 %v5586_v60  ;;  %2219 = vmatpush.bf16.msra.mxu1 %v5590_v57 }
 0x1c4   : > { %v1522_v25 = vpack.c.bf16 %v1502_v48, %v1500_v16 }
 0x1c5   : > { %v1503_v49 = vmax.f32 %v1475_v40, 0.0  ;;  %v1367_v50 = vpop.f32.mrf.mxu0 }
 0x1c6   : > { %1663 = vmatmul.bf16.gmra.mxu2 %v1522_v25  ;;  %1838 = vmatmul.bf16.gmra.mxu0 %v1522_v25  ;;  %v1442_v14 = vadd.f32 %v1367_v50, %v1231_v30  ;;  %v5647_v30 = vld [vmem:[%s9065_s1 + $0x50] sm:$0xf] }
 0x1c7   : > { %v1523_v31 = vpack.c.bf16 %v1503_v49, %v1501_v43  ;;  %v1210_v43 = vpop.f32.mrf.mxu3 }
 0x1c8   : > { %v1411_v51 = vpop.f32.mrf.mxu1  ;;  %v1476_v8 = vadd.f32 %v7548_v59, %v1442_v14  ;;  %v9077_v14 = vld [vmem:[#allocation13_spill] sm:$0xff] }
 0x1c9   : > { %5490 = vmatmul.msk.bf16.gmra.mxu3 %vm1614_vm2, %v1523_v31  ;;  %5537 = vmatmul.msk.bf16.gmra.mxu1 %vm1614_vm2, %v1523_v31  ;;  %v1443_v15 = vadd.f32 %v1411_v51, %v1232_v38  ;;  %v1166_v16 = vpop.f32.mrf.mxu2  ;;  %v6518_v38 = vld [vmem:[%s9065_s1 + $0x54] sm:$0xf0] }
 0x1ca   : > { %v1504_v13 = vmax.f32 %v1476_v8, 0.0  ;;  %v6501_v8 = vld [vmem:[%s9065_s1 + $0x4] sm:$0xf0] }
 0x1cb   : > { %v1477_v9 = vadd.f32 %v7550_v53, %v1443_v15  ;;  %v9078_v15 = vld [vmem:[#allocation15_spill] sm:$0xff] }
 0x1cd   : > { %v1369_v3 = vpop.f32.mrf.mxu0  ;;  %v1505_v4 = vmax.f32 %v1477_v9, 0.0  ;;  %v9079_v9 = vld [vmem:[#allocation16_spill] sm:$0xff] }
 0x1ce   : > { %v1444_v10 = vadd.f32 %v1369_v3, %v1233_v37  ;;  %v819_v37 = vadd.f32 %v9078_v15, %v9077_v14  ;;  %v5649_v3 = vld [vmem:[%s9065_s1 + $0x58] sm:$0xf0] }
 0x1d0   : > { %v1413_v17 = vpop.f32.mrf.mxu1  ;;  %v1478_v55 = vadd.f32 %v7548_v59, %v1444_v10  ;;  %v1239_v10 = vadd.f32 %v1166_v16, %v9079_v9 }
 0x1d1   : > { %v1445_v11 = vadd.f32 %v1413_v17, %v1234_v2  ;;  %v5648_v2 = vor.u32 %v6518_v38, %v5647_v30  ;;  %v5577_v17 = vld [vmem:[%s9065_s1] sm:$0xf]  ;;  %v1168_v1 = vpop.f32.mrf.mxu2 }
 0x1d2   : > { %v1506_v5 = vmax.f32 %v1478_v55, 0.0 }
 0x1d3   : > { %v1479_v0 = vadd.f32 %v7550_v53, %v1445_v11  ;;  %v9080_v11 = vld [vmem:[#allocation17_spill] sm:$0xff]  ;;  %2357 = vmatpush.bf16.msra.mxu2 %v5648_v2 }
 0x1d4   : > { %v1524_v58 = vpack.c.bf16 %v1506_v5, %v1504_v13  ;;  %v1240_v55 = vadd.f32 %v1210_v43, %v9080_v11  ;;  %v5578_v13 = vor.u32 %v6501_v8, %v5577_v17  ;;  %v5579_v5 = vld [vmem:[%s9065_s1 + $0x8] sm:$0xf0] }
 0x1d5   : > { %v1507_v32 = vmax.f32 %v1479_v0, 0.0  ;;  %v1372_v7 = vpop.f32.mrf.mxu0  ;;  %v5652_v0 = vor.u32 %v6517_v39, %v5649_v3  ;;  %v6736_v2 = vld [vmem:[%s7146_s30 + $0x48] sm:$0xff]  }
 0x1d6   : > { %1668 = vmatmul.bf16.gmra.mxu2 %v1524_v58  ;;  %1843 = vmatmul.bf16.gmra.mxu0 %v1524_v58  ;;  %v1446_v63 = vadd.f32 %v1372_v7, %v1235_v22  ;;  %v9082_v7 = vld [vmem:[#allocation19_spill] sm:$0xff] }
 0x1d7   : > { %v1525_v12 = vpack.c.bf16 %v1507_v32, %v1505_v4  ;;  %v6500_v4 = vld [vmem:[%s9065_s1 + $0x4] sm:$0xf]  ;;  %v9081_v32 = vld [vmem:[#allocation18_spill] sm:$0xff]  ;;  %2401 = vmatpush.bf16.msra.mxu3 %v5652_v0  ;;  %2176 = vmatpush.bf16.msra.mxu0 %v5578_v13 }
 0x1d8   : > { %v1416_v33 = vpop.f32.mrf.mxu1  ;;  %v1480_v46 = vadd.f32 %v7548_v59, %v1446_v63  ;;  %v1030_v24 = vadd.f32 %v9081_v32, %v775_v44  ;;  %v5582_v58 = vor.u32 %v6500_v4, %v5579_v5  ;;  %v6833_v32 = vld [vmem:[%s7146_s30 + $0x54] sm:$0xff]  }
 0x1d9   : > { %5491 = vmatmul.msk.bf16.gmra.mxu3 %vm1614_vm2, %v1525_v12  ;;  %5538 = vmatmul.msk.bf16.gmra.mxu1 %vm1614_vm2, %v1525_v12  ;;  %v1447_v47 = vadd.f32 %v1416_v33, %v1236_v26  ;;  %v1212_v12 = vpop.f32.mrf.mxu3  ;;  %v1031_v33 = vadd.f32 %v9082_v7, %v819_v37  ;;  %v6737_v7 = vld [vmem:[%s7146_s30 + $0x50] sm:$0xff]  }
 0x1da   : > { %v1508_v48 = vmax.f32 %v1480_v46, 0.0  ;;  %2220 = vmatpush.bf16.msra.mxu1 %v5582_v58  ;;  %v1241_v42 = vadd.f32 %v1168_v1, %v1030_v24  ;;  %v6827_v46 = vld [vmem:[%s7146_s30 + $0x3c] sm:$0xff]  }
 0x1db   : > { %v1481_v36 = vadd.f32 %v7550_v53, %v1447_v47  ;;  %v1242_v56 = vadd.f32 %v1212_v12, %v1031_v33 }
 0x1dd   : > { %v1374_v27 = vpop.f32.mrf.mxu0  ;;  %v1509_v49 = vmax.f32 %v1481_v36, 0.0  ;;  %v6734_v36 = vld [vmem:[%s7146_s30 + $0x38] sm:$0xff]  }
 0x1de   : > { %v1448_v35 = vadd.f32 %v1374_v27, %v1237_v19 }
 0x1e0   : > { %v1418_v34 = vpop.f32.mrf.mxu1  ;;  %v1482_v21 = vadd.f32 %v7548_v59, %v1448_v35 }
 0x1e1   : > { %v1449_v40 = vadd.f32 %v1418_v34, %v1238_v23 }
 0x1e2   : > { %v1510_v31 = vmax.f32 %v1482_v21, 0.0 }
 0x1e3   : > { %v1483_v52 = vadd.f32 %v7550_v53, %v1449_v40  ;;  %v6735_v40 = vld [vmem:[%s7146_s30 + $0x40] sm:$0xff]  }
 0x1e4   : > { %v1526_v51 = vpack.c.bf16 %v1510_v31, %v1508_v48  ;;  %v5639_v48 = vld [vmem:[%s9065_s1 + $0x40] sm:$0xf]  ;;  %v6515_v31 = vld [vmem:[%s9065_s1 + $0x44] sm:$0xf] }
 0x1e5   : > { %v1511_v25 = vmax.f32 %v1483_v52, 0.0  ;;  %v1377_v45 = vpop.f32.mrf.mxu0 }
 0x1e6   : > { %1673 = vmatmul.bf16.gmra.mxu2 %v1526_v51  ;;  %1848 = vmatmul.bf16.gmra.mxu0 %v1526_v51  ;;  %v1450_v41 = vadd.f32 %v1377_v45, %v1239_v10 }
 0x1e7   : > { %v1527_v50 = vpack.c.bf16 %v1511_v25, %v1509_v49  ;;  %v6516_v49 = vld [vmem:[%s9065_s1 + $0x44] sm:$0xf0] }
 0x1e8   : > { %v1421_v29 = vpop.f32.mrf.mxu1  ;;  %v1484_v26 = vadd.f32 %v7548_v59, %v1450_v41  ;;  %v5640_v25 = vor.u32 %v6516_v49, %v5639_v48 }
 0x1e9   : > { %5492 = vmatmul.msk.bf16.gmra.mxu3 %vm1614_vm2, %v1527_v50  ;;  %5539 = vmatmul.msk.bf16.gmra.mxu1 %vm1614_vm2, %v1527_v50  ;;  %v1451_v20 = vadd.f32 %v1421_v29, %v1240_v55  ;;  %v5641_v50 = vld [vmem:[%s9065_s1 + $0x48] sm:$0xf0] }
 0x1ea   : > { %v1512_v63 = vmax.f32 %v1484_v26, 0.0  ;;  %v5644_v51 = vor.u32 %v6515_v31, %v5641_v50  ;;  %2358 = vmatpush.bf16.msra.mxu2 %v5640_v25  ;;  %v6739_v50 = vld [vmem:[%s7146_s30 + $0x60] sm:$0xff]  }
 0x1eb   : > { %v1485_v60 = vadd.f32 %v7550_v53, %v1451_v20 }
 0x1ec   : > { %2402 = vmatpush.bf16.msra.mxu3 %v5644_v51  ;;  %v5709_v51 = vld [vmem:[%s9065_s1 + $0x70] sm:$0xf] }
 0x1ed   : > { %v1379_v28 = vpop.f32.mrf.mxu0  ;;  %v1513_v47 = vmax.f32 %v1485_v60, 0.0 }
 0x1ee   : > { %v1452_v62 = vadd.f32 %v1379_v28, %v1241_v42 }
 0x1f0   : > { %v1423_v22 = vpop.f32.mrf.mxu1  ;;  %v1486_v18 = vadd.f32 %v7548_v59, %v1452_v62 }
 0x1f1   : > { %v1453_v57 = vadd.f32 %v1423_v22, %v1242_v56 }
 0x1f2   : > { %v1514_v19 = vmax.f32 %v1486_v18, 0.0  ;;  %v6835_v18 = vld [vmem:[%s7146_s30 + $0x5c] sm:$0xff]  }
 0x1f3   : > { %v1487_v61 = vadd.f32 %v7550_v53, %v1453_v57  ;;  %v6829_v53 = vld [vmem:[%s7146_s30 + $0x44] sm:$0xff]  }
 0x1f4   : > { %v1528_v34 = vpack.c.bf16 %v1514_v19, %v1512_v63 }
 0x1f5   : > { %v1515_v23 = vmax.f32 %v1487_v61, 0.0 }
 0x1f6   : > { %1678 = vmatmul.bf16.gmra.mxu2 %v1528_v34  ;;  %1853 = vmatmul.bf16.gmra.mxu0 %v1528_v34 }
 0x1f7   : > { %v1529_v27 = vpack.c.bf16 %v1515_v23, %v1513_v47  ;;  %v6738_v23 = vld [vmem:[%s7146_s30 + $0x58] sm:$0xff]  }
 0x1f9   : > { %5493 = vmatmul.msk.bf16.gmra.mxu3 %vm1614_vm2, %v1529_v27  ;;  %5540 = vmatmul.msk.bf16.gmra.mxu1 %vm1614_vm2, %v1529_v27 }
 0x206   : > { %5561 = vmatmul.msk.bf16.vlgmr.msrb.gmra.mxu2 %vm573_vm0, %v6827_v46  ;;  %5591 = vmatmul.msk.bf16.vlgmr.msra.gmra.mxu0 %vm573_vm0, %v6734_v36 }
 0x209   : > { %5568 = vmatmul.msk.bf16.vlgmr.msrb.gmra.mxu3 %vm573_vm0, %v6827_v46  ;;  %5598 = vmatmul.msk.bf16.vlgmr.msra.gmra.mxu1 %vm573_vm0, %v6734_v36 }
 0x213   : > { %v1824_v59 = vpop.f32.mrf.mxu0 }
 0x216   : > { %v1868_v35 = vpop.f32.mrf.mxu1  ;;  %5562 = vmatmul.msk.bf16.gmra.mxu2 %vm573_vm0, %v6829_v53  ;;  %5592 = vmatmul.msk.bf16.gmra.mxu0 %vm573_vm0, %v6735_v40 }
 0x217   : > { %v1869_v38 = vadd.f32 %v1868_v35, %v1824_v59 }
 0x219   : > { %5569 = vmatmul.msk.bf16.gmra.mxu3 %vm573_vm0, %v6829_v53  ;;  %5599 = vmatmul.msk.bf16.gmra.mxu1 %vm573_vm0, %v6735_v40  ;;  %v1649_v16 = vpop.f32.mrf.mxu2 }
 0x21b   : > { %v1826_v21 = vpop.f32.mrf.mxu0 }
 0x21c   : > { %v1693_v43 = vpop.f32.mrf.mxu3 }
 0x21d   : > { %v1694_v45 = vadd.f32 %v1693_v43, %v1649_v16 }
 0x21e   : > { %v1870_v52 = vpop.f32.mrf.mxu1 }
 0x21f   : > { %v1871_v39 = vadd.f32 %v1870_v52, %v1826_v21  ;;  %v1903_v44 = vmax.f32 %v1694_v45, %v1869_v38  ;;  %v6837_v52 = vld [vmem:[%s7146_s30 + $0x64] sm:$0xff]   ;;  %v6529_v45 = vld [vmem:[%s9065_s1 + $0x74] sm:$0xf0]  ;;  %v6528_v38 = vld [vmem:[%s9065_s1 + $0x74] sm:$0xf] }
 0x221   : > { %v1651_v29 = vpop.f32.mrf.mxu2 }
 0x223   : > { %v1829_v15 = vpop.f32.mrf.mxu0 }
 0x224   : > { %v1695_v30 = vpop.f32.mrf.mxu3 }
 0x225   : > { %v1696_v6 = vadd.f32 %v1695_v30, %v1651_v29  ;;  %v5710_v30 = vor.u32 %v6529_v45, %v5709_v51  ;;  %v6520_v51 = vld [vmem:[%s7146_s30 + $0x4c] sm:$0xff] }
 0x226   : > { %v1873_v37 = vpop.f32.mrf.mxu1  ;;  %5563 = vmatmul.msk.bf16.gmra.mxu2 %vm573_vm0, %v6831_v54  ;;  %5593 = vmatmul.msk.bf16.gmra.mxu0 %vm573_vm0, %v6736_v2 }
 0x227   : > { %v1904_v14 = vmax.f32 %v1696_v6, %v1871_v39  ;;  %v1874_v13 = vadd.f32 %v1873_v37, %v1829_v15  ;;  %v5711_v39 = vld [vmem:[%s9065_s1 + $0x78] sm:$0xf0]  ;;  %2567 = vmatpush.bf16.msrb.mxu0 %v5710_v30 }
 0x228   : > { %v5714_v6 = vor.u32 %v6528_v38, %v5711_v39 }
 0x229   : > { %v1917_v3 = vmax.f32 %v1903_v44, %v1904_v14  ;;  %5570 = vmatmul.msk.bf16.gmra.mxu3 %vm573_vm0, %v6831_v54  ;;  %5600 = vmatmul.msk.bf16.gmra.mxu1 %vm573_vm0, %v6736_v2  ;;  %v1654_v17 = vpop.f32.mrf.mxu2  ;;  %v5771_v54 = vld [vmem:[%s9065_s1 + $0x90] sm:$0xf]  ;;  %v6540_v44 = vld [vmem:[%s9065_s1 + $0x94] sm:$0xf0]  ;;  %v6539_v2 = vld [vmem:[%s9065_s1 + $0x94] sm:$0xf] }
 0x22a   : > { %v5772_v37 = vor.u32 %v6540_v44, %v5771_v54  ;;  %2611 = vmatpush.bf16.msrb.mxu1 %v5714_v6 }
 0x22b   : > { %1919 = vst.msk [vmem:[#allocation2] sm:$0xff] %vm1918_vm3, %v1917_v3  ;;  %v1831_v9 = vpop.f32.mrf.mxu0  ;;  %v5773_v3 = vld [vmem:[%s9065_s1 + $0x98] sm:$0xf0] }
 0x22c   : > { %v1698_v8 = vpop.f32.mrf.mxu3  ;;  %2777 = vmatpush.bf16.msrb.mxu2 %v5772_v37  ;;  %v6538_v37 = vld [vmem:[%s9065_s1 + $0x84] sm:$0xf0] }
 0x22d   : > { %v1699_v11 = vadd.f32 %v1698_v8, %v1654_v17  ;;  %v5701_v17 = vld [vmem:[%s9065_s1 + $0x60] sm:$0xf]  ;;  %v5776_v8 = vor.u32 %v6539_v2, %v5773_v3  ;;  %v6537_v3 = vld [vmem:[%s9065_s1 + $0x84] sm:$0xf] }
 0x22e   : > { %v1875_v10 = vpop.f32.mrf.mxu1 }
 0x22f   : > { %v1876_v4 = vadd.f32 %v1875_v10, %v1831_v9  ;;  %v1905_v24 = vmax.f32 %v1699_v11, %v1874_v13  ;;  %v6527_v9 = vld [vmem:[%s9065_s1 + $0x64] sm:$0xf0]  ;;  %v6526_v10 = vld [vmem:[%s9065_s1 + $0x64] sm:$0xf]  ;;  %v5703_v11 = vld [vmem:[%s9065_s1 + $0x68] sm:$0xf0]  ;;  %2821 = vmatpush.bf16.msrb.mxu3 %v5776_v8 }
 0x231   : > { %v1656_v55 = vpop.f32.mrf.mxu2 }
 0x233   : > { %v1834_v12 = vpop.f32.mrf.mxu0 }
 0x234   : > { %v1700_v0 = vpop.f32.mrf.mxu3 }
 0x235   : > { %v1701_v5 = vadd.f32 %v1700_v0, %v1656_v55  ;;  %v5702_v55 = vor.u32 %v6527_v9, %v5701_v17  ;;  %v5706_v0 = vor.u32 %v6526_v10, %v5703_v11  ;;  %v5765_v17 = vld [vmem:[%s9065_s1 + $0x88] sm:$0xf0] }
 0x236   : > { %v1878_v58 = vpop.f32.mrf.mxu1  ;;  %5564 = vmatmul.msk.bf16.gmra.mxu2 %vm573_vm0, %v6833_v32  ;;  %5594 = vmatmul.msk.bf16.gmra.mxu0 %vm573_vm0, %v6737_v7  ;;  %v5768_v10 = vor.u32 %v6537_v3, %v5765_v17 }
 0x237   : > { %v1906_v1 = vmax.f32 %v1701_v5, %v1876_v4  ;;  %v1879_v60 = vadd.f32 %v1878_v58, %v1834_v12  ;;  %2568 = vmatpush.bf16.msrb.mxu0 %v5702_v55  ;;  %2612 = vmatpush.bf16.msrb.mxu1 %v5706_v0 }
 0x238   : > { %2822 = vmatpush.bf16.msrb.mxu3 %v5768_v10 }
 0x239   : > { %v1920_v33 = vmax.f32 %v1905_v24, %v1906_v1  ;;  %5571 = vmatmul.msk.bf16.gmra.mxu3 %vm573_vm0, %v6833_v32  ;;  %5601 = vmatmul.msk.bf16.gmra.mxu1 %vm573_vm0, %v6737_v7  ;;  %v1659_v41 = vpop.f32.mrf.mxu2  ;;  %v6838_v7 = vld [vmem:[%s7146_s30 + $0x6c] sm:$0xff] }
 0x23b   : > { %1921 = vst.msk [vmem:[#allocation2 + $0x8] sm:$0xff] %vm1918_vm3, %v1920_v33  ;;  %v1836_v42 = vpop.f32.mrf.mxu0 }
 0x23c   : > { %v1703_v20 = vpop.f32.mrf.mxu3 }
 0x23d   : > { %v1704_v28 = vadd.f32 %v1703_v20, %v1659_v41 }
 0x23e   : > { %v1880_v56 = vpop.f32.mrf.mxu1 }
 0x23f   : > { %v1881_v62 = vadd.f32 %v1880_v56, %v1836_v42  ;;  %v1907_v61 = vmax.f32 %v1704_v28, %v1879_v60  ;;  %v6740_v56 = vld [vmem:[%s7146_s30 + $0x68] sm:$0xff]  }
 0x241   : > { %v1661_v22 = vpop.f32.mrf.mxu2 }
 0x243   : > { %v1839_v47 = vpop.f32.mrf.mxu0 }
 0x244   : > { %v1705_v26 = vpop.f32.mrf.mxu3 }
 0x245   : > { %v1706_v57 = vadd.f32 %v1705_v26, %v1661_v22 }
 0x246   : > { %v1883_v19 = vpop.f32.mrf.mxu1  ;;  %5565 = vmatmul.msk.bf16.gmra.mxu2 %vm573_vm0, %v6835_v18  ;;  %5595 = vmatmul.msk.bf16.gmra.mxu0 %vm573_vm0, %v6738_v23 }
 0x247   : > { %v1908_v63 = vmax.f32 %v1706_v57, %v1881_v62  ;;  %v1884_v16 = vadd.f32 %v1883_v19, %v1839_v47 }
 0x249   : > { %v1922_v27 = vmax.f32 %v1907_v61, %v1908_v63  ;;  %5572 = vmatmul.msk.bf16.gmra.mxu3 %vm573_vm0, %v6835_v18  ;;  %5602 = vmatmul.msk.bf16.gmra.mxu1 %vm573_vm0, %v6738_v23  ;;  %v1664_v34 = vpop.f32.mrf.mxu2  ;;  %v6508_v23 = vld [vmem:[%s7146_s30 + $0x40] sm:$0xff] }
 0x24b   : > { %1923 = vst.msk [vmem:[#allocation2 + $0x10] sm:$0xff] %vm1918_vm3, %v1922_v27  ;;  %v1841_v36 = vpop.f32.mrf.mxu0  ;;  %v6519_v27 = vld [vmem:[%s7146_s30 + $0x44] sm:$0xff] }
 0x24c   : > { %v1708_v46 = vpop.f32.mrf.mxu3 }
 0x24d   : > { %v1709_v59 = vadd.f32 %v1708_v46, %v1664_v34 }
 0x24e   : > { %v1885_v53 = vpop.f32.mrf.mxu1 }
 0x24f   : > { %v1886_v43 = vadd.f32 %v1885_v53, %v1841_v36  ;;  %v1909_v48 = vmax.f32 %v1709_v59, %v1884_v16 }
 0x251   : > { %v1666_v35 = vpop.f32.mrf.mxu2 }
 0x253   : > { %v1844_v31 = vpop.f32.mrf.mxu0 }
 0x254   : > { %v1710_v40 = vpop.f32.mrf.mxu3 }
 0x255   : > { %v1711_v21 = vadd.f32 %v1710_v40, %v1666_v35 }
 0x256   : > { %v1888_v25 = vpop.f32.mrf.mxu1  ;;  %5566 = vmatmul.msk.bf16.gmra.mxu2 %vm573_vm0, %v6837_v52  ;;  %5596 = vmatmul.msk.bf16.gmra.mxu0 %vm573_vm0, %v6739_v50 }
 0x257   : > { %v1910_v49 = vmax.f32 %v1711_v21, %v1886_v43  ;;  %v1889_v1 = vadd.f32 %v1888_v25, %v1844_v31 }
 0x259   : > { %v1924_v29 = vmax.f32 %v1909_v48, %v1910_v49  ;;  %5573 = vmatmul.msk.bf16.gmra.mxu3 %vm573_vm0, %v6837_v52  ;;  %5603 = vmatmul.msk.bf16.gmra.mxu1 %vm573_vm0, %v6739_v50  ;;  %v1669_v14 = vpop.f32.mrf.mxu2  ;;  %v6509_v50 = vld [vmem:[%s7146_s30 + $0x48] sm:$0xff] }
 0x25b   : > { %1925 = vst.msk [vmem:[#allocation2 + $0x18] sm:$0xff] %vm1918_vm3, %v1924_v29  ;;  %v1846_v13 = vpop.f32.mrf.mxu0 }
 0x25c   : > { %v1713_v15 = vpop.f32.mrf.mxu3 }
 0x25d   : > { %v1714_v5 = vadd.f32 %v1713_v15, %v1669_v14  ;;  %v5763_v15 = vld [vmem:[%s9065_s1 + $0x80] sm:$0xf] }
 0x25e   : > { %v1890_v4 = vpop.f32.mrf.mxu1  ;;  %v5764_v2 = vor.u32 %v6538_v37, %v5763_v15  ;;  %v6514_v15 = vld [vmem:[%s7146_s30 + $0x70] sm:$0xff] }
 0x25f   : > { %v1891_v12 = vadd.f32 %v1890_v4, %v1846_v13  ;;  %v1911_v33 = vmax.f32 %v1714_v5, %v1889_v1  ;;  %v6510_v4 = vld [vmem:[%s7146_s30 + $0x50] sm:$0xff] }
 0x260   : > { %2778 = vmatpush.bf16.msrb.mxu2 %v5764_v2  ;;  %v6521_v5 = vld [vmem:[%s7146_s30 + $0x54] sm:$0xff] }
 0x261   : > { %v1671_v32 = vpop.f32.mrf.mxu2  ;;  %v6525_v37 = vld [vmem:[%s7146_s30 + $0x74] sm:$0xff] }
 0x263   : > { %v1849_v20 = vpop.f32.mrf.mxu0 }
 0x264   : > { %v1715_v24 = vpop.f32.mrf.mxu3 }
 0x265   : > { %v1716_v58 = vadd.f32 %v1715_v24, %v1671_v32 }
 0x266   : > { %v1893_v42 = vpop.f32.mrf.mxu1  ;;  %5567 = vmatmul.msk.bf16.gmra.mxu2 %vm573_vm0, %v6838_v7  ;;  %5597 = vmatmul.msk.bf16.gmra.mxu0 %vm573_vm0, %v6740_v56 }
 0x267   : > { %v1912_v41 = vmax.f32 %v1716_v58, %v1891_v12  ;;  %v1894_v63 = vadd.f32 %v1893_v42, %v1849_v20 }
 0x269   : > { %v1926_v28 = vmax.f32 %v1911_v33, %v1912_v41  ;;  %5574 = vmatmul.msk.bf16.gmra.mxu3 %vm573_vm0, %v6838_v7  ;;  %5604 = vmatmul.msk.bf16.gmra.mxu1 %vm573_vm0, %v6740_v56  ;;  %v1674_v22 = vpop.f32.mrf.mxu2 }
 0x26b   : > { %1927 = vst.msk [vmem:[#allocation2 + $0x20] sm:$0xff] %vm1918_vm3, %v1926_v28  ;;  %v1851_v60 = vpop.f32.mrf.mxu0 }
 0x26c   : > { %v1718_v26 = vpop.f32.mrf.mxu3 }
 0x26d   : > { %v1719_v57 = vadd.f32 %v1718_v26, %v1674_v22  ;;  %v6511_v22 = vld [vmem:[%s7146_s30 + $0x58] sm:$0xff] }
 0x26e   : > { %v1895_v62 = vpop.f32.mrf.mxu1  ;;  %v6522_v26 = vld [vmem:[%s7146_s30 + $0x5c] sm:$0xff] }
 0x26f   : > { %v1896_v47 = vadd.f32 %v1895_v62, %v1851_v60  ;;  %v1913_v34 = vmax.f32 %v1719_v57, %v1894_v63 }
 0x271   : > { %v1676_v18 = vpop.f32.mrf.mxu2 }
 0x273   : > { %v1854_v36 = vpop.f32.mrf.mxu0 }
 0x274   : > { %v1720_v61 = vpop.f32.mrf.mxu3 }
 0x275   : > { %v1721_v19 = vadd.f32 %v1720_v61, %v1676_v18 }
 0x276   : > { %v1898_v53 = vpop.f32.mrf.mxu1  ;;  %5653 = vmatmul.msk.bf16.vlgmr.msra.gmra.mxu2 %vm573_vm0, %v6508_v23  ;;  %5715 = vmatmul.msk.bf16.vlgmr.msrb.gmra.mxu0 %vm573_vm0, %v6519_v27 }
 0x277   : > { %v1914_v46 = vmax.f32 %v1721_v19, %v1896_v47  ;;  %v1899_v49 = vadd.f32 %v1898_v53, %v1854_v36 }
 0x279   : > { %v1928_v59 = vmax.f32 %v1913_v34, %v1914_v46  ;;  %5660 = vmatmul.msk.bf16.vlgmr.msra.gmra.mxu3 %vm573_vm0, %v6508_v23  ;;  %5722 = vmatmul.msk.bf16.vlgmr.msrb.gmra.mxu1 %vm573_vm0, %v6519_v27  ;;  %v1679_v35 = vpop.f32.mrf.mxu2  ;;  %v6512_v34 = vld [vmem:[%s7146_s30 + $0x60] sm:$0xff] }
 0x27a   : > { %v6523_v46 = vld [vmem:[%s7146_s30 + $0x64] sm:$0xff] }
 0x27b   : > { %1929 = vst.msk [vmem:[#allocation2 + $0x28] sm:$0xff] %vm1918_vm3, %v1928_v59  ;;  %v1856_v16 = vpop.f32.mrf.mxu0 }
 0x27c   : > { %v1723_v40 = vpop.f32.mrf.mxu3 }
 0x27d   : > { %v1724_v21 = vadd.f32 %v1723_v40, %v1679_v35 }
 0x27e   : > { %v1900_v43 = vpop.f32.mrf.mxu1 }
 0x27f   : > { %v1901_v31 = vadd.f32 %v1900_v43, %v1856_v16  ;;  %v1915_v45 = vmax.f32 %v1724_v21, %v1899_v49  ;;  %v6513_v49 = vld [vmem:[%s7146_s30 + $0x68] sm:$0xff] }
 0x281   : > { %v1681_v52 = vpop.f32.mrf.mxu2 }
 0x283   : > { %v2178_v30 = vpop.f32.mrf.mxu0 }
 0x284   : > { %v1725_v48 = vpop.f32.mrf.mxu3 }
 0x285   : > { %v1726_v25 = vadd.f32 %v1725_v48, %v1681_v52 }
 0x286   : > { %v2222_v38 = vpop.f32.mrf.mxu1  ;;  %5654 = vmatmul.msk.bf16.gmra.mxu2 %vm573_vm0, %v6509_v50  ;;  %5716 = vmatmul.msk.bf16.gmra.mxu0 %vm573_vm0, %v6520_v51 }
 0x287   : > { %v1916_v29 = vmax.f32 %v1726_v25, %v1901_v31  ;;  %v6524_v31 = vld [vmem:[%s7146_s30 + $0x6c] sm:$0xff] }
 0x289   : > { %v1930_v39 = vmax.f32 %v1915_v45, %v1916_v29  ;;  %5661 = vmatmul.msk.bf16.gmra.mxu3 %vm573_vm0, %v6509_v50  ;;  %5723 = vmatmul.msk.bf16.gmra.mxu1 %vm573_vm0, %v6520_v51  ;;  %v2040_v6 = vpop.f32.mrf.mxu2 }
 0x28a   : > { %v7797_v44 = vadd.f32 %v2178_v30, %v2040_v6 }
 0x28b   : > { %1931 = vst.msk [vmem:[#allocation2 + $0x30] sm:$0xff] %vm1918_vm3, %v1930_v39  ;;  %v2180_v8 = vpop.f32.mrf.mxu0 }
 0x28c   : > { %v2084_v54 = vpop.f32.mrf.mxu3 }
 0x28d   : > { %v7799_v14 = vadd.f32 %v2222_v38, %v2084_v54 }
 0x28e   : > { %v2224_v9 = vpop.f32.mrf.mxu1 }
 0x291   : > { %v2042_v11 = vpop.f32.mrf.mxu2 }
 0x292   : > { %v7813_v0 = vadd.f32 %v2180_v8, %v2042_v11 }
 0x293   : > { %v2183_v32 = vpop.f32.mrf.mxu0 }
 0x294   : > { %v2086_v55 = vpop.f32.mrf.mxu3 }
 0x295   : > { %v7815_v13 = vadd.f32 %v2224_v9, %v2086_v55 }
 0x296   : > { %v2227_v24 = vpop.f32.mrf.mxu1  ;;  %5655 = vmatmul.msk.bf16.gmra.mxu2 %vm573_vm0, %v6510_v4  ;;  %5717 = vmatmul.msk.bf16.gmra.mxu0 %vm573_vm0, %v6521_v5 }
 0x299   : > { %5662 = vmatmul.msk.bf16.gmra.mxu3 %vm573_vm0, %v6510_v4  ;;  %5724 = vmatmul.msk.bf16.gmra.mxu1 %vm573_vm0, %v6521_v5  ;;  %v2045_v1 = vpop.f32.mrf.mxu2 }
 0x29a   : > { %v7823_v58 = vadd.f32 %v2183_v32, %v2045_v1  ;;  %v6530_v32 = vld [vmem:[%s7146_s30 + $0x48] sm:$0xff] }
 0x29b   : > { %v2185_v33 = vpop.f32.mrf.mxu0 }
 0x29c   : > { %v2089_v12 = vpop.f32.mrf.mxu3 }
 0x29d   : > { %v7825_v7 = vadd.f32 %v2227_v24, %v2089_v12 }
 0x29e   : > { %v2229_v41 = vpop.f32.mrf.mxu1 }
 0x2a1   : > { %v2047_v20 = vpop.f32.mrf.mxu2 }
 0x2a2   : > { %v7827_v56 = vadd.f32 %v2185_v33, %v2047_v20 }
 0x2a3   : > { %v2188_v60 = vpop.f32.mrf.mxu0 }
 0x2a4   : > { %v2091_v42 = vpop.f32.mrf.mxu3 }
 0x2a5   : > { %v7829_v28 = vadd.f32 %v2229_v41, %v2091_v42  ;;  %v6558_v42 = vld [vmem:[%s9039_s4 + $0x38] sm:$0xff] }
 0x2a6   : > { %v2232_v62 = vpop.f32.mrf.mxu1  ;;  %5656 = vmatmul.msk.bf16.gmra.mxu2 %vm573_vm0, %v6511_v22  ;;  %5718 = vmatmul.msk.bf16.gmra.mxu0 %vm573_vm0, %v6522_v26 }
 0x2a7   : > { %3246 = vmatpush.bf16.msra.mxu2 %v6558_v42  ;;  %v6555_v42 = vld [vmem:[%s9039_s4 + $0x20] sm:$0xff] }
 0x2a9   : > { %5663 = vmatmul.msk.bf16.gmra.mxu3 %vm573_vm0, %v6511_v22  ;;  %5725 = vmatmul.msk.bf16.gmra.mxu1 %vm573_vm0, %v6522_v26  ;;  %v2050_v57 = vpop.f32.mrf.mxu2  ;;  %v3179_v22 = vld [vmem:[%s9039_s4 + $0x50] sm:$0xf] }
 0x2aa   : > { %v7837_v61 = vadd.f32 %v2188_v60, %v2050_v57  ;;  %v3221_v26 = vunpack.c.l.b16 %v3179_v22  ;;  %v6548_v60 = vld [vmem:[%s9038_s3 + $0x38] sm:$0xff]  ;;  %v6550_v22 = vld [vmem:[%s9038_s3 + $0x48] sm:$0xff] }
 0x2ab   : > { %v7841_v47 = vpop.f32.mrf.mxu0  ;;  %3071 = vmatpush.bf16.msra.mxu0 %v6548_v60 }
 0x2ac   : > { %v2094_v18 = vpop.f32.mrf.mxu3  ;;  %v3232_v57 = vpack.c.b16 %v3221_v26, %v3221_v26 }
 0x2ad   : > { %v7839_v63 = vadd.f32 %v2232_v62, %v2094_v18  ;;  %v2983_v62 = vld [vmem:[%s9038_s3 + $0x50] sm:$0xf] }
 0x2ae   : > { %v7843_v19 = vpop.f32.mrf.mxu1  ;;  %v3025_v18 = vunpack.c.l.b16 %v2983_v62  ;;  %v6545_v62 = vld [vmem:[%s9038_s3 + $0x20] sm:$0xff] }
 0x2b1   : > { %v7845_v23 = vpop.f32.mrf.mxu2 }
 0x2b3   : > { %v2193_v36 = vpop.f32.mrf.mxu0 }
 0x2b4   : > { %v7847_v27 = vpop.f32.mrf.mxu3 }
 0x2b6   : > { %v2237_v53 = vpop.f32.mrf.mxu1  ;;  %5657 = vmatmul.msk.bf16.gmra.mxu2 %vm573_vm0, %v6512_v34  ;;  %5719 = vmatmul.msk.bf16.gmra.mxu0 %vm573_vm0, %v6523_v46 }
 0x2b9   : > { %5664 = vmatmul.msk.bf16.gmra.mxu3 %vm573_vm0, %v6512_v34  ;;  %5726 = vmatmul.msk.bf16.gmra.mxu1 %vm573_vm0, %v6523_v46  ;;  %v2055_v59 = vpop.f32.mrf.mxu2  ;;  %v3244_v34 = vsel %vm1636_vm1, %v3232_v57, 0  ;;  %v3036_v46 = vpack.c.b16 %v3025_v18, %v3025_v18 }
 0x2ba   : > { %v7855_v40 = vadd.f32 %v2193_v36, %v2055_v59  ;;  %3295 = vmatpush.bf16.msra.mxu3 %v3244_v34  ;;  %v6534_v34 = vld [vmem:[%s7146_s30 + $0x68] sm:$0xff] }
 0x2bb   : > { %v7859_v43 = vpop.f32.mrf.mxu0  ;;  %v3069_v59 = vsel %vm1636_vm1, %v3036_v46, 0  ;;  %v6554_v46 = vld [vmem:[%s9039_s4 + $0x18] sm:$0xff] }
 0x2bc   : > { %v2099_v35 = vpop.f32.mrf.mxu3  ;;  %3120 = vmatpush.bf16.msra.mxu1 %v3069_v59 }
 0x2bd   : > { %v7857_v16 = vadd.f32 %v2237_v53, %v2099_v35  ;;  %v6531_v35 = vld [vmem:[%s7146_s30 + $0x50] sm:$0xff] }
 0x2be   : > { %v7861_v21 = vpop.f32.mrf.mxu1 }
 0x2c0   : > { %3121 = vmatpush.bf16.msra.mxu1 %v6550_v22 }
 0x2c1   : > { %v7863_v52 = vpop.f32.mrf.mxu2 }
 0x2c3   : > { %v2198_v25 = vpop.f32.mrf.mxu0 }
 0x2c4   : > { %v7865_v48 = vpop.f32.mrf.mxu3 }
 0x2c6   : > { %v2242_v50 = vpop.f32.mrf.mxu1  ;;  %5658 = vmatmul.msk.bf16.gmra.mxu2 %vm573_vm0, %v6513_v49  ;;  %5720 = vmatmul.msk.bf16.gmra.mxu0 %vm573_vm0, %v6524_v31 }
 0x2c9   : > { %5665 = vmatmul.msk.bf16.gmra.mxu3 %vm573_vm0, %v6513_v49  ;;  %5727 = vmatmul.msk.bf16.gmra.mxu1 %vm573_vm0, %v6524_v31  ;;  %v2060_v51 = vpop.f32.mrf.mxu2  ;;  %v6557_v49 = vld [vmem:[%s9039_s4 + $0x30] sm:$0xff] }
 0x2ca   : > { %v7873_v29 = vadd.f32 %v2198_v25, %v2060_v51  ;;  %3247 = vmatpush.bf16.msra.mxu2 %v6557_v49 }
 0x2cb   : > { %v7877_v38 = vpop.f32.mrf.mxu0 }
 0x2cc   : > { %v2104_v45 = vpop.f32.mrf.mxu3 }
 0x2cd   : > { %v7875_v30 = vadd.f32 %v2242_v50, %v2104_v45  ;;  %v6547_v45 = vld [vmem:[%s9038_s3 + $0x30] sm:$0xff] }
 0x2ce   : > { %v7879_v39 = vpop.f32.mrf.mxu1  ;;  %3072 = vmatpush.bf16.msra.mxu0 %v6547_v45 }
 0x2d1   : > { %v7881_v6 = vpop.f32.mrf.mxu2 }
 0x2d3   : > { %v2203_v2 = vpop.f32.mrf.mxu0 }
 0x2d4   : > { %v7883_v54 = vpop.f32.mrf.mxu3 }
 0x2d6   : > { %v2247_v3 = vpop.f32.mrf.mxu1  ;;  %5659 = vmatmul.msk.bf16.gmra.mxu2 %vm573_vm0, %v6514_v15  ;;  %5721 = vmatmul.msk.bf16.gmra.mxu0 %vm573_vm0, %v6525_v37 }
 0x2d9   : > { %5666 = vmatmul.msk.bf16.gmra.mxu3 %vm573_vm0, %v6514_v15  ;;  %5728 = vmatmul.msk.bf16.gmra.mxu1 %vm573_vm0, %v6525_v37  ;;  %v2065_v17 = vpop.f32.mrf.mxu2 }
 0x2da   : > { %v7891_v9 = vadd.f32 %v2203_v2, %v2065_v17  ;;  %v6532_v17 = vld [vmem:[%s7146_s30 + $0x58] sm:$0xff] }
 0x2db   : > { %v7895_v11 = vpop.f32.mrf.mxu0 }
 0x2dc   : > { %v2109_v8 = vpop.f32.mrf.mxu3 }
 0x2dd   : > { %v7893_v10 = vadd.f32 %v2247_v3, %v2109_v8 }
 0x2de   : > { %v7897_v55 = vpop.f32.mrf.mxu1 }
 0x2e1   : > { %v7899_v4 = vpop.f32.mrf.mxu2 }
 0x2e3   : > { %v2208_v24 = vpop.f32.mrf.mxu0 }
 0x2e4   : > { %v7901_v5 = vpop.f32.mrf.mxu3 }
 0x2e6   : > { %5777 = vmatmul.msk.bf16.vlgmr.msrb.gmra.mxu2 %vm573_vm0, %v6530_v32  ;;  %v2252_v1 = vpop.f32.mrf.mxu1 }
 0x2e9   : > { %5784 = vmatmul.msk.bf16.vlgmr.msrb.gmra.mxu3 %vm573_vm0, %v6530_v32  ;;  %v2070_v12 = vpop.f32.mrf.mxu2 }
 0x2ea   : > { %v7906_v41 = vadd.f32 %v2208_v24, %v2070_v12  ;;  %v6560_v24 = vld [vmem:[%s9039_s4 + $0x48] sm:$0xff] }
 0x2eb   : > { %3296 = vmatpush.bf16.msra.mxu3 %v6560_v24 }
 0x2ec   : > { %v2114_v33 = vpop.f32.mrf.mxu3 }
 0x2ed   : > { %v7908_v20 = vadd.f32 %v2252_v1, %v2114_v33 }
 0x2f1   : > { %v7923_v36 = vpop.f32.mrf.mxu2 }
 0x2f2   : > { %9083 = vst [vmem:[#allocation12_spill] sm:$0xff] %v7923_v36 }
 0x2f4   : > { %v7925_v53 = vpop.f32.mrf.mxu3 }
 0x2f5   : > { %9084 = vst [vmem:[#allocation14_spill] sm:$0xff] %v7925_v53 }
 0x2f6   : > { %5778 = vmatmul.msk.bf16.gmra.mxu2 %vm573_vm0, %v6531_v35 }
 0x2f9   : > { %5785 = vmatmul.msk.bf16.gmra.mxu3 %vm573_vm0, %v6531_v35  ;;  %v2360_v31 = vpop.f32.mrf.mxu2 }
 0x2fa   : > { %v7935_v50 = vadd.f32 %v2360_v31, %v7797_v44  ;;  %v6556_v44 = vld [vmem:[%s9039_s4 + $0x28] sm:$0xff]  ;;  %v6553_v31 = vld [vmem:[%s9039_s4 + $0x10] sm:$0xff] }
 0x2fb   : > { %3248 = vmatpush.bf16.msra.mxu2 %v6556_v44 }
 0x2fc   : > { %v2404_v25 = vpop.f32.mrf.mxu3 }
 0x2fd   : > { %v7938_v51 = vadd.f32 %v2404_v25, %v7799_v14 }
 0x2ff   : > { %3249 = vmatpush.bf16.msra.mxu2 %v6555_v42 }
 0x301   : > { %v2362_v15 = vpop.f32.mrf.mxu2 }
 0x302   : > { %v7944_v2 = vadd.f32 %v2362_v15, %v7813_v0  ;;  %v6535_v15 = vld [vmem:[%s7146_s30 + $0x70] sm:$0xff] }
 0x303   : > { %3250 = vmatpush.bf16.msra.mxu2 %v6554_v46  ;;  %v6551_v46 = vld [vmem:[%s9039_s4] sm:$0xff] }
 0x304   : > { %v2406_v37 = vpop.f32.mrf.mxu3 }
 0x305   : > { %v7947_v3 = vadd.f32 %v2406_v37, %v7815_v13  ;;  %v6546_v13 = vld [vmem:[%s9038_s3 + $0x28] sm:$0xff]  ;;  %v6559_v37 = vld [vmem:[%s9039_s4 + $0x40] sm:$0xff] }
 0x306   : > { %5779 = vmatmul.msk.bf16.gmra.mxu2 %vm573_vm0, %v6532_v17  ;;  %3073 = vmatpush.bf16.msra.mxu0 %v6546_v13  ;;  %v6552_v13 = vld [vmem:[%s9039_s4 + $0x8] sm:$0xff] }
 0x307   : > { %3251 = vmatpush.bf16.msra.mxu2 %v6553_v31  ;;  %3297 = vmatpush.bf16.msra.mxu3 %v6559_v37 }
 0x309   : > { %5786 = vmatmul.msk.bf16.gmra.mxu3 %vm573_vm0, %v6532_v17  ;;  %v2365_v14 = vpop.f32.mrf.mxu2 }
 0x30a   : > { %v7956_v32 = vadd.f32 %v2365_v14, %v7823_v58  ;;  %3074 = vmatpush.bf16.msra.mxu0 %v6545_v62 }
 0x30b   : > { %3252 = vmatpush.bf16.msra.mxu2 %v6552_v13 }
 0x30c   : > { %v2409_v8 = vpop.f32.mrf.mxu3 }
 0x30d   : > { %v7959_v0 = vadd.f32 %v2409_v8, %v7825_v7  ;;  %v6533_v7 = vld [vmem:[%s7146_s30 + $0x60] sm:$0xff] }
 0x30e   : > { %v6549_v8 = vld [vmem:[%s9038_s3 + $0x40] sm:$0xff] }
 0x30f   : > { %3122 = vmatpush.bf16.msra.mxu1 %v6549_v8  ;;  %3253 = vmatpush.bf16.msra.mxu2 %v6551_v46  ;;  %v2887_v46 = vld [vmem:[%s9037_s2] sm:$0x3] }
 0x311   : > { %v2367_v1 = vpop.f32.mrf.mxu2 }
 0x312   : > { %v7968_v33 = vadd.f32 %v2367_v1, %v7827_v56 }
 0x314   : > { %v2411_v12 = vpop.f32.mrf.mxu3 }
 0x315   : > { %v7971_v58 = vadd.f32 %v2411_v12, %v7829_v28  ;;  %v8042_v12 = vpop.f32.mrf.mxu0 }
 0x316   : > { %5780 = vmatmul.msk.bf16.gmra.mxu2 %vm573_vm0, %v6533_v7  ;;  %9085 = vst [vmem:[#allocation13_spill] sm:$0xff] %v8042_v12 }
 0x319   : > { %5787 = vmatmul.msk.bf16.gmra.mxu3 %vm573_vm0, %v6533_v7  ;;  %v2370_v56 = vpop.f32.mrf.mxu2  ;;  %v6542_v7 = vld [vmem:[%s9038_s3 + $0x8] sm:$0xff] }
 0x31a   : > { %v7983_v28 = vadd.f32 %v2370_v56, %v7837_v61  ;;  %v6544_v61 = vld [vmem:[%s9038_s3 + $0x18] sm:$0xff] }
 0x31b   : > { %3075 = vmatpush.bf16.msra.mxu0 %v6544_v61 }
 0x31c   : > { %v2414_v26 = vpop.f32.mrf.mxu3 }
 0x31d   : > { %v7986_v60 = vadd.f32 %v2414_v26, %v7839_v63  ;;  %v2570_v56 = vpop.f32.mrf.mxu0 }
 0x321   : > { %v7991_v57 = vpop.f32.mrf.mxu2 }
 0x324   : > { %v7993_v18 = vpop.f32.mrf.mxu3 }
 0x326   : > { %5781 = vmatmul.msk.bf16.gmra.mxu2 %vm573_vm0, %v6534_v34 }
 0x329   : > { %5788 = vmatmul.msk.bf16.gmra.mxu3 %vm573_vm0, %v6534_v34  ;;  %v2375_v63 = vpop.f32.mrf.mxu2 }
 0x32a   : > { %v8005_v35 = vadd.f32 %v2375_v63, %v7855_v40  ;;  %v6543_v40 = vld [vmem:[%s9038_s3 + $0x10] sm:$0xff] }
 0x32b   : > { %3076 = vmatpush.bf16.msra.mxu0 %v6543_v40 }
 0x32c   : > { %v2419_v59 = vpop.f32.mrf.mxu3 }
 0x32d   : > { %v8008_v49 = vadd.f32 %v2419_v59, %v7857_v16  ;;  %v2572_v59 = vpop.f32.mrf.mxu0 }
 0x32f   : > { %3077 = vmatpush.bf16.msra.mxu0 %v6542_v7 }
 0x331   : > { %v8013_v25 = vpop.f32.mrf.mxu2 }
 0x334   : > { %v8015_v45 = vpop.f32.mrf.mxu3 }
 0x336   : > { %5782 = vmatmul.msk.bf16.gmra.mxu2 %vm573_vm0, %v6535_v15 }
 0x339   : > { %5789 = vmatmul.msk.bf16.gmra.mxu3 %vm573_vm0, %v6535_v15  ;;  %v2380_v16 = vpop.f32.mrf.mxu2  ;;  %v6541_v15 = vld [vmem:[%s9038_s3] sm:$0xff] }
 0x33a   : > { %v8027_v44 = vadd.f32 %v2380_v16, %v7873_v29  ;;  %v8044_v29 = vpop.f32.mrf.mxu1  ;;  %3078 = vmatpush.bf16.msra.mxu0 %v6541_v15  ;;  %v2575_v16 = vpop.f32.mrf.mxu0 }
 0x33b   : > { %9086 = vst [vmem:[#allocation15_spill] sm:$0xff] %v8044_v29 }
 0x33c   : > { %v2424_v17 = vpop.f32.mrf.mxu3 }
 0x33d   : > { %v8030_v14 = vadd.f32 %v2424_v17, %v7875_v30  ;;  %v6536_v30 = vld [vmem:[%s7146_s30 + $0x78] sm:$0xff]  ;;  %s6905_s30 = scalar_lea.hbm %s9050_s15, 16 }
 0x341   : > { %v8038_v24 = vpop.f32.mrf.mxu2 }
 0x342   : > { %v2614_v26 = vpop.f32.mrf.mxu1 }
 0x343   : > { %v2650_v15 = vadd.f32 %v2614_v26, %v7938_v51 }
 0x344   : > { %v8040_v1 = vpop.f32.mrf.mxu3 }
 0x346   : > { %5783 = vmatmul.msk.bf16.gmra.mxu2 %vm573_vm0, %v6536_v30 }
 0x349   : > { %5790 = vmatmul.msk.bf16.gmra.mxu3 %vm573_vm0, %v6536_v30  ;;  %v2385_v42 = vpop.f32.mrf.mxu2  ;;  %v2577_v30 = vpop.f32.mrf.mxu0 }
 0x34a   : > { %v8053_v62 = vadd.f32 %v2385_v42, %v7891_v9  ;;  %v2616_v31 = vpop.f32.mrf.mxu1 }
 0x34c   : > { %v2429_v22 = vpop.f32.mrf.mxu3 }
 0x34d   : > { %v8056_v34 = vadd.f32 %v2429_v22, %v7893_v10 }
 0x351   : > { %v8061_v61 = vpop.f32.mrf.mxu2  ;;  %v2580_v53 = vpop.f32.mrf.mxu0 }
 0x352   : > { %v2619_v17 = vpop.f32.mrf.mxu1 }
 0x354   : > { %v8063_v63 = vpop.f32.mrf.mxu3 }
 0x355   : > { %9087 = vst [vmem:[#allocation16_spill] sm:$0xff] %v8063_v63 }
 0x359   : > { %v2390_v9 = vpop.f32.mrf.mxu2 }
 0x35a   : > { %v8069_v10 = vadd.f32 %v2390_v9, %v7906_v41  ;;  %v2621_v7 = vpop.f32.mrf.mxu1  ;;  %v2649_v41 = vadd.f32 %v2570_v56, %v7935_v50  ;;  %v8083_v9 = vperm.slane %v2887_v46, 0 }
 0x35c   : > { %v2434_v37 = vpop.f32.mrf.mxu3  ;;  %9088 = vst [vmem:[#allocation17_spill] sm:$0xff] %v8069_v10 }
 0x35d   : > { %v8072_v40 = vadd.f32 %v2434_v37, %v7908_v20 }
 0x35f   : > { %9089 = vst [vmem:[#allocation18_spill] sm:$0xff] %v8072_v40  ;;  %v8085_v40 = vperm.slane %v2887_v46, 1 }
 0x361   : > { %v8074_v8 = vpop.f32.mrf.mxu2 }
 0x362   : > { %9090 = vst [vmem:[#allocation19_spill] sm:$0xff] %v8074_v8  ;;  %v2652_v8 = vadd.f32 %v2616_v31, %v7947_v3  ;;  %v2624_v12 = vpop.f32.mrf.mxu1  ;;  %v5895_v31 = vld [vmem:[%s9040_s5 + $0xa8] sm:$0x33] }
 0x363   : > { %v3437_v63 = vunpack.c.l.b16 %v5895_v31 }
 0x364   : > { %v8076_v13 = vpop.f32.mrf.mxu3 }
 0x365   : > { %9091 = vst [vmem:[#allocation20_spill] sm:$0xff] %v8076_v13  ;;  %v2651_v13 = vadd.f32 %v2572_v59, %v7944_v2 }
 0x369   : > { %v2780_v42 = vpop.f32.mrf.mxu2 }
 0x36a   : > { %v2859_v20 = vadd.f32 %v2780_v42, %v2649_v41 }
 0x36c   : > { %v2824_v22 = vpop.f32.mrf.mxu3  ;;  %v2893_v36 = vadd.f32 %v8083_v9, %v2859_v20 }
 0x36d   : > { %v2860_v37 = vadd.f32 %v2824_v22, %v2650_v15 }
 0x36e   : > { %v2921_v22 = vmax.f32 %v2893_v36, 0.0  ;;  %v3449_v36 = vpack.c.b16 %v3437_v63, %v3437_v63 }
 0x36f   : > { %v2894_v50 = vadd.f32 %v8085_v40, %v2860_v37  ;;  %v3438_v37 = vunpack.c.h.b16 %v5895_v31 }
 0x371   : > { %v2782_v10 = vpop.f32.mrf.mxu2  ;;  %v2922_v46 = vmax.f32 %v2894_v50, 0.0  ;;  %v2626_v50 = vpop.f32.mrf.mxu1 }
 0x372   : > { %v2861_v56 = vadd.f32 %v2782_v10, %v2651_v13  ;;  %v2653_v10 = vadd.f32 %v2575_v16, %v7956_v32  ;;  %v2582_v13 = vpop.f32.mrf.mxu0 }
 0x374   : > { %v2826_v29 = vpop.f32.mrf.mxu3  ;;  %v2895_v26 = vadd.f32 %v8083_v9, %v2861_v56  ;;  %v3478_v56 = vsel %vm3476_vm4, %v3449_v36, 0 }
 0x375   : > { %v2862_v51 = vadd.f32 %v2826_v29, %v2652_v8  ;;  %v3450_v29 = vpack.c.b16 %v3438_v37, %v3438_v37  ;;  %v2654_v8 = vadd.f32 %v2619_v17, %v7959_v0  ;;  %3485 = vmatpush.bf16.msrb.mxu0 %v3478_v56  ;;  %v2658_v56 = vadd.f32 %v2624_v12, %v7986_v60 }
 0x376   : > { %v2923_v41 = vmax.f32 %v2895_v26, 0.0 }
 0x377   : > { %v2896_v42 = vadd.f32 %v8085_v40, %v2862_v51  ;;  %v3481_v51 = vsel %vm3476_vm4, %v3450_v29, 0  ;;  %v2191_v29 = vadd.f32 %v7841_v47, %v7845_v23  ;;  %v5930_v47 = vld [vmem:[%s9040_s5 + $0x98] sm:$0xf] }
 0x378   : > { %v2949_v59 = vpack.c.bf16 %v2923_v41, %v2921_v22  ;;  %3519 = vmatpush.bf16.msrb.mxu1 %v3481_v51  ;;  %v2655_v22 = vadd.f32 %v2577_v30, %v7968_v33 }
 0x379   : > { %v2924_v2 = vmax.f32 %v2896_v42, 0.0  ;;  %v2785_v15 = vpop.f32.mrf.mxu2  ;;  %v2629_v31 = vpop.f32.mrf.mxu1  ;;  %v2449_v51 = vadd.f32 %v7991_v57, %v2191_v29 }
 0x37a   : > { %3079 = vmatmul.bf16.vlgmr.msra.gmra.mxu0 %v2949_v59  ;;  %3254 = vmatmul.bf16.vlgmr.msra.gmra.mxu2 %v2949_v59  ;;  %v2863_v26 = vadd.f32 %v2785_v15, %v2653_v10  ;;  %v2235_v10 = vadd.f32 %v7843_v19, %v7847_v27  ;;  %v6580_v19 = vld [vmem:[%s9040_s5 + $0x9c] sm:$0xf0]  ;;  %v6579_v27 = vld [vmem:[%s9040_s5 + $0x9c] sm:$0xf] }
 0x37b   : > { %v2950_v3 = vpack.c.bf16 %v2924_v2, %v2922_v46  ;;  %v2656_v46 = vadd.f32 %v2621_v7, %v7971_v58  ;;  %v5931_v23 = vor.u32 %v6580_v19, %v5930_v47 }
 0x37c   : > { %v2829_v20 = vpop.f32.mrf.mxu3  ;;  %v2897_v32 = vadd.f32 %v8083_v9, %v2863_v26  ;;  %v2450_v26 = vadd.f32 %v7993_v18, %v2235_v10 }
 0x37d   : > { %5831 = vmatmul.msk.bf16.vlgmr.msra.gmra.mxu1 %vm1614_vm2, %v2950_v3  ;;  %5878 = vmatmul.msk.bf16.vlgmr.msra.gmra.mxu3 %vm1614_vm2, %v2950_v3  ;;  %v2864_v42 = vadd.f32 %v2829_v20, %v2654_v8  ;;  %v2585_v3 = vpop.f32.mrf.mxu0  ;;  %v2657_v8 = vadd.f32 %v2580_v53, %v7983_v28  ;;  %v5932_v53 = vld [vmem:[%s9040_s5 + $0xa0] sm:$0xf0]  ;;  %v2659_v28 = vadd.f32 %v2582_v13, %v2449_v51 }
 0x37e   : > { %v2925_v15 = vmax.f32 %v2897_v32, 0.0  ;;  %v2660_v60 = vadd.f32 %v2626_v50, %v2450_v26  ;;  %v5935_v12 = vor.u32 %v6579_v27, %v5932_v53  ;;  %3486 = vmatpush.bf16.msrb.mxu0 %v5931_v23  ;;  %v2661_v10 = vadd.f32 %v2585_v3, %v8005_v35  ;;  %v6577_v35 = vld [vmem:[%s9040_s5 + $0x8c] sm:$0xf] }
 0x37f   : > { %v2898_v0 = vadd.f32 %v8085_v40, %v2864_v42 }
 0x380   : > { %3520 = vmatpush.bf16.msrb.mxu1 %v5935_v12 }
 0x381   : > { %v2787_v63 = vpop.f32.mrf.mxu2  ;;  %v2926_v20 = vmax.f32 %v2898_v0, 0.0  ;;  %v2631_v18 = vpop.f32.mrf.mxu1 }
 0x382   : > { %v2865_v16 = vadd.f32 %v2787_v63, %v2655_v22 }
 0x384   : > { %v2831_v41 = vpop.f32.mrf.mxu3  ;;  %v2899_v2 = vadd.f32 %v8083_v9, %v2865_v16 }
 0x385   : > { %v2866_v17 = vadd.f32 %v2831_v41, %v2656_v46  ;;  %v2587_v57 = vpop.f32.mrf.mxu0 }
 0x386   : > { %v2927_v37 = vmax.f32 %v2899_v2, 0.0 }
 0x387   : > { %v2900_v59 = vadd.f32 %v8085_v40, %v2866_v17 }
 0x388   : > { %v2951_v58 = vpack.c.bf16 %v2927_v37, %v2925_v15 }
 0x389   : > { %v2928_v33 = vmax.f32 %v2900_v59, 0.0  ;;  %v2790_v7 = vpop.f32.mrf.mxu2  ;;  %v2634_v29 = vpop.f32.mrf.mxu1 }
 0x38a   : > { %3084 = vmatmul.bf16.gmra.mxu0 %v2951_v58  ;;  %3259 = vmatmul.bf16.gmra.mxu2 %v2951_v58  ;;  %v2867_v42 = vadd.f32 %v2790_v7, %v2657_v8  ;;  %v2196_v58 = vadd.f32 %v7859_v43, %v7863_v52  ;;  %v2240_v7 = vadd.f32 %v7861_v21, %v7865_v48  ;;  %v5922_v21 = vld [vmem:[%s9040_s5 + $0x88] sm:$0xf]  ;;  %v6578_v48 = vld [vmem:[%s9040_s5 + $0x8c] sm:$0xf0] }
 0x38b   : > { %v2952_v30 = vpack.c.bf16 %v2928_v33, %v2926_v20  ;;  %v2662_v8 = vadd.f32 %v2629_v31, %v8008_v49  ;;  %v5923_v26 = vor.u32 %v6578_v48, %v5922_v21  ;;  %v5924_v49 = vld [vmem:[%s9040_s5 + $0x90] sm:$0xf0] }
 0x38c   : > { %v2834_v36 = vpop.f32.mrf.mxu3  ;;  %v2901_v41 = vadd.f32 %v8083_v9, %v2867_v42  ;;  %v2454_v51 = vadd.f32 %v8015_v45, %v2240_v7  ;;  %v5927_v3 = vor.u32 %v6577_v35, %v5924_v49 }
 0x38d   : > { %5832 = vmatmul.msk.bf16.gmra.mxu1 %vm1614_vm2, %v2952_v30  ;;  %5879 = vmatmul.msk.bf16.gmra.mxu3 %vm1614_vm2, %v2952_v30  ;;  %v2868_v22 = vadd.f32 %v2834_v36, %v2658_v56  ;;  %v2590_v36 = vpop.f32.mrf.mxu0  ;;  %v2453_v56 = vadd.f32 %v8013_v25, %v2196_v58 }
 0x38e   : > { %v2929_v59 = vmax.f32 %v2901_v41, 0.0  ;;  %v2664_v45 = vadd.f32 %v2631_v18, %v2454_v51  ;;  %3487 = vmatpush.bf16.msrb.mxu0 %v5923_v26  ;;  %3521 = vmatpush.bf16.msrb.mxu1 %v5927_v3  ;;  %v6569_v3 = vld [vmem:[%s9040_s5 + $0x44] sm:$0xf] }
 0x38f   : > { %v2902_v32 = vadd.f32 %v8085_v40, %v2868_v22  ;;  %v2663_v25 = vadd.f32 %v2587_v57, %v2453_v56 }
 0x391   : > { %v2792_v46 = vpop.f32.mrf.mxu2  ;;  %v2930_v13 = vmax.f32 %v2902_v32, 0.0  ;;  %v2636_v53 = vpop.f32.mrf.mxu1  ;;  %v2201_v32 = vadd.f32 %v7877_v38, %v7881_v6 }
 0x392   : > { %v2869_v0 = vadd.f32 %v2792_v46, %v2659_v28 }
 0x394   : > { %v2836_v63 = vpop.f32.mrf.mxu3  ;;  %v2903_v17 = vadd.f32 %v8083_v9, %v2869_v0  ;;  %v2665_v0 = vadd.f32 %v2590_v36, %v8027_v44 }
 0x395   : > { %v2870_v16 = vadd.f32 %v2836_v63, %v2660_v60  ;;  %v2592_v27 = vpop.f32.mrf.mxu0 }
 0x396   : > { %v2931_v50 = vmax.f32 %v2903_v17, 0.0 }
 0x397   : > { %v2904_v2 = vadd.f32 %v8085_v40, %v2870_v16 }
 0x398   : > { %v2953_v37 = vpack.c.bf16 %v2931_v50, %v2929_v59  ;;  %v2666_v59 = vadd.f32 %v2634_v29, %v8030_v14 }
 0x399   : > { %v2932_v15 = vmax.f32 %v2904_v2, 0.0  ;;  %v2795_v33 = vpop.f32.mrf.mxu2  ;;  %v2245_v2 = vadd.f32 %v7879_v39, %v7883_v54  ;;  %v5914_v39 = vld [vmem:[%s9040_s5 + $0x78] sm:$0xf]  ;;  %v6576_v54 = vld [vmem:[%s9040_s5 + $0x7c] sm:$0xf0] }
 0x39a   : > { %3089 = vmatmul.bf16.gmra.mxu0 %v2953_v37  ;;  %3264 = vmatmul.bf16.gmra.mxu2 %v2953_v37  ;;  %v2871_v43 = vadd.f32 %v2795_v33, %v2661_v10  ;;  %v6575_v37 = vld [vmem:[%s9040_s5 + $0x7c] sm:$0xf]  ;;  %v3387_v33 = vld [vmem:[%s9040_s5 + $0x50] sm:$0x33] }
 0x39b   : > { %v2954_v20 = vpack.c.bf16 %v2932_v15, %v2930_v13  ;;  %v2457_v13 = vadd.f32 %v8038_v24, %v2201_v32  ;;  %v2458_v38 = vadd.f32 %v8040_v1, %v2245_v2  ;;  %v2639_v15 = vpop.f32.mrf.mxu1  ;;  %v5916_v1 = vld [vmem:[%s9040_s5 + $0x80] sm:$0xf0]  ;;  %v3582_v7 = vunpack.c.l.b16 %v3387_v33  ;;  %v5964_v2 = vld [vmem:[%s9040_s5 + $0x20] sm:$0xf] }
 0x39c   : > { %v2839_v30 = vpop.f32.mrf.mxu3  ;;  %v2905_v22 = vadd.f32 %v8083_v9, %v2871_v43  ;;  %v5919_v58 = vor.u32 %v6575_v37, %v5916_v1  ;;  %v3583_v36 = vunpack.c.h.b16 %v3387_v33  ;;  %v2250_v32 = vadd.f32 %v7897_v55, %v7901_v5  ;;  %v6565_v55 = vld [vmem:[%s9040_s5 + $0x24] sm:$0xf]  ;;  %v6564_v37 = vld [vmem:[%s9040_s5 + $0x14] sm:$0xf0]  ;;  %v6563_v1 = vld [vmem:[%s9040_s5 + $0x14] sm:$0xf] }
 0x39d   : > { %5833 = vmatmul.msk.bf16.gmra.mxu1 %vm1614_vm2, %v2954_v20  ;;  %5880 = vmatmul.msk.bf16.gmra.mxu3 %vm1614_vm2, %v2954_v20  ;;  %v2872_v52 = vadd.f32 %v2839_v30, %v2662_v8  ;;  %v2595_v44 = vpop.f32.mrf.mxu0  ;;  %v2667_v14 = vadd.f32 %v2592_v27, %v2457_v13  ;;  %v5915_v20 = vor.u32 %v6576_v54, %v5914_v39  ;;  %v9092_v13 = vld [vmem:[#allocation16_spill] sm:$0xff]  ;;  %v6574_v39 = vld [vmem:[%s9040_s5 + $0x6c] sm:$0xf0]  ;;  %v5958_v33 = vld [vmem:[%s9040_s5 + $0x18] sm:$0xf0] }
 0x39e   : > { %v2933_v12 = vmax.f32 %v2905_v22, 0.0  ;;  %v2668_v30 = vadd.f32 %v2636_v53, %v2458_v38  ;;  %3522 = vmatpush.bf16.msrb.mxu1 %v5919_v58  ;;  %v3594_v43 = vpack.c.b16 %v3582_v7, %v3582_v7  ;;  %v2670_v5 = vadd.f32 %v2639_v15, %v8056_v34  ;;  %v5966_v38 = vld [vmem:[%s9040_s5 + $0x28] sm:$0xf0]  ;;  %v5908_v15 = vld [vmem:[%s9040_s5 + $0x70] sm:$0xf0] }
 0x39f   : > { %v2906_v47 = vadd.f32 %v8085_v40, %v2872_v52  ;;  %3488 = vmatpush.bf16.msrb.mxu0 %v5915_v20  ;;  %v3595_v52 = vpack.c.b16 %v3583_v36, %v3583_v36  ;;  %v5969_v34 = vor.u32 %v6565_v55, %v5966_v38  ;;  %v5956_v20 = vld [vmem:[%s9040_s5 + $0x10] sm:$0xf]  ;;  %v6572_v58 = vld [vmem:[%s9040_s5 + $0x5c] sm:$0xf0] }
 0x3a0   : > { %v3622_v35 = vsel %vm3476_vm4, %v3594_v43, 0  ;;  %v5957_v43 = vor.u32 %v6564_v37, %v5956_v20 }
 0x3a1   : > { %v2797_v31 = vpop.f32.mrf.mxu2  ;;  %v2934_v57 = vmax.f32 %v2906_v47, 0.0  ;;  %v3625_v49 = vsel %vm3476_vm4, %v3595_v52, 0  ;;  %3629 = vmatpush.bf16.msrb.mxu2 %v3622_v35  ;;  %v5961_v52 = vor.u32 %v6563_v1, %v5958_v33 }
 0x3a2   : > { %v2873_v19 = vadd.f32 %v2797_v31, %v2663_v25  ;;  %3663 = vmatpush.bf16.msrb.mxu3 %v3625_v49  ;;  %v5980_v25 = vld [vmem:[%s9040_s5 + $0x40] sm:$0xf] }
 0x3a3   : > { %v2641_v53 = vpop.f32.mrf.mxu1 }
 0x3a4   : > { %v2841_v42 = vpop.f32.mrf.mxu3  ;;  %v2907_v28 = vadd.f32 %v8083_v9, %v2873_v19  ;;  %v5982_v19 = vld [vmem:[%s9040_s5 + $0x48] sm:$0xf0] }
 0x3a5   : > { %v2874_v23 = vadd.f32 %v2841_v42, %v2664_v45  ;;  %v6570_v45 = vld [vmem:[%s9040_s5 + $0x44] sm:$0xf0]  ;;  %v2597_v27 = vpop.f32.mrf.mxu0 }
 0x3a6   : > { %v2935_v18 = vmax.f32 %v2907_v28, 0.0  ;;  %v5981_v47 = vor.u32 %v6570_v45, %v5980_v25  ;;  %v6562_v45 = vld [vmem:[%s9040_s5 + $0x4] sm:$0xf0] }
 0x3a7   : > { %v2908_v60 = vadd.f32 %v8085_v40, %v2874_v23  ;;  %v5985_v23 = vor.u32 %v6569_v3, %v5982_v19  ;;  %v6561_v3 = vld [vmem:[%s9040_s5 + $0x4] sm:$0xf] }
 0x3a8   : > { %v2955_v41 = vpack.c.bf16 %v2935_v18, %v2933_v12  ;;  %3630 = vmatpush.bf16.msrb.mxu2 %v5981_v47  ;;  %v5972_v18 = vld [vmem:[%s9040_s5 + $0x30] sm:$0xf] }
 0x3a9   : > { %v2936_v46 = vmax.f32 %v2908_v60, 0.0  ;;  %v2800_v16 = vpop.f32.mrf.mxu2  ;;  %3664 = vmatpush.bf16.msrb.mxu3 %v5985_v23 }
 0x3aa   : > { %3094 = vmatmul.bf16.gmra.mxu0 %v2955_v41  ;;  %v2875_v50 = vadd.f32 %v2800_v16, %v2665_v0  ;;  %3269 = vmatmul.bf16.gmra.mxu2 %v2955_v41  ;;  %v2206_v41 = vadd.f32 %v7895_v11, %v7899_v4  ;;  %v5974_v16 = vld [vmem:[%s9040_s5 + $0x38] sm:$0xf0]  ;;  %v6566_v11 = vld [vmem:[%s9040_s5 + $0x24] sm:$0xf0]  ;;  %v2669_v4 = vadd.f32 %v2595_v44, %v8053_v62 }
 0x3ab   : > { %v2956_v63 = vpack.c.bf16 %v2936_v46, %v2934_v57  ;;  %v6568_v46 = vld [vmem:[%s9040_s5 + $0x34] sm:$0xf0]  ;;  %v5965_v62 = vor.u32 %v6566_v11, %v5964_v2  ;;  %v9097_v11 = vld [vmem:[#allocation17_spill] sm:$0xff] }
 0x3ac   : > { %v2844_v17 = vpop.f32.mrf.mxu3  ;;  %v2909_v24 = vadd.f32 %v8083_v9, %v2875_v50  ;;  %v5973_v0 = vor.u32 %v6568_v46, %v5972_v18  ;;  %v2462_v50 = vadd.f32 %v9092_v13, %v2250_v32  ;;  %v9094_v32 = vld [vmem:[#allocation13_spill] sm:$0xff] }
 0x3ad   : > { %5834 = vmatmul.msk.bf16.gmra.mxu1 %vm1614_vm2, %v2956_v63  ;;  %5881 = vmatmul.msk.bf16.gmra.mxu3 %vm1614_vm2, %v2956_v63  ;;  %v2876_v6 = vadd.f32 %v2844_v17, %v2666_v59  ;;  %v6567_v63 = vld [vmem:[%s9040_s5 + $0x34] sm:$0xf]  ;;  %v2461_v59 = vadd.f32 %v8061_v61, %v2206_v41  ;;  %v6573_v61 = vld [vmem:[%s9040_s5 + $0x6c] sm:$0xf]  ;;  %v9093_v41 = vld [vmem:[#allocation12_spill] sm:$0xff] }
 0x3ae   : > { %v2937_v21 = vmax.f32 %v2909_v24, 0.0  ;;  %v5977_v17 = vor.u32 %v6567_v63, %v5974_v16  ;;  %3631 = vmatpush.bf16.msrb.mxu2 %v5973_v0  ;;  %v5911_v24 = vor.u32 %v6573_v61, %v5908_v15  ;;  %v2672_v36 = vadd.f32 %v2641_v53, %v2462_v50  ;;  %v9095_v16 = vld [vmem:[#allocation14_spill] sm:$0xff]  ;;  %v9100_v50 = vld [vmem:[#allocation20_spill] sm:$0xff] }
 0x3af   : > { %v2910_v29 = vadd.f32 %v8085_v40, %v2876_v6  ;;  %v5906_v6 = vld [vmem:[%s9040_s5 + $0x68] sm:$0xf]  ;;  %v2671_v7 = vadd.f32 %v2597_v27, %v2461_v59  ;;  %v2211_v0 = vadd.f32 %v9094_v32, %v9093_v41  ;;  %v9099_v59 = vld [vmem:[#allocation19_spill] sm:$0xff]  ;;  %v6587_v41 = vld [vmem:[%s9040_s5 + $0xe4] sm:$0xf] }
 0x3b0   : > { %3665 = vmatpush.bf16.msrb.mxu3 %v5977_v17  ;;  %v5907_v44 = vor.u32 %v6574_v39, %v5906_v6  ;;  %3523 = vmatpush.bf16.msrb.mxu1 %v5911_v24  ;;  %v9096_v17 = vld [vmem:[#allocation15_spill] sm:$0xff] }
 0x3b1   : > { %v2802_v10 = vpop.f32.mrf.mxu2  ;;  %v2938_v31 = vmax.f32 %v2910_v29, 0.0  ;;  %v2255_v2 = vadd.f32 %v9096_v17, %v9095_v16  ;;  %v2465_v13 = vadd.f32 %v9099_v59, %v2211_v0  ;;  %v6035_v0 = vld [vmem:[%s9040_s5 + $0xe8] sm:$0xf0] }
 0x3b2   : > { %v2877_v56 = vadd.f32 %v2802_v10, %v2667_v14  ;;  %3489 = vmatpush.bf16.msrb.mxu0 %v5907_v44  ;;  %v6571_v10 = vld [vmem:[%s9040_s5 + $0x5c] sm:$0xf]  ;;  %3632 = vmatpush.bf16.msrb.mxu2 %v5965_v62  ;;  %v6038_v16 = vor.u32 %v6587_v41, %v6035_v0  ;;  %v6595_v41 = vld [vmem:[%s9040_s5 + $0x12c] sm:$0xf]  ;;  %v6088_v0 = vld [vmem:[%s9040_s5 + $0x130] sm:$0xf0] }
 0x3b3   : > { %v2466_v38 = vadd.f32 %v9100_v50, %v2255_v2  ;;  %v8350_v2 = vld [vmem:[#allocation2 + $0x30] sm:$0xff] }
 0x3b4   : > { %v2846_v8 = vpop.f32.mrf.mxu3  ;;  %v2911_v48 = vadd.f32 %v8083_v9, %v2877_v56  ;;  %3666 = vmatpush.bf16.msrb.mxu3 %v5969_v34 }
 0x3b5   : > { %v2878_v51 = vadd.f32 %v2846_v8, %v2668_v30  ;;  %v5898_v30 = vld [vmem:[%s9040_s5 + $0x58] sm:$0xf]  ;;  %v5900_v8 = vld [vmem:[%s9040_s5 + $0x60] sm:$0xf0] }
 0x3b6   : > { %v2939_v42 = vmax.f32 %v2911_v48, 0.0  ;;  %v5899_v29 = vor.u32 %v6572_v58, %v5898_v30  ;;  %v5948_v48 = vld [vmem:[%s9040_s5] sm:$0xf]  ;;  %3633 = vmatpush.bf16.msrb.mxu2 %v5957_v43 }
 0x3b7   : > { %v2912_v26 = vadd.f32 %v8085_v40, %v2878_v51  ;;  %v5949_v23 = vor.u32 %v6562_v45, %v5948_v48  ;;  %v3362_v43 = vld [vmem:[#allocation2] sm:$0xff] }
 0x3b8   : > { %v2957_v60 = vpack.c.bf16 %v2939_v42, %v2937_v21  ;;  %v5903_v21 = vor.u32 %v6571_v10, %v5900_v8  ;;  %v2600_v42 = vpop.f32.mrf.mxu0  ;;  %3490 = vmatpush.bf16.msrb.mxu0 %v5899_v29  ;;  %3667 = vmatpush.bf16.msrb.mxu3 %v5961_v52  ;;  %v3364_v8 = vld [vmem:[#allocation2 + $0x10] sm:$0xff] }
 0x3b9   : > { %v2940_v22 = vmax.f32 %v2912_v26, 0.0  ;;  %v2805_v12 = vpop.f32.mrf.mxu2  ;;  %v2673_v55 = vadd.f32 %v2600_v42, %v9097_v11 }
 0x3ba   : > { %3099 = vmatmul.bf16.gmra.mxu0 %v2957_v60  ;;  %3274 = vmatmul.bf16.gmra.mxu2 %v2957_v60  ;;  %v2879_v54 = vadd.f32 %v2805_v12, %v2669_v4  ;;  %v9098_v4 = vld [vmem:[#allocation18_spill] sm:$0xff] }
 0x3bb   : > { %v2958_v28 = vpack.c.bf16 %v2940_v22, %v2938_v31  ;;  %v5950_v31 = vld [vmem:[%s9040_s5 + $0x8] sm:$0xf0]  ;;  %v2644_v22 = vpop.f32.mrf.mxu1  ;;  %3524 = vmatpush.bf16.msrb.mxu1 %v5903_v21  ;;  %3634 = vmatpush.bf16.msrb.mxu2 %v5949_v23 }
 0x3bc   : > { %v2849_v57 = vpop.f32.mrf.mxu3  ;;  %v2913_v26 = vadd.f32 %v8083_v9, %v2879_v54  ;;  %v5953_v27 = vor.u32 %v6561_v3, %v5950_v31  ;;  %v6043_v31 = vld [vmem:[%s9040_s5 + $0xf8] sm:$0xf0] }
 0x3bd   : > { %5835 = vmatmul.msk.bf16.gmra.mxu1 %vm1614_vm2, %v2958_v28  ;;  %5882 = vmatmul.msk.bf16.gmra.mxu3 %vm1614_vm2, %v2958_v28  ;;  %v2880_v14 = vadd.f32 %v2849_v57, %v2670_v5  ;;  %v2674_v5 = vadd.f32 %v2644_v22, %v9098_v4  ;;  %v3367_v4 = vld [vmem:[#allocation2 + $0x28] sm:$0xff] }
 0x3be   : > { %v2941_v53 = vmax.f32 %v2913_v26, 0.0  ;;  %3668 = vmatpush.bf16.msrb.mxu3 %v5953_v27 }
 0x3bf   : > { %v2914_v35 = vadd.f32 %v8085_v40, %v2880_v14 }
 0x3c0   : > { %v2602_v6 = vpop.f32.mrf.mxu0 }
 0x3c1   : > { %v2807_v56 = vpop.f32.mrf.mxu2  ;;  %v2942_v28 = vmax.f32 %v2914_v35, 0.0  ;;  %v2675_v44 = vadd.f32 %v2602_v6, %v2465_v13  ;;  %v6041_v35 = vld [vmem:[%s9040_s5 + $0xf0] sm:$0xf]  ;;  %v8353_v6 = vpack.c.bf16 %v8350_v2, %v3367_v4 }
 0x3c2   : > { %v2881_v49 = vadd.f32 %v2807_v56, %v2671_v7  ;;  %v3363_v56 = vld [vmem:[#allocation2 + $0x8] sm:$0xff] }
 0x3c3   : > { %v2646_v39 = vpop.f32.mrf.mxu1  ;;  %v3372_v52 = vpack.c.bf16 %v3363_v56, %v3362_v43 }
 0x3c4   : > { %v2851_v51 = vpop.f32.mrf.mxu3  ;;  %v2915_v47 = vadd.f32 %v8083_v9, %v2881_v49  ;;  %v2676_v61 = vadd.f32 %v2646_v39, %v2466_v38  ;;  %v6590_v49 = vld [vmem:[%s9040_s5 + $0xf4] sm:$0xf0] }
 0x3c5   : > { %v2882_v25 = vadd.f32 %v2851_v51, %v2672_v36  ;;  %v3389_v51 = vpack.c.bf16 %v3364_v8, %v3363_v56  ;;  %v6042_v42 = vor.u32 %v6590_v49, %v6041_v35  ;;  %v6102_v56 = vld [vmem:[%s9040_s5 + $0x148] sm:$0xf]  ;;  %v6598_v35 = vld [vmem:[%s9040_s5 + $0x13c] sm:$0xf0]  ;;  %v6597_v49 = vld [vmem:[%s9040_s5 + $0x13c] sm:$0xf] }
 0x3c6   : > { %v2943_v60 = vmax.f32 %v2915_v47, 0.0  ;;  %v3366_v47 = vld [vmem:[#allocation2 + $0x20] sm:$0xff] }
 0x3c7   : > { %v2916_v19 = vadd.f32 %v8085_v40, %v2882_v25  ;;  %v6589_v25 = vld [vmem:[%s9040_s5 + $0xf4] sm:$0xf] }
 0x3c8   : > { %v2959_v18 = vpack.c.bf16 %v2943_v60, %v2941_v53  ;;  %v6046_v22 = vor.u32 %v6589_v25, %v6043_v31 }
 0x3c9   : > { %v2944_v12 = vmax.f32 %v2916_v19, 0.0  ;;  %v2810_v46 = vpop.f32.mrf.mxu2  ;;  %v3365_v19 = vld [vmem:[#allocation2 + $0x18] sm:$0xff] }
 0x3ca   : > { %3104 = vmatmul.bf16.gmra.mxu0 %v2959_v18  ;;  %3279 = vmatmul.bf16.gmra.mxu2 %v2959_v18  ;;  %v2883_v62 = vadd.f32 %v2810_v46, %v2673_v55  ;;  %v8326_v53 = vpack.c.bf16 %v3366_v47, %v3365_v19  ;;  %v6033_v46 = vld [vmem:[%s9040_s5 + $0xe0] sm:$0xf] }
 0x3cb   : > { %v2960_v57 = vpack.c.bf16 %v2944_v12, %v2942_v28  ;;  %v8328_v28 = vpack.c.bf16 %v3365_v19, %v3364_v8  ;;  %v6027_v8 = vld [vmem:[%s9040_s5 + $0xd8] sm:$0xf0] }
 0x3cc   : > { %v2854_v63 = vpop.f32.mrf.mxu3  ;;  %v2917_v14 = vadd.f32 %v8083_v9, %v2883_v62 }
 0x3cd   : > { %5836 = vmatmul.msk.bf16.gmra.mxu1 %vm1614_vm2, %v2960_v57  ;;  %5883 = vmatmul.msk.bf16.gmra.mxu3 %vm1614_vm2, %v2960_v57  ;;  %v2884_v34 = vadd.f32 %v2854_v63, %v2674_v5  ;;  %v6588_v63 = vld [vmem:[%s9040_s5 + $0xe4] sm:$0xf0] }
 0x3ce   : > { %v2945_v30 = vmax.f32 %v2917_v14, 0.0  ;;  %v6034_v32 = vor.u32 %v6588_v63, %v6033_v46  ;;  %v6086_v46 = vld [vmem:[%s9040_s5 + $0x128] sm:$0xf]  ;;  %v6596_v63 = vld [vmem:[%s9040_s5 + $0x12c] sm:$0xf0] }
 0x3cf   : > { %v2918_v24 = vadd.f32 %v8085_v40, %v2884_v34  ;;  %v8355_v34 = vpack.c.bf16 %v3367_v4, %v3366_v47 }
 0x3d1   : > { %v2812_v15 = vpop.f32.mrf.mxu2  ;;  %v2946_v58 = vmax.f32 %v2918_v24, 0.0 }
 0x3d2   : > { %v2885_v20 = vadd.f32 %v2812_v15, %v2675_v44  ;;  %v6067_v44 = vld [vmem:[%s9040_s5 + $0x158] sm:$0x33] }
 0x3d3   : > { %v3944_v15 = vunpack.c.l.b16 %v6067_v44 }
 0x3d4   : > { %v2856_v54 = vpop.f32.mrf.mxu3  ;;  %v2919_v1 = vadd.f32 %v8083_v9, %v2885_v20 }
 0x3d5   : > { %v2886_v37 = vadd.f32 %v2856_v54, %v2676_v61  ;;  %v3945_v54 = vunpack.c.h.b16 %v6067_v44  ;;  %v3956_v14 = vpack.c.b16 %v3944_v15, %v3944_v15  ;;  %v6594_v44 = vld [vmem:[%s9040_s5 + $0x11c] sm:$0xf0]  ;;  %v6080_v15 = vld [vmem:[%s9040_s5 + $0x120] sm:$0xf0] }
 0x3d6   : > { %v2947_v7 = vmax.f32 %v2919_v1, 0.0 }
 0x3d7   : > { %v2920_v33 = vadd.f32 %v8085_v40, %v2886_v37  ;;  %v6006_v40 = vld [vmem:[%s9040_s5 + $0x100] sm:$0x33]  ;;  %v3957_v24 = vpack.c.b16 %v3945_v54, %v3945_v54 }
 0x3d8   : > { %v2961_v10 = vpack.c.bf16 %v2947_v7, %v2945_v30  ;;  %v3753_v9 = vunpack.c.l.b16 %v6006_v40  ;;  %v3754_v21 = vunpack.c.h.b16 %v6006_v40  ;;  %v3984_v30 = vsel %vm3476_vm4, %v3956_v14, 0  ;;  %v6025_v7 = vld [vmem:[%s9040_s5 + $0xd0] sm:$0xf]  ;;  %v6599_v40 = vld [vmem:[%s9040_s5 + $0x14c] sm:$0xf] }
 0x3d9   : > { %v2948_v36 = vmax.f32 %v2920_v33, 0.0  ;;  %3991 = vmatpush.bf16.msra.mxu2 %v3984_v30 }
 0x3da   : > { %3109 = vmatmul.bf16.gmra.mxu0 %v2961_v10  ;;  %3284 = vmatmul.bf16.gmra.mxu2 %v2961_v10  ;;  %v3765_v48 = vpack.c.b16 %v3753_v9, %v3753_v9  ;;  %v3766_v26 = vpack.c.b16 %v3754_v21, %v3754_v21  ;;  %v6104_v9 = vld [vmem:[%s9040_s5 + $0x150] sm:$0xf0] }
 0x3db   : > { %v2962_v29 = vpack.c.bf16 %v2948_v36, %v2946_v58  ;;  %v3987_v58 = vsel %vm3476_vm4, %v3957_v24, 0  ;;  %v6586_v36 = vld [vmem:[%s9040_s5 + $0xd4] sm:$0xf0]  ;;  %v6107_v21 = vor.u32 %v6599_v40, %v6104_v9  ;;  %v6070_v24 = vld [vmem:[%s9040_s5 + $0x108] sm:$0xf] }
 0x3dc   : > { %v3793_v45 = vsel %vm3476_vm4, %v3765_v48, 0  ;;  %v3796_v3 = vsel %vm3476_vm4, %v3766_v26, 0  ;;  %4025 = vmatpush.bf16.msra.mxu3 %v3987_v58  ;;  %v6026_v10 = vor.u32 %v6586_v36, %v6025_v7  ;;  %v6094_v26 = vld [vmem:[%s9040_s5 + $0x138] sm:$0xf] }
 0x3dd   : > { %5837 = vmatmul.msk.bf16.gmra.mxu1 %vm1614_vm2, %v2962_v29  ;;  %5884 = vmatmul.msk.bf16.gmra.mxu3 %vm1614_vm2, %v2962_v29  ;;  %v6585_v29 = vld [vmem:[%s9040_s5 + $0xd4] sm:$0xf]  ;;  %v6095_v31 = vor.u32 %v6598_v35, %v6094_v26  ;;  %v6582_v26 = vld [vmem:[%s9040_s5 + $0xb4] sm:$0xf0] }
 0x3de   : > { %3800 = vmatpush.bf16.msra.mxu0 %v3793_v45  ;;  %3834 = vmatpush.bf16.msra.mxu1 %v3796_v3  ;;  %v6030_v43 = vor.u32 %v6585_v29, %v6027_v8 }
 0x3e0   : > { %4026 = vmatpush.bf16.msra.mxu3 %v6107_v21 }
 0x3e2   : > { %3801 = vmatpush.bf16.msra.mxu0 %v6042_v42  ;;  %3835 = vmatpush.bf16.msra.mxu1 %v6046_v22  ;;  %v6096_v42 = vld [vmem:[%s9040_s5 + $0x140] sm:$0xf0] }
 0x3e6   : > { %3802 = vmatpush.bf16.msra.mxu0 %v6034_v32  ;;  %3836 = vmatpush.bf16.msra.mxu1 %v6038_v16  ;;  %v6087_v32 = vor.u32 %v6596_v63, %v6086_v46 }
 0x3ea   : > { %5936 = vmatmul.msk.bf16.vlgmr.msrb.gmra.mxu0 %vm1918_vm3, %v3389_v51  ;;  %5986 = vmatmul.msk.bf16.vlgmr.msrb.gmra.mxu2 %vm1918_vm3, %v3372_v52 }
 0x3eb   : > { %3803 = vmatpush.bf16.msra.mxu0 %v6026_v10  ;;  %3837 = vmatpush.bf16.msra.mxu1 %v6030_v43 }
 0x3ed   : > { %5941 = vmatmul.msk.bf16.vlgmr.msrb.gmra.mxu1 %vm1918_vm3, %v3389_v51  ;;  %5991 = vmatmul.msk.bf16.vlgmr.msrb.gmra.mxu3 %vm1918_vm3, %v3372_v52  ;;  %v6600_v51 = vld [vmem:[%s9040_s5 + $0x14c] sm:$0xf0] }
 0x3ee   : > { %v6103_v52 = vor.u32 %v6600_v51, %v6102_v56 }
 0x3f0   : > { %3992 = vmatpush.bf16.msra.mxu2 %v6103_v52 }
 0x3f4   : > { %3993 = vmatpush.bf16.msra.mxu2 %v6095_v31 }
 0x3f7   : > { %v3080_v23 = vpop.f32.mrf.mxu0 }
 0x3f8   : > { %3994 = vmatpush.bf16.msra.mxu2 %v6087_v32 }
 0x3fa   : > { %v3124_v27 = vpop.f32.mrf.mxu1  ;;  %5937 = vmatmul.msk.bf16.gmra.mxu0 %vm1918_vm3, %v8326_v53  ;;  %5987 = vmatmul.msk.bf16.gmra.mxu2 %vm1918_vm3, %v8328_v28 }
 0x3fb   : > { %v3125_v5 = vadd.f32 %v3124_v27, %v3080_v23 }
 0x3fd   : > { %5942 = vmatmul.msk.bf16.gmra.mxu1 %vm1918_vm3, %v8326_v53  ;;  %5992 = vmatmul.msk.bf16.gmra.mxu3 %vm1918_vm3, %v8328_v28  ;;  %v3255_v60 = vpop.f32.mrf.mxu2 }
 0x3ff   : > { %v3082_v57 = vpop.f32.mrf.mxu0 }
 0x400   : > { %v3299_v12 = vpop.f32.mrf.mxu3 }
 0x401   : > { %v3300_v17 = vadd.f32 %v3299_v12, %v3255_v60  ;;  %v6099_v60 = vor.u32 %v6597_v49, %v6096_v42 }
 0x402   : > { %v3126_v18 = vpop.f32.mrf.mxu1 }
 0x403   : > { %v3127_v59 = vadd.f32 %v3126_v18, %v3082_v57  ;;  %v3334_v39 = vmax.f32 %v3125_v5, %v3300_v17  ;;  %4027 = vmatpush.bf16.msra.mxu3 %v6099_v60  ;;  %v6091_v17 = vor.u32 %v6595_v41, %v6088_v0 }
 0x405   : > { %v3257_v11 = vpop.f32.mrf.mxu2 }
 0x407   : > { %v3085_v50 = vpop.f32.mrf.mxu0  ;;  %4028 = vmatpush.bf16.msra.mxu3 %v6091_v17  ;;  %v6128_v17 = vld [vmem:[%s9040_s5 + $0x1b0] sm:$0x33] }
 0x408   : > { %v3301_v55 = vpop.f32.mrf.mxu3 }
 0x409   : > { %v3302_v13 = vadd.f32 %v3301_v55, %v3257_v11  ;;  %v6584_v11 = vld [vmem:[%s9040_s5 + $0xc4] sm:$0xf0] }
 0x40a   : > { %v3129_v38 = vpop.f32.mrf.mxu1  ;;  %5938 = vmatmul.msk.bf16.gmra.mxu0 %vm1918_vm3, %v8353_v6  ;;  %5988 = vmatmul.msk.bf16.gmra.mxu2 %vm1918_vm3, %v8355_v34 }
 0x40b   : > { %v3335_v62 = vmax.f32 %v3127_v59, %v3302_v13  ;;  %v3130_v22 = vadd.f32 %v3129_v38, %v3085_v50  ;;  %v6583_v59 = vld [vmem:[%s9040_s5 + $0xc4] sm:$0xf]  ;;  %v6019_v13 = vld [vmem:[%s9040_s5 + $0xc8] sm:$0xf0]  ;;  %v6078_v50 = vld [vmem:[%s9040_s5 + $0x118] sm:$0xf] }
 0x40c   : > { %v6079_v54 = vor.u32 %v6594_v44, %v6078_v50 }
 0x40d   : > { %5943 = vmatmul.msk.bf16.gmra.mxu1 %vm1918_vm3, %v8353_v6  ;;  %v3348_v61 = vmax.f32 %v3334_v39, %v3335_v62  ;;  %5993 = vmatmul.msk.bf16.gmra.mxu3 %vm1918_vm3, %v8355_v34  ;;  %v3260_v20 = vpop.f32.mrf.mxu2  ;;  %v6022_v62 = vor.u32 %v6583_v59, %v6019_v13 }
 0x40e   : > { %3995 = vmatpush.bf16.msra.mxu2 %v6079_v54 }
 0x40f   : > { %3349 = vst.msk [vmem:[#allocation2 + $0x38] sm:$0xff] %vm1918_vm3, %v3348_v61  ;;  %v3087_v1 = vpop.f32.mrf.mxu0  ;;  %v6593_v61 = vld [vmem:[%s9040_s5 + $0x11c] sm:$0xf]  ;;  %3838 = vmatpush.bf16.msra.mxu1 %v6022_v62 }
 0x410   : > { %v3304_v37 = vpop.f32.mrf.mxu3  ;;  %v6083_v14 = vor.u32 %v6593_v61, %v6080_v15  ;;  %v6609_v61 = vld [vmem:[%s9040_s5 + $0x1a4] sm:$0xf]  ;;  %v6165_v15 = vld [vmem:[%s9040_s5 + $0x1a8] sm:$0xf0] }
 0x411   : > { %v3305_v48 = vadd.f32 %v3304_v37, %v3260_v20  ;;  %v6592_v20 = vld [vmem:[%s9040_s5 + $0x10c] sm:$0xf0]  ;;  %v6591_v37 = vld [vmem:[%s9040_s5 + $0x10c] sm:$0xf] }
 0x412   : > { %v3131_v33 = vpop.f32.mrf.mxu1  ;;  %4029 = vmatpush.bf16.msra.mxu3 %v6083_v14 }
 0x413   : > { %v3132_v47 = vadd.f32 %v3131_v33, %v3087_v1  ;;  %v3336_v12 = vmax.f32 %v3130_v22, %v3305_v48  ;;  %v6071_v1 = vor.u32 %v6592_v20, %v6070_v24  ;;  %v6072_v33 = vld [vmem:[%s9040_s5 + $0x110] sm:$0xf0]  ;;  %v6009_v48 = vld [vmem:[%s9040_s5 + $0xb0] sm:$0xf] }
 0x414   : > { %v6075_v30 = vor.u32 %v6591_v37, %v6072_v33  ;;  %v6168_v37 = vor.u32 %v6609_v61, %v6165_v15 }
 0x415   : > { %v3262_v25 = vpop.f32.mrf.mxu2  ;;  %3996 = vmatpush.bf16.msra.mxu2 %v6071_v1 }
 0x416   : > { %v3369_v3 = vld [vmem:[#allocation2 + $0x38] sm:$0xff]  ;;  %4030 = vmatpush.bf16.msra.mxu3 %v6075_v30 }
 0x417   : > { %v3090_v23 = vpop.f32.mrf.mxu0  ;;  %v8408_v18 = vpack.c.bf16 %v3369_v3, %v8350_v2  ;;  %v6017_v2 = vld [vmem:[%s9040_s5 + $0xc0] sm:$0xf] }
 0x418   : > { %v3306_v45 = vpop.f32.mrf.mxu3  ;;  %v6018_v5 = vor.u32 %v6584_v11, %v6017_v2 }
 0x419   : > { %v3307_v19 = vadd.f32 %v3306_v45, %v3262_v25  ;;  %v6010_v25 = vor.u32 %v6582_v26, %v6009_v48  ;;  %v6581_v45 = vld [vmem:[%s9040_s5 + $0xb4] sm:$0xf]  ;;  %v6608_v48 = vld [vmem:[%s9040_s5 + $0x194] sm:$0xf0] }
 0x41a   : > { %v3134_v27 = vpop.f32.mrf.mxu1  ;;  %5989 = vmatmul.msk.bf16.gmra.mxu2 %vm1918_vm3, %v8408_v18  ;;  %3804 = vmatpush.bf16.msra.mxu0 %v6018_v5 }
 0x41b   : > { %v3337_v57 = vmax.f32 %v3132_v47, %v3307_v19  ;;  %v3135_v8 = vadd.f32 %v3134_v27, %v3090_v23 }
 0x41d   : > { %v3350_v16 = vmax.f32 %v3336_v12, %v3337_v57  ;;  %5994 = vmatmul.msk.bf16.gmra.mxu3 %vm1918_vm3, %v8408_v18  ;;  %v3265_v55 = vpop.f32.mrf.mxu2 }
 0x41e   : > { %3805 = vmatpush.bf16.msra.mxu0 %v6010_v25 }
 0x41f   : > { %3351 = vst.msk [vmem:[#allocation2 + $0x40] sm:$0xff] %vm1918_vm3, %v3350_v16  ;;  %v3092_v38 = vpop.f32.mrf.mxu0 }
 0x420   : > { %v3309_v4 = vpop.f32.mrf.mxu3 }
 0x421   : > { %v3310_v7 = vadd.f32 %v3309_v4, %v3265_v55  ;;  %v4135_v55 = vunpack.c.l.b16 %v6128_v17  ;;  %v4136_v4 = vunpack.c.h.b16 %v6128_v17 }
 0x422   : > { %v3136_v39 = vpop.f32.mrf.mxu1 }
 0x423   : > { %v3137_v56 = vadd.f32 %v3136_v39, %v3092_v38  ;;  %v3338_v40 = vmax.f32 %v3135_v8, %v3310_v7  ;;  %v4147_v13 = vpack.c.b16 %v4135_v55, %v4135_v55  ;;  %v4148_v50 = vpack.c.b16 %v4136_v4, %v4136_v4  ;;  %v6163_v38 = vld [vmem:[%s9040_s5 + $0x1a0] sm:$0xf]  ;;  %v6610_v39 = vld [vmem:[%s9040_s5 + $0x1a4] sm:$0xf0] }
 0x424   : > { %v6164_v20 = vor.u32 %v6610_v39, %v6163_v38  ;;  %v6139_v38 = vld [vmem:[%s9040_s5 + $0x170] sm:$0xf]  ;;  %v6604_v39 = vld [vmem:[%s9040_s5 + $0x174] sm:$0xf0] }
 0x425   : > { %v3267_v29 = vpop.f32.mrf.mxu2  ;;  %v4175_v62 = vsel %vm3476_vm4, %v4147_v13, 0  ;;  %v4178_v44 = vsel %vm3476_vm4, %v4148_v50, 0  ;;  %v6140_v15 = vor.u32 %v6604_v39, %v6139_v38  ;;  %v6620_v39 = vld [vmem:[%s9042_s7 + $0x48] sm:$0xff] }
 0x426   : > { %v3370_v58 = vld [vmem:[#allocation2 + $0x40] sm:$0xff]  ;;  %4182 = vmatpush.bf16.msrb.mxu0 %v4175_v62  ;;  %v6603_v62 = vld [vmem:[%s9040_s5 + $0x174] sm:$0xf]  ;;  %4459 = vmatpush.bf16.msrb.mxu3 %v6620_v39  ;;  %v6622_v39 = vld [vmem:[%s9043_s8 + $0x8] sm:$0xff] }
 0x427   : > { %v8463_v36 = vpack.c.bf16 %v3370_v58, %v3369_v3  ;;  %v3095_v43 = vpop.f32.mrf.mxu0  ;;  %v6011_v3 = vld [vmem:[%s9040_s5 + $0xb8] sm:$0xf0] }
 0x428   : > { %v3311_v10 = vpop.f32.mrf.mxu3  ;;  %v6014_v22 = vor.u32 %v6581_v45, %v6011_v3 }
 0x429   : > { %v3312_v51 = vadd.f32 %v3311_v10, %v3267_v29  ;;  %5939 = vmatmul.msk.bf16.gmra.mxu0 %vm1918_vm3, %v8463_v36  ;;  %5944 = vmatmul.msk.bf16.gmra.mxu1 %vm1918_vm3, %v8463_v36 }
 0x42a   : > { %v3139_v52 = vpop.f32.mrf.mxu1  ;;  %3839 = vmatpush.bf16.msra.mxu1 %v6014_v22  ;;  %4183 = vmatpush.bf16.msrb.mxu0 %v6164_v20 }
 0x42b   : > { %v3339_v9 = vmax.f32 %v3137_v56, %v3312_v51  ;;  %v3140_v12 = vadd.f32 %v3139_v52, %v3095_v43 }
 0x42d   : > { %v3352_v21 = vmax.f32 %v3338_v40, %v3339_v9  ;;  %v3270_v35 = vpop.f32.mrf.mxu2 }
 0x42e   : > { %4216 = vmatpush.bf16.msrb.mxu1 %v4178_v44 }
 0x42f   : > { %3353 = vst.msk [vmem:[#allocation2 + $0x48] sm:$0xff] %vm1918_vm3, %v3352_v21  ;;  %v3097_v31 = vpop.f32.mrf.mxu0  ;;  %v6155_v21 = vld [vmem:[%s9040_s5 + $0x190] sm:$0xf] }
 0x430   : > { %v3314_v49 = vpop.f32.mrf.mxu3  ;;  %v6156_v26 = vor.u32 %v6608_v48, %v6155_v21 }
 0x431   : > { %v3315_v19 = vadd.f32 %v3314_v49, %v3270_v35  ;;  %v6157_v35 = vld [vmem:[%s9040_s5 + $0x198] sm:$0xf0] }
 0x432   : > { %v3141_v42 = vpop.f32.mrf.mxu1  ;;  %4217 = vmatpush.bf16.msrb.mxu1 %v6168_v37  ;;  %4184 = vmatpush.bf16.msrb.mxu0 %v6156_v26 }
 0x433   : > { %v3142_v57 = vadd.f32 %v3141_v42, %v3097_v31  ;;  %v3340_v32 = vmax.f32 %v3140_v12, %v3315_v19 }
 0x435   : > { %v3272_v27 = vpop.f32.mrf.mxu2 }
 0x436   : > { %v3371_v47 = vld [vmem:[#allocation2 + $0x48] sm:$0xff] }
 0x437   : > { %v8482_v23 = vpack.c.bf16 %v3371_v47, %v3370_v58  ;;  %v3100_v63 = vpop.f32.mrf.mxu0 }
 0x438   : > { %v3316_v60 = vpop.f32.mrf.mxu3 }
 0x439   : > { %v3317_v46 = vadd.f32 %v3316_v60, %v3272_v27  ;;  %5990 = vmatmul.msk.bf16.gmra.mxu2 %vm1918_vm3, %v8482_v23  ;;  %5995 = vmatmul.msk.bf16.gmra.mxu3 %vm1918_vm3, %v8482_v23 }
 0x43a   : > { %v3144_v41 = vpop.f32.mrf.mxu1 }
 0x43b   : > { %v3341_v0 = vmax.f32 %v3142_v57, %v3317_v46  ;;  %v3145_v30 = vadd.f32 %v3144_v41, %v3100_v63 }
 0x43d   : > { %v3354_v16 = vmax.f32 %v3340_v32, %v3341_v0  ;;  %v3275_v2 = vpop.f32.mrf.mxu2  ;;  %v6606_v32 = vld [vmem:[%s9040_s5 + $0x184] sm:$0xf0] }
 0x43f   : > { %3355 = vst.msk [vmem:[#allocation2 + $0x50] sm:$0xff] %vm1918_vm3, %v3354_v16  ;;  %v3102_v5 = vpop.f32.mrf.mxu0  ;;  %v6149_v16 = vld [vmem:[%s9040_s5 + $0x188] sm:$0xf0] }
 0x440   : > { %v3319_v11 = vpop.f32.mrf.mxu3 }
 0x441   : > { %v3320_v14 = vadd.f32 %v3319_v11, %v3275_v2 }
 0x442   : > { %v3146_v59 = vpop.f32.mrf.mxu1 }
 0x443   : > { %v3147_v58 = vadd.f32 %v3146_v59, %v3102_v5  ;;  %v3342_v8 = vmax.f32 %v3145_v30, %v3320_v14  ;;  %v6141_v14 = vld [vmem:[%s9040_s5 + $0x178] sm:$0xf0] }
 0x445   : > { %v3277_v1 = vpop.f32.mrf.mxu2 }
 0x446   : > { %v8506_v54 = vld [vmem:[#allocation2 + $0x50] sm:$0xff] }
 0x447   : > { %v8509_v24 = vpack.c.bf16 %v8506_v54, %v3371_v47  ;;  %v3105_v29 = vpop.f32.mrf.mxu0 }
 0x448   : > { %v3321_v33 = vpop.f32.mrf.mxu3 }
 0x449   : > { %v3322_v7 = vadd.f32 %v3321_v33, %v3277_v1  ;;  %5940 = vmatmul.msk.bf16.gmra.mxu0 %vm1918_vm3, %v8509_v24  ;;  %5945 = vmatmul.msk.bf16.gmra.mxu1 %vm1918_vm3, %v8509_v24 }
 0x44a   : > { %v3149_v10 = vpop.f32.mrf.mxu1  ;;  %6108 = vmatmul.msk.bf16.vlgmr.msra.gmra.mxu2 %vm1918_vm3, %v8326_v53  ;;  %6113 = vmatmul.msk.bf16.vlgmr.msra.gmra.mxu3 %vm1918_vm3, %v8326_v53  ;;  %v6607_v53 = vld [vmem:[%s9040_s5 + $0x194] sm:$0xf] }
 0x44b   : > { %v3343_v56 = vmax.f32 %v3147_v58, %v3322_v7  ;;  %v6160_v49 = vor.u32 %v6607_v53, %v6157_v35  ;;  %v3150_v31 = vadd.f32 %v3149_v10, %v3105_v29 }
 0x44d   : > { %v3356_v51 = vmax.f32 %v3342_v8, %v3343_v56  ;;  %v3280_v43 = vpop.f32.mrf.mxu2  ;;  %4218 = vmatpush.bf16.msrb.mxu1 %v6160_v49  ;;  %v6131_v8 = vld [vmem:[%s9040_s5 + $0x160] sm:$0xf]  ;;  %v6602_v56 = vld [vmem:[%s9040_s5 + $0x164] sm:$0xf0] }
 0x44f   : > { %3357 = vst.msk [vmem:[#allocation2 + $0x58] sm:$0xff] %vm1918_vm3, %v3356_v51  ;;  %v3107_v40 = vpop.f32.mrf.mxu0  ;;  %v6601_v51 = vld [vmem:[%s9040_s5 + $0x164] sm:$0xf] }
 0x450   : > { %v3324_v52 = vpop.f32.mrf.mxu3 }
 0x451   : > { %v3325_v25 = vadd.f32 %v3324_v52, %v3280_v43  ;;  %v6132_v43 = vor.u32 %v6602_v56, %v6131_v8  ;;  %v6133_v52 = vld [vmem:[%s9040_s5 + $0x168] sm:$0xf0] }
 0x452   : > { %v3151_v9 = vpop.f32.mrf.mxu1  ;;  %v6136_v21 = vor.u32 %v6601_v51, %v6133_v52  ;;  %v6616_v8 = vld [vmem:[%s9042_s7 + $0x28] sm:$0xff] }
 0x453   : > { %v3152_v42 = vadd.f32 %v3151_v9, %v3107_v40  ;;  %v3344_v27 = vmax.f32 %v3150_v31, %v3325_v25 }
 0x455   : > { %v3282_v45 = vpop.f32.mrf.mxu2 }
 0x457   : > { %v3110_v47 = vpop.f32.mrf.mxu0 }
 0x458   : > { %v3326_v3 = vpop.f32.mrf.mxu3 }
 0x459   : > { %v3327_v22 = vadd.f32 %v3326_v3, %v3282_v45  ;;  %6047 = vmatmul.msk.bf16.vlgmr.msra.gmra.mxu0 %vm1918_vm3, %v8328_v28  ;;  %6052 = vmatmul.msk.bf16.vlgmr.msra.gmra.mxu1 %vm1918_vm3, %v8328_v28  ;;  %v6147_v28 = vld [vmem:[%s9040_s5 + $0x180] sm:$0xf]  ;;  %v3894_v45 = vld [vmem:[#allocation2 + $0x58] sm:$0xff] }
 0x45a   : > { %v3154_v19 = vpop.f32.mrf.mxu1  ;;  %6109 = vmatmul.msk.bf16.gmra.mxu2 %vm1918_vm3, %v8353_v6  ;;  %6114 = vmatmul.msk.bf16.gmra.mxu3 %vm1918_vm3, %v8353_v6  ;;  %v6605_v6 = vld [vmem:[%s9040_s5 + $0x184] sm:$0xf]  ;;  %v6148_v0 = vor.u32 %v6606_v32, %v6147_v28 }
 0x45b   : > { %v3345_v60 = vmax.f32 %v3152_v42, %v3327_v22  ;;  %v6152_v17 = vor.u32 %v6605_v6, %v6149_v16  ;;  %v3155_v4 = vadd.f32 %v3154_v19, %v3110_v47 }
 0x45c   : > { %4185 = vmatpush.bf16.msrb.mxu0 %v6148_v0 }
 0x45d   : > { %v3358_v12 = vmax.f32 %v3344_v27, %v3345_v60  ;;  %v3285_v57 = vpop.f32.mrf.mxu2  ;;  %4219 = vmatpush.bf16.msrb.mxu1 %v6152_v17 }
 0x45f   : > { %3359 = vst.msk [vmem:[#allocation2 + $0x60] sm:$0xff] %vm1918_vm3, %v3358_v12  ;;  %v3112_v63 = vpop.f32.mrf.mxu0 }
 0x460   : > { %v3329_v46 = vpop.f32.mrf.mxu3  ;;  %4186 = vmatpush.bf16.msrb.mxu0 %v6140_v15 }
 0x461   : > { %v3330_v2 = vadd.f32 %v3329_v46, %v3285_v57  ;;  %v3709_v57 = vpack.c.bf16 %v3894_v45, %v8506_v54 }
 0x462   : > { %v3156_v41 = vpop.f32.mrf.mxu1 }
 0x463   : > { %v3157_v5 = vadd.f32 %v3156_v41, %v3112_v63  ;;  %v3346_v44 = vmax.f32 %v3155_v4, %v3330_v2 }
 0x464   : > { %4187 = vmatpush.bf16.msrb.mxu0 %v6132_v43  ;;  %v6615_v43 = vld [vmem:[%s9042_s7 + $0x20] sm:$0xff] }
 0x465   : > { %v3287_v11 = vpop.f32.mrf.mxu2 }
 0x467   : > { %v3492_v13 = vpop.f32.mrf.mxu0 }
 0x468   : > { %v3331_v55 = vpop.f32.mrf.mxu3 }
 0x469   : > { %v3332_v59 = vadd.f32 %v3331_v55, %v3287_v11  ;;  %6048 = vmatmul.msk.bf16.gmra.mxu0 %vm1918_vm3, %v8355_v34  ;;  %6053 = vmatmul.msk.bf16.gmra.mxu1 %vm1918_vm3, %v8355_v34 }
 0x46a   : > { %v3526_v50 = vpop.f32.mrf.mxu1  ;;  %6110 = vmatmul.msk.bf16.gmra.mxu2 %vm1918_vm3, %v8463_v36  ;;  %6115 = vmatmul.msk.bf16.gmra.mxu3 %vm1918_vm3, %v8463_v36  ;;  %v6144_v36 = vor.u32 %v6603_v62, %v6141_v14  ;;  %v6628_v62 = vld [vmem:[%s9043_s8 + $0x38] sm:$0xff] }
 0x46b   : > { %v3347_v61 = vmax.f32 %v3157_v5, %v3332_v59  ;;  %4567 = vmatpush.bf16.msra.mxu0 %v6628_v62  ;;  %v6611_v62 = vld [vmem:[%s9042_s7] sm:$0xff] }
 0x46c   : > { %4220 = vmatpush.bf16.msrb.mxu1 %v6144_v36 }
 0x46d   : > { %v3360_v20 = vmax.f32 %v3346_v44, %v3347_v61  ;;  %v3636_v37 = vpop.f32.mrf.mxu2  ;;  %v6630_v44 = vld [vmem:[%s9043_s8 + $0x48] sm:$0xff] }
 0x46e   : > { %v8574_v33 = vadd.f32 %v3636_v37, %v3492_v13 }
 0x46f   : > { %3361 = vst.msk [vmem:[#allocation2 + $0x68] sm:$0xff] %vm1918_vm3, %v3360_v20  ;;  %v8578_v58 = vpop.f32.mrf.mxu0 }
 0x470   : > { %v3670_v1 = vpop.f32.mrf.mxu3  ;;  %4221 = vmatpush.bf16.msrb.mxu1 %v6136_v21 }
 0x471   : > { %v8576_v30 = vadd.f32 %v3670_v1, %v3526_v50  ;;  %v6627_v1 = vld [vmem:[%s9043_s8 + $0x30] sm:$0xff] }
 0x472   : > { %v8580_v7 = vpop.f32.mrf.mxu1  ;;  %4568 = vmatpush.bf16.msra.mxu0 %v6627_v1 }
 0x474   : > { %4607 = vmatpush.bf16.msra.mxu1 %v6630_v44 }
 0x475   : > { %v8582_v29 = vpop.f32.mrf.mxu2 }
 0x476   : > { %v4086_v51 = vld [vmem:[#allocation2 + $0x68] sm:$0xff] }
 0x477   : > { %v3497_v40 = vpop.f32.mrf.mxu0 }
 0x478   : > { %v8584_v10 = vpop.f32.mrf.mxu3 }
 0x479   : > { %6049 = vmatmul.msk.bf16.gmra.mxu0 %vm1918_vm3, %v8408_v18  ;;  %6054 = vmatmul.msk.bf16.gmra.mxu1 %vm1918_vm3, %v8408_v18 }
 0x47a   : > { %6111 = vmatmul.msk.bf16.gmra.mxu2 %vm1918_vm3, %v8509_v24  ;;  %6116 = vmatmul.msk.bf16.gmra.mxu3 %vm1918_vm3, %v8509_v24  ;;  %v3531_v9 = vpop.f32.mrf.mxu1  ;;  %v8614_v24 = vld [vmem:[#allocation2 + $0x60] sm:$0xff] }
 0x47b   : > { %v3900_v42 = vpack.c.bf16 %v8614_v24, %v3894_v45 }
 0x47d   : > { %v3641_v48 = vpop.f32.mrf.mxu2 }
 0x47e   : > { %v8606_v26 = vadd.f32 %v3641_v48, %v3497_v40  ;;  %v4091_v48 = vpack.c.bf16 %v4086_v51, %v8614_v24  ;;  %v6624_v24 = vld [vmem:[%s9043_s8 + $0x18] sm:$0xff] }
 0x47f   : > { %v8610_v49 = vpop.f32.mrf.mxu0 }
 0x480   : > { %v3675_v53 = vpop.f32.mrf.mxu3 }
 0x481   : > { %v8608_v35 = vadd.f32 %v3675_v53, %v3531_v9  ;;  %v6625_v53 = vld [vmem:[%s9043_s8 + $0x20] sm:$0xff] }
 0x482   : > { %v8612_v25 = vpop.f32.mrf.mxu1 }
 0x485   : > { %v8616_v3 = vpop.f32.mrf.mxu2 }
 0x487   : > { %v3502_v22 = vpop.f32.mrf.mxu0 }
 0x488   : > { %v8618_v31 = vpop.f32.mrf.mxu3 }
 0x489   : > { %6050 = vmatmul.msk.bf16.gmra.mxu0 %vm1918_vm3, %v8482_v23  ;;  %6055 = vmatmul.msk.bf16.gmra.mxu1 %vm1918_vm3, %v8482_v23 }
 0x48a   : > { %6112 = vmatmul.msk.bf16.gmra.mxu2 %vm1918_vm3, %v3900_v42  ;;  %6117 = vmatmul.msk.bf16.gmra.mxu3 %vm1918_vm3, %v3900_v42  ;;  %v3536_v47 = vpop.f32.mrf.mxu1 }
 0x48d   : > { %v3646_v19 = vpop.f32.mrf.mxu2 }
 0x48e   : > { %v8627_v60 = vadd.f32 %v3646_v19, %v3502_v22  ;;  %v6629_v22 = vld [vmem:[%s9043_s8 + $0x40] sm:$0xff] }
 0x48f   : > { %v8638_v41 = vpop.f32.mrf.mxu0  ;;  %4608 = vmatpush.bf16.msra.mxu1 %v6629_v22 }
 0x490   : > { %v3680_v27 = vpop.f32.mrf.mxu3 }
 0x491   : > { %v8629_v12 = vadd.f32 %v3680_v27, %v3536_v47 }
 0x492   : > { %v8640_v28 = vpop.f32.mrf.mxu1 }
 0x495   : > { %v8634_v46 = vpop.f32.mrf.mxu2 }
 0x498   : > { %v8636_v63 = vpop.f32.mrf.mxu3 }
 0x499   : > { %6051 = vmatmul.msk.bf16.gmra.mxu0 %vm1918_vm3, %v3709_v57  ;;  %6056 = vmatmul.msk.bf16.gmra.mxu1 %vm1918_vm3, %v3709_v57 }
 0x49d   : > { %v3651_v32 = vpop.f32.mrf.mxu2 }
 0x4a0   : > { %v3685_v6 = vpop.f32.mrf.mxu3 }
 0x4a5   : > { %v8654_v54 = vpop.f32.mrf.mxu2 }
 0x4a6   : > { %v3507_v0 = vpop.f32.mrf.mxu0  ;;  %v3541_v16 = vpop.f32.mrf.mxu1 }
 0x4a7   : > { %v8642_v17 = vadd.f32 %v3651_v32, %v3507_v0  ;;  %v8644_v2 = vadd.f32 %v3685_v6, %v3541_v16  ;;  %v6613_v32 = vld [vmem:[%s9042_s7 + $0x10] sm:$0xff] }
 0x4a8   : > { %v8656_v11 = vpop.f32.mrf.mxu3  ;;  %v6623_v16 = vld [vmem:[%s9043_s8 + $0x10] sm:$0xff] }
 0x4a9   : > { %6169 = vmatmul.msk.bf16.vlgmr.msrb.gmra.mxu0 %vm1918_vm3, %v8355_v34  ;;  %6174 = vmatmul.msk.bf16.vlgmr.msrb.gmra.mxu1 %vm1918_vm3, %v8355_v34 }
 0x4ae   : > { %v8658_v55 = vpop.f32.mrf.mxu0  ;;  %v8660_v4 = vpop.f32.mrf.mxu1 }
 0x4b9   : > { %6170 = vmatmul.msk.bf16.gmra.mxu0 %vm1918_vm3, %v8408_v18  ;;  %6175 = vmatmul.msk.bf16.gmra.mxu1 %vm1918_vm3, %v8408_v18  ;;  %v6618_v18 = vld [vmem:[%s9042_s7 + $0x38] sm:$0xff] }
 0x4ba   : > { %4419 = vmatpush.bf16.msrb.mxu2 %v6618_v18 }
 0x4bc   : > { %v3656_v5 = vpop.f32.mrf.mxu2  ;;  %v3690_v59 = vpop.f32.mrf.mxu3 }
 0x4c6   : > { %v3512_v13 = vpop.f32.mrf.mxu0  ;;  %v3546_v50 = vpop.f32.mrf.mxu1 }
 0x4c7   : > { %v8662_v38 = vadd.f32 %v3656_v5, %v3512_v13  ;;  %v8664_v34 = vadd.f32 %v3690_v59, %v3546_v50  ;;  %v8760_v59 = vpop.f32.mrf.mxu2  ;;  %v8762_v13 = vpop.f32.mrf.mxu3 }
 0x4c9   : > { %6171 = vmatmul.msk.bf16.gmra.mxu0 %vm1918_vm3, %v8482_v23  ;;  %6176 = vmatmul.msk.bf16.gmra.mxu1 %vm1918_vm3, %v8482_v23  ;;  %v6617_v23 = vld [vmem:[%s9042_s7 + $0x30] sm:$0xff] }
 0x4ca   : > { %4420 = vmatpush.bf16.msrb.mxu2 %v6617_v23 }
 0x4ce   : > { %v8682_v61 = vpop.f32.mrf.mxu0  ;;  %v8684_v15 = vpop.f32.mrf.mxu1  ;;  %4421 = vmatpush.bf16.msrb.mxu2 %v6616_v8 }
 0x4d2   : > { %4422 = vmatpush.bf16.msrb.mxu2 %v6615_v43 }
 0x4d6   : > { %v3807_v14 = vpop.f32.mrf.mxu0  ;;  %v3841_v36 = vpop.f32.mrf.mxu1 }
 0x4d7   : > { %v8690_v20 = vadd.f32 %v3807_v14, %v8574_v33  ;;  %v8693_v37 = vadd.f32 %v3841_v36, %v8576_v30  ;;  %v6626_v30 = vld [vmem:[%s9043_s8 + $0x28] sm:$0xff]  ;;  %v3998_v14 = vpop.f32.mrf.mxu2 }
 0x4d8   : > { %4569 = vmatpush.bf16.msra.mxu0 %v6626_v30 }
 0x4d9   : > { %6172 = vmatmul.msk.bf16.gmra.mxu0 %vm1918_vm3, %v3709_v57  ;;  %6177 = vmatmul.msk.bf16.gmra.mxu1 %vm1918_vm3, %v3709_v57 }
 0x4dc   : > { %4570 = vmatpush.bf16.msra.mxu0 %v6625_v53 }
 0x4de   : > { %v8703_v56 = vpop.f32.mrf.mxu0  ;;  %v8705_v33 = vpop.f32.mrf.mxu1 }
 0x4df   : > { %v4000_v51 = vpop.f32.mrf.mxu2 }
 0x4e0   : > { %4571 = vmatpush.bf16.msra.mxu0 %v6624_v24  ;;  %v3639_v24 = vadd.f32 %v8582_v29, %v8578_v58 }
 0x4e2   : > { %v3868_v22 = vadd.f32 %v8703_v56, %v3639_v24 }
 0x4e4   : > { %4572 = vmatpush.bf16.msra.mxu0 %v6623_v16  ;;  %v4059_v29 = vadd.f32 %v4000_v51, %v3868_v22 }
 0x4e6   : > { %v3812_v52 = vpop.f32.mrf.mxu0  ;;  %v3846_v40 = vpop.f32.mrf.mxu1 }
 0x4e7   : > { %v8714_v9 = vadd.f32 %v3812_v52, %v8606_v26  ;;  %v8717_v21 = vadd.f32 %v3846_v40, %v8608_v35  ;;  %v6614_v26 = vld [vmem:[%s9042_s7 + $0x18] sm:$0xff]  ;;  %v6619_v35 = vld [vmem:[%s9042_s7 + $0x40] sm:$0xff] }
 0x4e8   : > { %4423 = vmatpush.bf16.msrb.mxu2 %v6614_v26  ;;  %4460 = vmatpush.bf16.msrb.mxu3 %v6619_v35 }
 0x4e9   : > { %6173 = vmatmul.msk.bf16.gmra.mxu0 %vm1918_vm3, %v4091_v48  ;;  %6178 = vmatmul.msk.bf16.gmra.mxu1 %vm1918_vm3, %v4091_v48  ;;  %v4003_v48 = vpop.f32.mrf.mxu2 }
 0x4ea   : > { %4573 = vmatpush.bf16.msra.mxu0 %v6622_v39 }
 0x4ec   : > { %4424 = vmatpush.bf16.msrb.mxu2 %v6613_v32 }
 0x4ee   : > { %v8725_v45 = vpop.f32.mrf.mxu0  ;;  %v8727_v42 = vpop.f32.mrf.mxu1 }
 0x4f1   : > { %v4005_v39 = vpop.f32.mrf.mxu2 }
 0x4f6   : > { %v3817_v47 = vpop.f32.mrf.mxu0  ;;  %v3851_v19 = vpop.f32.mrf.mxu1 }
 0x4f7   : > { %v8742_v27 = vadd.f32 %v3817_v47, %v8627_v60  ;;  %v8745_v57 = vadd.f32 %v3851_v19, %v8629_v12  ;;  %v6612_v60 = vld [vmem:[%s9042_s7 + $0x8] sm:$0xff]  ;;  %v4057_v19 = vadd.f32 %v3998_v14, %v8690_v20 }
 0x4f8   : > { %4425 = vmatpush.bf16.msrb.mxu2 %v6612_v60 }
 0x4f9   : > { %v4008_v22 = vpop.f32.mrf.mxu2 }
 0x4fc   : > { %4426 = vmatpush.bf16.msrb.mxu2 %v6611_v62 }
 0x4fe   : > { %v8750_v6 = vpop.f32.mrf.mxu0  ;;  %v8752_v0 = vpop.f32.mrf.mxu1 }
 0x506   : > { %v3822_v12 = vpop.f32.mrf.mxu0  ;;  %v3856_v5 = vpop.f32.mrf.mxu1 }
 0x507   : > { %v8765_v50 = vadd.f32 %v3822_v12, %v8642_v17  ;;  %v8768_v18 = vadd.f32 %v3856_v5, %v8644_v2  ;;  %v4032_v17 = vpop.f32.mrf.mxu3  ;;  %v6621_v2 = vld [vmem:[%s9043_s8] sm:$0xff] }
 0x508   : > { %4574 = vmatpush.bf16.msra.mxu0 %v6621_v2  ;;  %v4058_v32 = vadd.f32 %v4032_v17, %v8693_v37 }
 0x50e   : > { %v8776_v44 = vpop.f32.mrf.mxu0  ;;  %v8778_v23 = vpop.f32.mrf.mxu1 }
 0x50f   : > { %v4034_v43 = vpop.f32.mrf.mxu3 }
 0x516   : > { %v3827_v36 = vpop.f32.mrf.mxu0  ;;  %v3861_v1 = vpop.f32.mrf.mxu1 }
 0x517   : > { %v8784_v8 = vadd.f32 %v3827_v36, %v8662_v38  ;;  %v8787_v30 = vadd.f32 %v3861_v1, %v8664_v34  ;;  %v4037_v53 = vpop.f32.mrf.mxu3  ;;  %v3673_v38 = vadd.f32 %v8584_v10, %v8580_v7  ;;  %v4268_v34 = vld [vmem:[%s9041_s6] sm:$0x3] }
 0x518   : > { %v8804_v60 = vperm.slane %v4268_v34, 0  ;;  %v8806_v58 = vperm.slane %v4268_v34, 1  ;;  %v3678_v34 = vadd.f32 %v8618_v31, %v8612_v25 }
 0x519   : > { %v3869_v47 = vadd.f32 %v8705_v33, %v3673_v38  ;;  %v3644_v38 = vadd.f32 %v8616_v3, %v8610_v49 }
 0x51b   : > { %v4060_v7 = vadd.f32 %v4034_v43, %v3869_v47 }
 0x51e   : > { %v8789_v52 = vpop.f32.mrf.mxu0  ;;  %v8791_v40 = vpop.f32.mrf.mxu1 }
 0x51f   : > { %v4039_v62 = vpop.f32.mrf.mxu3 }
 0x526   : > { %v4189_v26 = vpop.f32.mrf.mxu0  ;;  %v4223_v35 = vpop.f32.mrf.mxu1 }
 0x527   : > { %v4248_v16 = vadd.f32 %v4189_v26, %v4057_v19  ;;  %v4249_v12 = vadd.f32 %v4223_v35, %v4058_v32  ;;  %v4042_v47 = vpop.f32.mrf.mxu3  ;;  %v3872_v19 = vadd.f32 %v8725_v45, %v3644_v38  ;;  %v3873_v32 = vadd.f32 %v8727_v42, %v3678_v34 }
 0x529   : > { %v4274_v56 = vadd.f32 %v8804_v60, %v4248_v16  ;;  %v4275_v33 = vadd.f32 %v8806_v58, %v4249_v12  ;;  %v4061_v16 = vadd.f32 %v4003_v48, %v8714_v9  ;;  %v4062_v12 = vadd.f32 %v4037_v53, %v8717_v21 }
 0x52a   : > { %v4064_v25 = vadd.f32 %v4039_v62, %v3873_v32 }
 0x52b   : > { %v4294_v17 = vmax.f32 %v4274_v56, 0.0  ;;  %v4295_v36 = vmax.f32 %v4275_v33, 0.0 }
 0x52e   : > { %v4191_v10 = vpop.f32.mrf.mxu0  ;;  %v4225_v5 = vpop.f32.mrf.mxu1 }
 0x52f   : > { %v4250_v2 = vadd.f32 %v4191_v10, %v4059_v29  ;;  %v4251_v20 = vadd.f32 %v4225_v5, %v4060_v7  ;;  %v4063_v29 = vadd.f32 %v4005_v39, %v3872_v19  ;;  %v4044_v9 = vpop.f32.mrf.mxu3 }
 0x531   : > { %v4276_v37 = vadd.f32 %v8804_v60, %v4250_v2  ;;  %v4277_v14 = vadd.f32 %v8806_v58, %v4251_v20  ;;  %v4010_v2 = vpop.f32.mrf.mxu2 }
 0x533   : > { %v4296_v1 = vmax.f32 %v4276_v37, 0.0  ;;  %v4297_v26 = vmax.f32 %v4277_v14, 0.0 }
 0x535   : > { %v4314_v51 = vpack.c.bf16 %v4296_v1, %v4294_v17  ;;  %v4315_v43 = vpack.c.bf16 %v4297_v26, %v4295_v36  ;;  %v3649_v17 = vadd.f32 %v8634_v46, %v8638_v41  ;;  %v3683_v36 = vadd.f32 %v8636_v63, %v8640_v28 }
 0x536   : > { %v4194_v35 = vpop.f32.mrf.mxu0  ;;  %v4228_v24 = vpop.f32.mrf.mxu1 }
 0x537   : > { %4427 = vmatmul.bf16.vlgmr.msrb.gmra.mxu2 %v4314_v51  ;;  %6219 = vmatmul.msk.bf16.vlgmr.msrb.gmra.mxu3 %vm573_vm0, %v4315_v43  ;;  %v4252_v49 = vadd.f32 %v4194_v35, %v4061_v16  ;;  %v4253_v3 = vadd.f32 %v4228_v24, %v4062_v12  ;;  %v3876_v1 = vadd.f32 %v8750_v6, %v3649_v17  ;;  %v4047_v41 = vpop.f32.mrf.mxu3 }
 0x538   : > { %4575 = vmatmul.bf16.vlgmr.msra.gmra.mxu0 %v4314_v51  ;;  %6264 = vmatmul.msk.bf16.vlgmr.msra.gmra.mxu1 %vm573_vm0, %v4315_v43  ;;  %v3877_v26 = vadd.f32 %v8752_v0, %v3683_v36  ;;  %v4065_v51 = vadd.f32 %v4008_v22, %v8742_v27  ;;  %v4066_v43 = vadd.f32 %v4042_v47, %v8745_v57 }
 0x539   : > { %v4278_v10 = vadd.f32 %v8804_v60, %v4252_v49  ;;  %v4279_v5 = vadd.f32 %v8806_v58, %v4253_v3  ;;  %v4013_v46 = vpop.f32.mrf.mxu2  ;;  %v4067_v38 = vadd.f32 %v4010_v2, %v3876_v1 }
 0x53a   : > { %v4068_v63 = vadd.f32 %v4044_v9, %v3877_v26 }
 0x53b   : > { %v4298_v48 = vmax.f32 %v4278_v10, 0.0  ;;  %v4299_v21 = vmax.f32 %v4279_v5, 0.0 }
 0x53e   : > { %v4196_v31 = vpop.f32.mrf.mxu0  ;;  %v4230_v7 = vpop.f32.mrf.mxu1 }
 0x53f   : > { %v4254_v56 = vadd.f32 %v4196_v31, %v4063_v29  ;;  %v4255_v33 = vadd.f32 %v4230_v7, %v4064_v25  ;;  %v3654_v31 = vadd.f32 %v8654_v54, %v8658_v55  ;;  %v3688_v7 = vadd.f32 %v8656_v11, %v8660_v4  ;;  %v4049_v5 = vpop.f32.mrf.mxu3 }
 0x541   : > { %v4280_v45 = vadd.f32 %v8804_v60, %v4254_v56  ;;  %v4281_v42 = vadd.f32 %v8806_v58, %v4255_v33  ;;  %v4015_v10 = vpop.f32.mrf.mxu2  ;;  %v3880_v56 = vadd.f32 %v8776_v44, %v3654_v31  ;;  %v3881_v33 = vadd.f32 %v8778_v23, %v3688_v7 }
 0x543   : > { %v4300_v53 = vmax.f32 %v4280_v45, 0.0  ;;  %v4301_v20 = vmax.f32 %v4281_v42, 0.0  ;;  %v4069_v45 = vadd.f32 %v4013_v46, %v8765_v50  ;;  %v4070_v42 = vadd.f32 %v4047_v41, %v8768_v18 }
 0x544   : > { %v4071_v2 = vadd.f32 %v4015_v10, %v3880_v56  ;;  %v4072_v11 = vadd.f32 %v4049_v5, %v3881_v33 }
 0x545   : > { %v4317_v39 = vpack.c.bf16 %v4301_v20, %v4299_v21  ;;  %v4316_v62 = vpack.c.bf16 %v4300_v53, %v4298_v48 }
 0x546   : > { %v4199_v37 = vpop.f32.mrf.mxu0  ;;  %v4233_v14 = vpop.f32.mrf.mxu1 }
 0x547   : > { %4432 = vmatmul.bf16.gmra.mxu2 %v4316_v62  ;;  %6220 = vmatmul.msk.bf16.gmra.mxu3 %vm573_vm0, %v4317_v39  ;;  %v4256_v35 = vadd.f32 %v4199_v37, %v4065_v51  ;;  %v4257_v24 = vadd.f32 %v4233_v14, %v4066_v43  ;;  %v4052_v50 = vpop.f32.mrf.mxu3  ;;  %v3659_v51 = vadd.f32 %v8760_v59, %v8682_v61 }
 0x548   : > { %4580 = vmatmul.bf16.gmra.mxu0 %v4316_v62  ;;  %6265 = vmatmul.msk.bf16.gmra.mxu1 %vm573_vm0, %v4317_v39  ;;  %v4074_v1 = vadd.f32 %v4052_v50, %v8787_v30 }
 0x549   : > { %v4282_v19 = vadd.f32 %v8804_v60, %v4256_v35  ;;  %v4283_v32 = vadd.f32 %v8806_v58, %v4257_v24  ;;  %v4018_v39 = vpop.f32.mrf.mxu2  ;;  %v3693_v24 = vadd.f32 %v8762_v13, %v8684_v15 }
 0x54a   : > { %v4073_v36 = vadd.f32 %v4018_v39, %v8784_v8  ;;  %v3884_v8 = vadd.f32 %v8789_v52, %v3659_v51 }
 0x54b   : > { %v4302_v22 = vmax.f32 %v4282_v19, 0.0  ;;  %v4303_v57 = vmax.f32 %v4283_v32, 0.0  ;;  %v3885_v30 = vadd.f32 %v8791_v40, %v3693_v24 }
 0x54e   : > { %v4201_v28 = vpop.f32.mrf.mxu0  ;;  %v4235_v34 = vpop.f32.mrf.mxu1 }
 0x54f   : > { %v4258_v16 = vadd.f32 %v4201_v28, %v4067_v38  ;;  %v4259_v6 = vadd.f32 %v4235_v34, %v4068_v63  ;;  %v4054_v63 = vpop.f32.mrf.mxu3 }
 0x550   : > { %v4076_v15 = vadd.f32 %v4054_v63, %v3885_v30 }
 0x551   : > { %v4284_v0 = vadd.f32 %v8804_v60, %v4258_v16  ;;  %v4285_v27 = vadd.f32 %v8806_v58, %v4259_v6  ;;  %v4020_v59 = vpop.f32.mrf.mxu2 }
 0x552   : > { %v4075_v28 = vadd.f32 %v4020_v59, %v3884_v8  ;;  %v6646_v59 = vld [vmem:[%s9044_s9 + $0x78] sm:$0xff] }
 0x553   : > { %v4304_v47 = vmax.f32 %v4284_v0, 0.0  ;;  %v4305_v12 = vmax.f32 %v4285_v27, 0.0  ;;  %4909 = vmatpush.bf16.msra.mxu3 %v6646_v59  ;;  %v6663_v59 = vld [vmem:[%s9046_s11 + $0x38] sm:$0xff] }
 0x555   : > { %v4319_v49 = vpack.c.bf16 %v4305_v12, %v4303_v57  ;;  %v4318_v3 = vpack.c.bf16 %v4304_v47, %v4302_v22 }
 0x556   : > { %v4204_v29 = vpop.f32.mrf.mxu0  ;;  %v4238_v25 = vpop.f32.mrf.mxu1 }
 0x557   : > { %4437 = vmatmul.bf16.gmra.mxu2 %v4318_v3  ;;  %6221 = vmatmul.msk.bf16.gmra.mxu3 %vm573_vm0, %v4319_v49  ;;  %v4260_v54 = vadd.f32 %v4204_v29, %v4069_v45  ;;  %v4261_v55 = vadd.f32 %v4238_v25, %v4070_v42 }
 0x558   : > { %4585 = vmatmul.bf16.gmra.mxu0 %v4318_v3  ;;  %6266 = vmatmul.msk.bf16.gmra.mxu1 %vm573_vm0, %v4319_v49 }
 0x559   : > { %v4286_v48 = vadd.f32 %v8804_v60, %v4260_v54  ;;  %v4287_v21 = vadd.f32 %v8806_v58, %v4261_v55 }
 0x55b   : > { %v4306_v62 = vmax.f32 %v4286_v48, 0.0  ;;  %v4307_v18 = vmax.f32 %v4287_v21, 0.0 }
 0x55e   : > { %v4206_v4 = vpop.f32.mrf.mxu0  ;;  %v4240_v9 = vpop.f32.mrf.mxu1 }
 0x55f   : > { %v4262_v53 = vadd.f32 %v4206_v4, %v4071_v2  ;;  %v4263_v20 = vadd.f32 %v4240_v9, %v4072_v11 }
 0x561   : > { %v4288_v44 = vadd.f32 %v8804_v60, %v4262_v53  ;;  %v4289_v23 = vadd.f32 %v8806_v58, %v4263_v20 }
 0x563   : > { %v4308_v37 = vmax.f32 %v4288_v44, 0.0  ;;  %v4309_v14 = vmax.f32 %v4289_v23, 0.0 }
 0x565   : > { %v4321_v17 = vpack.c.bf16 %v4309_v14, %v4307_v18  ;;  %v4320_v26 = vpack.c.bf16 %v4308_v37, %v4306_v62 }
 0x566   : > { %v4209_v43 = vpop.f32.mrf.mxu0  ;;  %v4243_v35 = vpop.f32.mrf.mxu1 }
 0x567   : > { %v4264_v46 = vadd.f32 %v4209_v43, %v4073_v36  ;;  %v4265_v41 = vadd.f32 %v4243_v35, %v4074_v1  ;;  %4442 = vmatmul.bf16.gmra.mxu2 %v4320_v26  ;;  %6222 = vmatmul.msk.bf16.gmra.mxu3 %vm573_vm0, %v4321_v17 }
 0x568   : > { %4590 = vmatmul.bf16.gmra.mxu0 %v4320_v26  ;;  %6267 = vmatmul.msk.bf16.gmra.mxu1 %vm573_vm0, %v4321_v17 }
 0x569   : > { %v4290_v38 = vadd.f32 %v8804_v60, %v4264_v46  ;;  %v4291_v61 = vadd.f32 %v8806_v58, %v4265_v41 }
 0x56b   : > { %v4310_v0 = vmax.f32 %v4290_v38, 0.0  ;;  %v4311_v52 = vmax.f32 %v4291_v61, 0.0  ;;  %v6638_v61 = vld [vmem:[%s9044_s9 + $0x38] sm:$0xff] }
 0x56c   : > { %4896 = vmatpush.bf16.msra.mxu2 %v6638_v61 }
 0x56e   : > { %v4211_v13 = vpop.f32.mrf.mxu0  ;;  %v4245_v34 = vpop.f32.mrf.mxu1 }
 0x56f   : > { %v4266_v19 = vadd.f32 %v4211_v13, %v4075_v28  ;;  %v4267_v32 = vadd.f32 %v4245_v34, %v4076_v15  ;;  %v6637_v15 = vld [vmem:[%s9044_s9 + $0x30] sm:$0xff] }
 0x570   : > { %v6645_v13 = vld [vmem:[%s9044_s9 + $0x70] sm:$0xff]  ;;  %4897 = vmatpush.bf16.msra.mxu2 %v6637_v15  ;;  %v6661_v15 = vld [vmem:[%s9046_s11 + $0x28] sm:$0xff] }
 0x571   : > { %v4292_v16 = vadd.f32 %v8804_v60, %v4266_v19  ;;  %v4293_v6 = vadd.f32 %v8806_v58, %v4267_v32  ;;  %4910 = vmatpush.bf16.msra.mxu3 %v6645_v13  ;;  %v6636_v32 = vld [vmem:[%s9044_s9 + $0x28] sm:$0xff]  ;;  %v6660_v13 = vld [vmem:[%s9046_s11 + $0x20] sm:$0xff] }
 0x573   : > { %v4312_v27 = vmax.f32 %v4292_v16, 0.0  ;;  %v4313_v40 = vmax.f32 %v4293_v6, 0.0  ;;  %v6644_v16 = vld [vmem:[%s9044_s9 + $0x68] sm:$0xff] }
 0x574   : > { %4898 = vmatpush.bf16.msra.mxu2 %v6636_v32  ;;  %v6658_v32 = vld [vmem:[%s9046_s11 + $0x10] sm:$0xff] }
 0x575   : > { %v4323_v22 = vpack.c.bf16 %v4313_v40, %v4311_v52  ;;  %v4322_v57 = vpack.c.bf16 %v4312_v27, %v4310_v0  ;;  %4911 = vmatpush.bf16.msra.mxu3 %v6644_v16  ;;  %v6657_v16 = vld [vmem:[%s9046_s11 + $0x8] sm:$0xff] }
 0x577   : > { %4447 = vmatmul.bf16.gmra.mxu2 %v4322_v57  ;;  %6223 = vmatmul.msk.bf16.gmra.mxu3 %vm573_vm0, %v4323_v22 }
 0x578   : > { %4595 = vmatmul.bf16.gmra.mxu0 %v4322_v57  ;;  %6268 = vmatmul.msk.bf16.gmra.mxu1 %vm573_vm0, %v4323_v22  ;;  %v6635_v57 = vld [vmem:[%s9044_s9 + $0x20] sm:$0xff] }
 0x579   : > { %4899 = vmatpush.bf16.msra.mxu2 %v6635_v57  ;;  %v6667_v57 = vld [vmem:[%s9048_s13 + $0x18] sm:$0xff] }
 0x5b5   : > { %v4576_v47 = vpop.f32.mrf.mxu0  ;;  %v4610_v12 = vpop.f32.mrf.mxu1 }
 0x5b6   : > { %v4611_v7 = vadd.f32 %v4610_v12, %v4576_v47  ;;  %v6643_v47 = vld [vmem:[%s9044_s9 + $0x60] sm:$0xff] }
 0x5b7   : > { %4912 = vmatpush.bf16.msra.mxu3 %v6643_v47 }
 0x5ba   : > { %v4428_v49 = vpop.f32.mrf.mxu2  ;;  %v4462_v3 = vpop.f32.mrf.mxu3 }
 0x5bb   : > { %v4463_v25 = vadd.f32 %v4462_v3, %v4428_v49 }
 0x5bd   : > { %v4578_v29 = vpop.f32.mrf.mxu0  ;;  %v4612_v60 = vpop.f32.mrf.mxu1  ;;  %v4635_v56 = vmax.f32 %v4463_v25, %v4611_v7  ;;  %v6634_v25 = vld [vmem:[%s9044_s9 + $0x18] sm:$0xff]  ;;  %v6633_v7 = vld [vmem:[%s9044_s9 + $0x10] sm:$0xff] }
 0x5be   : > { %v4613_v10 = vadd.f32 %v4612_v60, %v4578_v29  ;;  %4900 = vmatpush.bf16.msra.mxu2 %v6634_v25 }
 0x5c2   : > { %v4430_v58 = vpop.f32.mrf.mxu2  ;;  %v4464_v31 = vpop.f32.mrf.mxu3  ;;  %4901 = vmatpush.bf16.msra.mxu2 %v6633_v7 }
 0x5c3   : > { %v4465_v5 = vadd.f32 %v4464_v31, %v4430_v58 }
 0x5c5   : > { %v4636_v33 = vmax.f32 %v4465_v5, %v4613_v10  ;;  %v4581_v45 = vpop.f32.mrf.mxu0  ;;  %v4615_v42 = vpop.f32.mrf.mxu1 }
 0x5c6   : > { %v4616_v53 = vadd.f32 %v4615_v42, %v4581_v45 }
 0x5c7   : > { %v4645_v54 = vmax.f32 %v4635_v56, %v4636_v33 }
 0x5c9   : > { %4647 = vst.msk [vmem:[#allocation3] sm:$0xff] %vm4646_vm5, %v4645_v54 }
 0x5ca   : > { %v4433_v55 = vpop.f32.mrf.mxu2  ;;  %v4467_v2 = vpop.f32.mrf.mxu3 }
 0x5cb   : > { %v4468_v9 = vadd.f32 %v4467_v2, %v4433_v55 }
 0x5cd   : > { %v4583_v11 = vpop.f32.mrf.mxu0  ;;  %v4617_v4 = vpop.f32.mrf.mxu1  ;;  %v4637_v23 = vmax.f32 %v4468_v9, %v4616_v53  ;;  %v6632_v9 = vld [vmem:[%s9044_s9 + $0x8] sm:$0xff]  ;;  %v6641_v53 = vld [vmem:[%s9044_s9 + $0x50] sm:$0xff] }
 0x5ce   : > { %v4618_v20 = vadd.f32 %v4617_v4, %v4583_v11  ;;  %4902 = vmatpush.bf16.msra.mxu2 %v6632_v9  ;;  %v6884_v9 = vld [vmem:[%s9049_s14] ss:$0 sm:$0xff] }
 0x5d2   : > { %v4435_v48 = vpop.f32.mrf.mxu2  ;;  %v4469_v21 = vpop.f32.mrf.mxu3 }
 0x5d3   : > { %v4470_v44 = vadd.f32 %v4469_v21, %v4435_v48  ;;  %v6642_v48 = vld [vmem:[%s9044_s9 + $0x58] sm:$0xff]  ;;  %v6631_v21 = vld [vmem:[%s9044_s9] sm:$0xff] }
 0x5d4   : > { %4913 = vmatpush.bf16.msra.mxu3 %v6642_v48  ;;  %4903 = vmatpush.bf16.msra.mxu2 %v6631_v21 }
 0x5d5   : > { %v4638_v39 = vmax.f32 %v4470_v44, %v4618_v20  ;;  %v4586_v50 = vpop.f32.mrf.mxu0  ;;  %v4620_v62 = vpop.f32.mrf.mxu1  ;;  %v6640_v20 = vld [vmem:[%s9044_s9 + $0x48] sm:$0xff]  ;;  %v6654_v44 = vld [vmem:[%s9044_s9 + $0xb8] sm:$0xff] }
 0x5d6   : > { %v4621_v43 = vadd.f32 %v4620_v62, %v4586_v50  ;;  %v6639_v50 = vld [vmem:[%s9044_s9 + $0x40] sm:$0xff]  ;;  %v6652_v62 = vld [vmem:[%s9044_s9 + $0xa8] sm:$0xff] }
 0x5d7   : > { %v4648_v18 = vmax.f32 %v4637_v23, %v4638_v39  ;;  %v6653_v23 = vld [vmem:[%s9044_s9 + $0xb0] sm:$0xff] }
 0x5d8   : > { %4914 = vmatpush.bf16.msra.mxu3 %v6641_v53  ;;  %4922 = vmatpush.bf16.msrb.mxu2 %v6654_v44 }
 0x5d9   : > { %4650 = vrot.lane.b32.xlu0 %v4648_v18, %s6949_s16  ;;  %v6651_v18 = vld [vmem:[%s9044_s9 + $0xa0] sm:$0xff]  ;;  %s5128_s16 = sshll.u32 %s487_s26, 4  ;;  %s5129_s16 = int_to_ptr.vmem [resolvable:$true] %s5128_s16 }
 0x5da   : > { %v4438_v37 = vpop.f32.mrf.mxu2  ;;  %v4472_v14 = vpop.f32.mrf.mxu3 }
 0x5db   : > { %v4473_v1 = vadd.f32 %v4472_v14, %v4438_v37 }
 0x5dc   : > { %4915 = vmatpush.bf16.msra.mxu3 %v6640_v20  ;;  %4923 = vmatpush.bf16.msrb.mxu2 %v6653_v23 }
 0x5dd   : > { %v4588_v17 = vpop.f32.mrf.mxu0  ;;  %v4622_v36 = vpop.f32.mrf.mxu1  ;;  %v4639_v46 = vmax.f32 %v4473_v1, %v4621_v43  ;;  %v6649_v1 = vld [vmem:[%s9044_s9 + $0x90] sm:$0xff]  ;;  %v6647_v43 = vld [vmem:[%s9044_s9 + $0x80] sm:$0xff] }
 0x5de   : > { %v4623_v35 = vadd.f32 %v4622_v36, %v4588_v17  ;;  %v6650_v17 = vld [vmem:[%s9044_s9 + $0x98] sm:$0xff]  ;;  %v6655_v36 = vld [vmem:[%s9044_s9 + $0xc0] sm:$0xff] }
 0x5e0   : > { %4916 = vmatpush.bf16.msra.mxu3 %v6639_v50  ;;  %4924 = vmatpush.bf16.msrb.mxu2 %v6652_v62 }
 0x5e2   : > { %v4440_v26 = vpop.f32.mrf.mxu2  ;;  %v4474_v51 = vpop.f32.mrf.mxu3 }
 0x5e3   : > { %v4475_v24 = vadd.f32 %v4474_v51, %v4440_v26  ;;  %v6648_v51 = vld [vmem:[%s9044_s9 + $0x88] sm:$0xff] }
 0x5e4   : > { %4925 = vmatpush.bf16.msrb.mxu2 %v6651_v18  ;;  %4942 = vmatpush.bf16.msrb.mxu3 %v6655_v36 }
 0x5e5   : > { %v4640_v41 = vmax.f32 %v4475_v24, %v4623_v35  ;;  %v4591_v8 = vpop.f32.mrf.mxu0  ;;  %v4625_v30 = vpop.f32.mrf.mxu1 }
 0x5e6   : > { %v4626_v27 = vadd.f32 %v4625_v30, %v4591_v8 }
 0x5e7   : > { %v4656_v38 = vmax.f32 %v4639_v46, %v4640_v41 }
 0x5e8   : > { %4926 = vmatpush.bf16.msrb.mxu2 %v6650_v17 }
 0x5e9   : > { %4658 = vrot.lane.b32.xlu0 %v4656_v38, %s6950_s17  ;;  %s6952_s17 = smov 64  }
 0x5ea   : > { %v4443_v63 = vpop.f32.mrf.mxu2  ;;  %v4477_v28 = vpop.f32.mrf.mxu3 }
 0x5eb   : > { %v4478_v6 = vadd.f32 %v4477_v28, %v4443_v63  ;;  %v6662_v63 = vld [vmem:[%s9046_s11 + $0x30] sm:$0xff] }
 0x5ec   : > { %4927 = vmatpush.bf16.msrb.mxu2 %v6649_v1 }
 0x5ed   : > { %v4593_v34 = vpop.f32.mrf.mxu0  ;;  %v4627_v19 = vpop.f32.mrf.mxu1  ;;  %v4641_v12 = vmax.f32 %v4478_v6, %v4626_v27  ;;  %v6656_v6 = vld [vmem:[%s9046_s11] sm:$0xff]  ;;  %v6669_v27 = vld [vmem:[%s9048_s13 + $0x28] sm:$0xff] }
 0x5ee   : > { %v4628_v40 = vadd.f32 %v4627_v19, %v4593_v34  ;;  %v6659_v19 = vld [vmem:[%s9046_s11 + $0x18] sm:$0xff] }
 0x5f0   : > { %4928 = vmatpush.bf16.msrb.mxu2 %v6648_v51 }
 0x5f2   : > { %v4445_v0 = vpop.f32.mrf.mxu2  ;;  %v4479_v52 = vpop.f32.mrf.mxu3 }
 0x5f3   : > { %v4480_v22 = vadd.f32 %v4479_v52, %v4445_v0  ;;  %v6671_v0 = vld [vmem:[%s9048_s13 + $0x38] sm:$0xff]  ;;  %v6670_v52 = vld [vmem:[%s9048_s13 + $0x30] sm:$0xff] }
 0x5f4   : > { %4929 = vmatpush.bf16.msrb.mxu2 %v6647_v43 }
 0x5f5   : > { %v4642_v49 = vmax.f32 %v4480_v22, %v4628_v40  ;;  %v4596_v3 = vpop.f32.mrf.mxu0  ;;  %v4630_v29 = vpop.f32.mrf.mxu1  ;;  %v6668_v22 = vld [vmem:[%s9048_s13 + $0x20] sm:$0xff] }
 0x5f6   : > { %v4631_v42 = vadd.f32 %v4630_v29, %v4596_v3 }
 0x5f7   : > { %v4663_v60 = vmax.f32 %v4641_v12, %v4642_v49  ;;  %v6882_v12 = vld [vmem:[%s9045_s10] ss:$0 sm:$0xff]  ;;  %v6666_v49 = vld [vmem:[%s9048_s13 + $0x10] sm:$0xff] }
 0x5f9   : > { %4665 = vrot.lane.b32.xlu1 %v4663_v60, %s6951_s29 }
 0x5fa   : > { %v4448_v58 = vpop.f32.mrf.mxu2  ;;  %v4482_v31 = vpop.f32.mrf.mxu3 }
 0x5fb   : > { %v4483_v56 = vadd.f32 %v4482_v31, %v4448_v58 }
 0x5fd   : > { %v4598_v10 = vpop.f32.mrf.mxu0  ;;  %v4632_v5 = vpop.f32.mrf.mxu1  ;;  %v4643_v2 = vmax.f32 %v4483_v56, %v4631_v42  ;;  %v6883_v42 = vld [vmem:[%s9047_s12] ss:$0 sm:$0xff] }
 0x5fe   : > { %v4633_v54 = vadd.f32 %v4632_v5, %v4598_v10 }
 0x602   : > { %v4450_v33 = vpop.f32.mrf.mxu2  ;;  %v4484_v45 = vpop.f32.mrf.mxu3 }
 0x603   : > { %v4485_v55 = vadd.f32 %v4484_v45, %v4450_v33  ;;  %v6665_v33 = vld [vmem:[%s9048_s13 + $0x8] sm:$0xff]  ;;  %v6664_v45 = vld [vmem:[%s9048_s13] sm:$0xff] }
 0x605   : > { %v4644_v11 = vmax.f32 %v4485_v55, %v4633_v54 }
 0x607   : > { %v4672_v4 = vmax.f32 %v4643_v2, %v4644_v11 }
 0x609   : > { %4674 = vrot.lane.b32.xlu1 %v4672_v4, %s6952_s17  ;;  %s5130_s17 = sshll.u32 %s5126_s24, 4  ;;  %s5131_s17 = int_to_ptr.hbm [resolvable:$true] %s5130_s17 }
 0x60a   : > { %s6899_s22 = sshra.s32 %s5131_s17, 4  ;;  %s6900_s22 = int_to_ptr.hbm [resolvable:$true] %s6899_s22 }
 0x60b   : > { %s6901_s1 = scalar_lea.hbm %s6900_s22, 8  ;;  %p6906_p0 = scmp.lt.s32.totalorder %s6900_s22, %s9050_s15 }
 0x60c   : > { %p6902_p11 = scmp.ne.s32.totalorder %s6900_s22, %s6901_s1  ;;  %p6907_p1 = scmp.lt.s32.totalorder %s6905_s30, %s6901_s1 }
 0x60e   : > { %p6903_p12 = pnand %p6902_p11, %p7071_p5  ;;  %p6908_p2 = por %p6907_p1, %p6906_p0 }
 0x610   : > { %p6904_p13 = pneg %p6903_p12 }
 0x612   : > { %p6909_p3 = pnand %p6908_p2, %p6904_p13 }
 0x64b   : > { %v4651_v39 = vpop.permute.xlu0 %4650 }
 0x64c   : > { %4654 = vst.msk [vmem:[#allocation3] sm:$0xff] %vm4653_vm6, %v4651_v39 }
 0x64d   : > { %4655 = vst.msk [vmem:[#allocation3 + $0x8] sm:$0xff] %vm573_vm0, %v4651_v39 }
 0x653   : > { %v4681_v37 = vld [vmem:[#allocation3] sm:$0xff] }
 0x654   : > { %v4685_v14 = vpack.c.bf16 %v4681_v37, %v4681_v37 }
 0x656   : > { %4904 = vmatmul.bf16.vlgmr.msra.gmra.mxu2 %v4685_v14 }
 0x657   : > { %5101 = vmatpush.bf16.msra.mxu2 %v6671_v0 }
 0x65b   : > { %v4659_v26 = vpop.permute.xlu0 %4658  ;;  %5102 = vmatpush.bf16.msra.mxu2 %v6670_v52 }
 0x65c   : > { %4662 = vst.msk [vmem:[#allocation3 + $0x8] sm:$0xff] %vm4661_vm7, %v4659_v26 }
 0x65f   : > { %5103 = vmatpush.bf16.msra.mxu2 %v6669_v27 }
 0x663   : > { %5104 = vmatpush.bf16.msra.mxu2 %v6668_v22 }
 0x667   : > { %5105 = vmatpush.bf16.msra.mxu2 %v6667_v57 }
 0x66b   : > { %v4666_v35 = vpop.permute.xlu1 %4665  ;;  %5106 = vmatpush.bf16.msra.mxu2 %v6666_v49 }
 0x66c   : > { %4669 = vst.msk [vmem:[#allocation3 + $0x8] sm:$0xff] %vm4668_vm8, %v4666_v35 }
 0x66d   : > { %4671 = vst.msk [vmem:[#allocation3 + $0x10] sm:$0xff] %vm4670_vm9, %v4666_v35 }
 0x66f   : > { %5107 = vmatpush.bf16.msra.mxu2 %v6665_v33 }
 0x673   : > { %v4682_v24 = vld [vmem:[#allocation3 + $0x8] sm:$0xff]  ;;  %5108 = vmatpush.bf16.msra.mxu2 %v6664_v45 }
 0x674   : > { %v4686_v46 = vpack.c.bf16 %v4682_v24, %v4682_v24 }
 0x676   : > { %4917 = vmatmul.bf16.vlgmr.msra.gmra.mxu3 %v4686_v46 }
 0x677   : > { %5018 = vmatpush.bf16.msra.mxu3 %v6663_v59 }
 0x67b   : > { %v4675_v41 = vpop.permute.xlu1 %4674  ;;  %5019 = vmatpush.bf16.msra.mxu3 %v6662_v63 }
 0x67c   : > { %4678 = vst.msk [vmem:[#allocation3 + $0x10] sm:$0xff] %vm4677_vm10, %v4675_v41 }
 0x67d   : > { %4680 = vst.msk [vmem:[#allocation3 + $0x18] sm:$0xff] %vm4679_vm11, %v4675_v41 }
 0x67f   : > { %5020 = vmatpush.bf16.msra.mxu3 %v6661_v15 }
 0x683   : > { %v4683_v8 = vld [vmem:[#allocation3 + $0x10] sm:$0xff]  ;;  %5021 = vmatpush.bf16.msra.mxu3 %v6660_v13 }
 0x684   : > { %v4687_v30 = vpack.c.bf16 %v4683_v8, %v4683_v8  ;;  %v4684_v38 = vld [vmem:[#allocation3 + $0x18] sm:$0xff] }
 0x685   : > { %v4688_v61 = vpack.c.bf16 %v4684_v38, %v4684_v38 }
 0x686   : > { %4930 = vmatmul.bf16.vlgmr.msrb.gmra.mxu2 %v4687_v30 }
 0x687   : > { %6369 = vmatmul.msk.bf16.vlgmr.msrb.gmra.mxu3 %vm4679_vm11, %v4688_v61 }
 0x688   : > { %5022 = vmatpush.bf16.msra.mxu3 %v6659_v19 }
 0x68c   : > { %5023 = vmatpush.bf16.msra.mxu3 %v6658_v32 }
 0x690   : > { %5024 = vmatpush.bf16.msra.mxu3 %v6657_v16 }
 0x694   : > { %5025 = vmatpush.bf16.msra.mxu3 %v6656_v6 }
 0x6d9   : > { %v4905_v28 = vpop.f32.mrf.mxu2 }
 0x6da   : > { %v4906_v3 = vadd.f32 %v6882_v12, %v4905_v28 }
 0x6e1   : > { %v4907_v34 = vpop.f32.mrf.mxu2 }
 0x6f9   : > { %v4918_v40 = vpop.f32.mrf.mxu3 }
 0x6fa   : > { %v4919_v29 = vadd.f32 %v4918_v40, %v4906_v3 }
 0x701   : > { %v4920_v47 = vpop.f32.mrf.mxu3 }
 0x709   : > { %v4931_v60 = vpop.f32.mrf.mxu2 }
 0x70a   : > { %v4932_v25 = vadd.f32 %v4931_v60, %v4919_v29  ;;  %v4944_v58 = vpop.f32.mrf.mxu3 }
 0x70c   : > { %v4945_v31 = vadd.f32 %v4944_v58, %v4932_v25 }
 0x70e   : > { %v4948_v7 = vmax.f32 %v4945_v31, 0.0 }
 0x710   : > { %v4949_v10 = vpack.c.bf16 %v4948_v7, %v4948_v7 }
 0x711   : > { %v4933_v5 = vpop.f32.mrf.mxu2 }
 0x712   : > { %v4946_v56 = vpop.f32.mrf.mxu3  ;;  %5026 = vmatmul.bf16.vlgmr.msra.gmra.mxu3 %v4949_v10 }
 0x795   : > { %v5027_v54 = vpop.f32.mrf.mxu3 }
 0x796   : > { %v5028_v55 = vadd.f32 %v6883_v42, %v5027_v54 }
 0x798   : > { %v5031_v2 = vmax.f32 %v5028_v55, 0.0 }
 0x79a   : > { %v5032_v11 = vpack.c.bf16 %v5031_v2, %v5031_v2 }
 0x79c   : > { %5109 = vmatmul.bf16.vlgmr.msra.gmra.mxu2 %v5032_v11 }
 0x79d   : > { %v5029_v4 = vpop.f32.mrf.mxu3 }
 0x81f   : > { %v5110_v48 = vpop.f32.mrf.mxu2 }
 0x820   : > { %v5111_v21 = vadd.f32 %v6884_v9, %v5110_v48 }
 0x822   : > { %5114 = vst [vmem:[%s487_s26] sm:$0xff] %v5111_v21 }
 0x823   : > { %6912 = shalt.err (!%p6909_p3)
}
 0x824   : > { %6839 = dma.vmem_to_hbm [thread:$0]  (%p7071_p5), %s5129_s16, 128, %s5131_s17, %s5116_s0  }
 0x827   : > { %v5112_v53 = vpop.f32.mrf.mxu2 }
 0x828 PF: > { %s9101_s23 = sld [smem:[#allocation7_spill]]  ;;  %p6845_p4 = scmp.ge.s32.totalorder %s6947_s21, 2 }
 0x82a   : > { %p6842_p7 = pnand %p6845_p4, %p7075_p6 }
 0x82c   : > { %p6843_p8 = pneg %p6842_p7 }
 0x82e   : > { %s5142_s29 = sand.u32 1, %s9101_s23  }
 0x82f   : > { %s5143_s26 = scalar_lea.sflag [#allocation5], %s5142_s29 }
 0x830   : > { %6930 = dma.done.wait (%p6843_p8), %s5143_s26, 128  }
 0x831   : > { %6932 = vsyncadd (%p6843_p8), %s5143_s26, 4294967168  ;;  %s9103_s21 = sld [smem:[#allocation9_spill]]  ;;  %s9106_s18 = smov %s6939_s19 }
 0x832   : > { %s9104_s1 = sld [smem:[#allocation8_spill]] }
 0x833   : > { %s9105_s20 = sld [smem:[#allocation10_spill]] }
 0x837   : > { %p25_p9 = scmp.ge.s32.totalorder %s9103_s21, 4  }
 0x838   : > { %s9107_s19 = smov %s9104_s1 }
 0x839   :  { %27 = sbr.rel (!%p25_p9) target bundleno = 6 (0x6), region = 123 }
 0x83e   :  { %5149 = vsyncpa [#allocation5], 1 }
 0x83f   :  { %5151 = vsyncpa [#allocation5 + $0x1], 1 }

</bundles_post_ra>
